<compile_context>
chip_gen: v7x
topology: tpu7x:2x2x1
jax: 0.10.0
libtpu: 0.0.40
codegen_flags: <defaults>
</compile_context>

<pallas_src>
import jax
import jax.numpy as jnp
from jax import lax
from jax.experimental import pallas as pl
from jax.experimental.pallas import tpu as pltpu


# ------------------------------ fused block kernel ------------------------------ #

def _make_block_kernel(matmul_dtype):
    """Build the fused MiddleFLowBlock kernel. grid=(N, 3); u = program_id(1)."""

    def block_kernel(x_ref, dw_ref, pw_ref, sc_ref, bi_ref, o_ref, pad_ref, cur_ref):
        u = pl.program_id(1)                       # which of the 3 units
        H, W, C = cur_ref.shape

        @pl.when(u == 0)
        def _():
            # Zero the halo buffer once per image (border stays 0 for all 3 units)
            # and seed the running activation with the block input.
            pad_ref[...] = jnp.zeros_like(pad_ref)
            cur_ref[...] = x_ref[0].astype(jnp.float32)

        # ---- ReLU -> depthwise 3x3 (VPU) -> pointwise 1x1 (MXU) -> folded BN ----
        pad_ref[1:H + 1, 1:W + 1, :] = jnp.maximum(cur_ref[...], 0.0)

        dw = dw_ref[u]                             # (3, 3, C) depthwise taps, unit u
        acc = None
        for dy in range(3):                        # reuse one row view per dy
            row = pad_ref[dy:dy + H, :, :]         # (H, W+2, C)
            for dx in range(3):
                term = row[:, dx:dx + W, :] * dw[dy, dx, :]
                acc = term if acc is None else acc + term   # init from first tap

        y = jnp.dot(acc.reshape(H * W, C).astype(matmul_dtype),
                    pw_ref[u].astype(matmul_dtype),           # (C, C) = (in, out)
                    preferred_element_type=jnp.float32)
        y = y * sc_ref[u] + bi_ref[u]                         # folded BatchNorm
        cur_ref[...] = y.reshape(H, W, C)

        @pl.when(u == 2)
        def _():
            # PyTorch's nn.ReLU(inplace=True) inside conv1 mutates x, so the
            # identity shortcut carries relu(x).
            shortcut = jnp.maximum(x_ref[0].astype(jnp.float32), 0.0)
            o_ref[0] = (shortcut + cur_ref[...]).astype(o_ref.dtype)

    return block_kernel


def _fused_block(x, dw, pw, sc, bi, matmul_dtype):
    """x: (N, H, W, Cp) NHWC with Cp a multiple of 128; one pallas_call per block."""
    N, H, W, Cp = x.shape
    return pl.pallas_call(
        _make_block_kernel(matmul_dtype),
        out_shape=jax.ShapeDtypeStruct((N, H, W, Cp), x.dtype),
        grid=(N, 3),
        in_specs=[
            pl.BlockSpec((1, H, W, Cp), lambda n, u: (n, 0, 0, 0)),   # image n
            pl.BlockSpec((3, 3, 3, Cp), lambda n, u: (0, 0, 0, 0)),   # dw (resident)
            pl.BlockSpec((3, Cp, Cp), lambda n, u: (0, 0, 0)),        # pw (resident)
            pl.BlockSpec((3, 1, Cp), lambda n, u: (0, 0, 0)),         # BN scale
            pl.BlockSpec((3, 1, Cp), lambda n, u: (0, 0, 0)),         # BN bias
        ],
        out_specs=pl.BlockSpec((1, H, W, Cp), lambda n, u: (n, 0, 0, 0)),
        scratch_shapes=[
            pltpu.VMEM((H + 2, W + 2, Cp), jnp.float32),   # zero-bordered halo buffer
            pltpu.VMEM((H, W, Cp), jnp.float32),           # inter-unit activation
        ],
        compiler_params=pltpu.CompilerParams(
            dimension_semantics=("parallel", "arbitrary")),
    )(x, dw, pw, sc, bi)


# ---------------------------------- wrapper ---------------------------------- #

def _prepare_block_params(blk, Cp):
    """Stack the 3 units' parameters and zero-pad channels to Cp (lane-dense)."""
    dw = jnp.stack([blk[u][0] for u in ("u1", "u2", "u3")])              # (3,3,3,C)
    pw = jnp.stack([blk[u][1] for u in ("u1", "u2", "u3")])              # (3,C,C)
    sc = jnp.stack([blk[u][2] for u in ("u1", "u2", "u3")])[:, None, :]  # (3,1,C)
    bi = jnp.stack([blk[u][3] for u in ("u1", "u2", "u3")])[:, None, :]  # (3,1,C)
    C = dw.shape[-1]
    p = Cp - C
    if p:
        dw = jnp.pad(dw, ((0, 0), (0, 0), (0, 0), (0, p)))
        pw = jnp.pad(pw, ((0, 0), (0, p), (0, p)))
        sc = jnp.pad(sc, ((0, 0), (0, 0), (0, p)))
        bi = jnp.pad(bi, ((0, 0), (0, 0), (0, p)))
    return dw, pw, sc, bi


def middle_flow(x_nchw, all_params, matmul_dtype=jnp.float32):
    """NCHW in / NCHW out, like the PyTorch module stack."""
    N, C, H, W = x_nchw.shape
    Cp = max(128, ((C + 127) // 128) * 128)          # lane-dense channel padding
    x = jnp.transpose(x_nchw, (0, 2, 3, 1))          # NCHW -> NHWC (once)
    if Cp != C:
        x = jnp.pad(x, ((0, 0), (0, 0), (0, 0), (0, Cp - C)))
    for blk in all_params:
        dw, pw, sc, bi = _prepare_block_params(blk, Cp)
        x = _fused_block(x, dw, pw, sc, bi, matmul_dtype)
    if Cp != C:
        x = x[..., :C]
    return jnp.transpose(x, (0, 3, 1, 2))            # NHWC -> NCHW


# ------------------------- deterministic parameters ------------------------- #

def init_params(key, C, num_blocks=8, eps=1e-5):
    params = []
    for _ in range(num_blocks):
        blk = {}
        for u in ("u1", "u2", "u3"):
            key, k1, k2, k3, k4, k5, k6 = jax.random.split(key, 7)
            dw = 0.1 * jax.random.normal(k1, (3, 3, C), jnp.float32)
            # PyTorch pointwise conv weight is (C_out, C_in); store transposed (C_in, C_out).
            pw_t = jax.random.normal(k2, (C, C), jnp.float32) / jnp.sqrt(C)
            gamma = 1.0 + 0.1 * jax.random.normal(k3, (C,), jnp.float32)
            beta = 0.1 * jax.random.normal(k4, (C,), jnp.float32)
            rmean = 0.1 * jax.random.normal(k5, (C,), jnp.float32)
            rvar = 1.0 + 0.1 * jax.random.uniform(k6, (C,), jnp.float32)
            scale = gamma / jnp.sqrt(rvar + eps)
            bias = beta - rmean * scale
            blk[u] = (dw, pw_t, scale, bias)
        params.append(blk)
    return params


# ---------------------------- pure-JAX reference ---------------------------- #

def _ref_unit(x, dw, pw_t, scale, bias):
    C = x.shape[-1]
    r = jnp.maximum(x, 0.0)
    dn = lax.conv_dimension_numbers(x.shape, (3, 3, 1, C), ("NHWC", "HWIO", "NHWC"))
    d = lax.conv_general_dilated(r, dw.reshape(3, 3, 1, C), (1, 1), "SAME",
                                 dimension_numbers=dn, feature_group_count=C,
                                 precision=lax.Precision.HIGHEST)
    p = jnp.einsum("nhwc,cd->nhwd", d, pw_t, precision=lax.Precision.HIGHEST)
    return p * scale + bias


def middle_flow_ref(x_nchw, all_params):
    x = jnp.transpose(x_nchw, (0, 2, 3, 1))
    for p in all_params:
        r = _ref_unit(x, *p["u1"])
        r = _ref_unit(r, *p["u2"])
        r = _ref_unit(r, *p["u3"])
        x = jnp.maximum(x, 0.0) + r     # inplace ReLU aliases the shortcut in PyTorch
    return jnp.transpose(x, (0, 3, 1, 2))


# ----------------------------------- main ----------------------------------- #

if __name__ == "__main__":
    # Original Xception middle flow uses C=728 (padded to 768 in-kernel); small here.
    N, C, H, W = 2, 32, 16, 16
    key = jax.random.PRNGKey(0)
    kx, kp = jax.random.split(key)
    x = jax.random.normal(kx, (N, C, H, W), jnp.float32)     # NCHW, PyTorch layout
    params = init_params(kp, C, num_blocks=8)

    run = jax.jit(middle_flow, static_argnames=("matmul_dtype",))
    out = jax.block_until_ready(run(x, params))
    assert out.shape == (N, C, H, W) and out.dtype == jnp.float32

    ref = middle_flow_ref(x, params)
    rel_err = float(jnp.max(jnp.abs(out - ref)) / (jnp.max(jnp.abs(ref)) + 1e-6))
    # f32 end-to-end (tolerance leaves headroom for the MXU's f32 pass decomposition
    # differing from the HIGHEST-precision XLA reference across 24 stacked units).
    assert rel_err < 2e-2, f"mismatch vs reference: rel_err={rel_err}"

    print("KERNEL_OK")
</pallas_src>

<mosaic_0001>
module attributes {stable_mosaic.version = 11 : i64} {
  func.func @block_kernel(%arg0: i32, %arg1: i32, %arg2: memref<1x16x16x128xf32, #tpu.memory_space<vmem>>, %arg3: memref<3x3x3x128xf32, #tpu.memory_space<vmem>>, %arg4: memref<3x128x128xf32, #tpu.memory_space<vmem>>, %arg5: memref<3x1x128xf32, #tpu.memory_space<vmem>>, %arg6: memref<3x1x128xf32, #tpu.memory_space<vmem>>, %arg7: memref<1x16x16x128xf32, #tpu.memory_space<vmem>>, %arg8: memref<18x18x128xf32, #tpu.memory_space<vmem>>, %arg9: memref<16x16x128xf32, #tpu.memory_space<vmem>>) attributes {dimension_semantics = [#tpu.dimension_semantics<parallel>, #tpu.dimension_semantics<arbitrary>], iteration_bounds = array<i64: 2, 3>, scalar_prefetch = 0 : i64, scratch_operands = 2 : i64, tpu.core_type = #tpu.core_type<tc>, window_params = [{transform_indices = @transform_0, window_bounds = array<i64: 1, 16, 16, 128>}, {pipeline_mode = #tpu.pipeline_mode<synchronous>, transform_indices = @transform_1, window_bounds = array<i64: 3, 3, 3, 128>}, {pipeline_mode = #tpu.pipeline_mode<synchronous>, transform_indices = @transform_2, window_bounds = array<i64: 3, 128, 128>}, {pipeline_mode = #tpu.pipeline_mode<synchronous>, transform_indices = @transform_3, window_bounds = array<i64: 3, 1, 128>}, {pipeline_mode = #tpu.pipeline_mode<synchronous>, transform_indices = @transform_4, window_bounds = array<i64: 3, 1, 128>}, {transform_indices = @transform_5, window_bounds = array<i64: 1, 16, 16, 128>}]} {
    %c0_i32 = arith.constant 0 : i32
    %0 = arith.cmpi eq, %arg1, %c0_i32 : i32
    %1 = arith.extui %0 : i1 to i32
    %c0_i32_0 = arith.constant 0 : i32
    %2 = arith.cmpi ne, %1, %c0_i32_0 : i32
    scf.if %2 {
      %cst_27 = arith.constant 0.000000e+00 : f32
      %95 = vector.broadcast %cst_27 : f32 to vector<18x18x128xf32>
      %c0_28 = arith.constant 0 : index
      %c0_29 = arith.constant 0 : index
      %c0_30 = arith.constant 0 : index
      %96 = vector.load %arg8[%c0_28, %c0_29, %c0_30] : memref<18x18x128xf32, #tpu.memory_space<vmem>>, vector<18x18x128xf32>
      tpu.vector_store %arg8[%c0_28, %c0_29, %c0_30], %95 {strides = array<i32>} : memref<18x18x128xf32, #tpu.memory_space<vmem>>, vector<18x18x128xf32>,
      %c0_31 = arith.constant 0 : index
      %c0_32 = arith.constant 0 : index
      %c0_33 = arith.constant 0 : index
      %c0_34 = arith.constant 0 : index
      %97 = vector.load %arg2[%c0_31, %c0_32, %c0_33, %c0_34] : memref<1x16x16x128xf32, #tpu.memory_space<vmem>>, vector<1x16x16x128xf32>
      %98 = vector.shape_cast %97 : vector<1x16x16x128xf32> to vector<16x16x128xf32>
      %c0_35 = arith.constant 0 : index
      %c0_36 = arith.constant 0 : index
      %c0_37 = arith.constant 0 : index
      %99 = vector.load %arg9[%c0_35, %c0_36, %c0_37] : memref<16x16x128xf32, #tpu.memory_space<vmem>>, vector<16x16x128xf32>
      tpu.vector_store %arg9[%c0_35, %c0_36, %c0_37], %98 {strides = array<i32>} : memref<16x16x128xf32, #tpu.memory_space<vmem>>, vector<16x16x128xf32>,
    } else {
    }
    %c0 = arith.constant 0 : index
    %c0_1 = arith.constant 0 : index
    %c0_2 = arith.constant 0 : index
    %3 = vector.load %arg9[%c0, %c0_1, %c0_2] : memref<16x16x128xf32, #tpu.memory_space<vmem>>, vector<16x16x128xf32>
    %cst = arith.constant 0.000000e+00 : f32
    %4 = vector.broadcast %cst : f32 to vector<16x16x128xf32>
    %5 = arith.maximumf %3, %4 : vector<16x16x128xf32>
    %c1 = arith.constant 1 : index
    %c1_3 = arith.constant 1 : index
    %c0_4 = arith.constant 0 : index
    %6 = vector.load %arg8[%c1, %c1_3, %c0_4] : memref<18x18x128xf32, #tpu.memory_space<vmem>>, vector<16x16x128xf32>
    tpu.vector_store %arg8[%c1, %c1_3, %c0_4], %5 {strides = array<i32>} : memref<18x18x128xf32, #tpu.memory_space<vmem>>, vector<16x16x128xf32>,
    %7 = arith.index_cast %arg1 : i32 to index
    %c0_5 = arith.constant 0 : index
    %c0_6 = arith.constant 0 : index
    %c0_7 = arith.constant 0 : index
    %8 = vector.load %arg3[%7, %c0_5, %c0_6, %c0_7] : memref<3x3x3x128xf32, #tpu.memory_space<vmem>>, vector<1x3x3x128xf32>
    %9 = vector.shape_cast %8 : vector<1x3x3x128xf32> to vector<3x3x128xf32>
    %c0_8 = arith.constant 0 : index
    %c0_9 = arith.constant 0 : index
    %c0_10 = arith.constant 0 : index
    %10 = vector.load %arg8[%c0_8, %c0_9, %c0_10] : memref<18x18x128xf32, #tpu.memory_space<vmem>>, vector<16x18x128xf32>
    %11 = vector.extract_strided_slice %10 {offsets = [0, 0, 0], sizes = [16, 16, 128], strides = [1, 1, 1]} : vector<16x18x128xf32> to vector<16x16x128xf32>
    %12 = vector.extract_strided_slice %9 {offsets = [0, 0, 0], sizes = [1, 1, 128], strides = [1, 1, 1]} : vector<3x3x128xf32> to vector<1x1x128xf32>
    %13 = vector.shape_cast %12 : vector<1x1x128xf32> to vector<128xf32>
    %14 = vector.shape_cast %13 : vector<128xf32> to vector<1x1x128xf32>
    %15 = vector.broadcast %14 : vector<1x1x128xf32> to vector<16x16x128xf32>
    %16 = arith.mulf %11, %15 : vector<16x16x128xf32>
    %17 = vector.extract_strided_slice %10 {offsets = [0, 1, 0], sizes = [16, 16, 128], strides = [1, 1, 1]} : vector<16x18x128xf32> to vector<16x16x128xf32>
    %18 = vector.extract_strided_slice %9 {offsets = [0, 1, 0], sizes = [1, 1, 128], strides = [1, 1, 1]} : vector<3x3x128xf32> to vector<1x1x128xf32>
    %19 = vector.shape_cast %18 : vector<1x1x128xf32> to vector<128xf32>
    %20 = vector.shape_cast %19 : vector<128xf32> to vector<1x1x128xf32>
    %21 = vector.broadcast %20 : vector<1x1x128xf32> to vector<16x16x128xf32>
    %22 = arith.mulf %17, %21 : vector<16x16x128xf32>
    %23 = arith.addf %16, %22 : vector<16x16x128xf32>
    %24 = vector.extract_strided_slice %10 {offsets = [0, 2, 0], sizes = [16, 16, 128], strides = [1, 1, 1]} : vector<16x18x128xf32> to vector<16x16x128xf32>
    %25 = vector.extract_strided_slice %9 {offsets = [0, 2, 0], sizes = [1, 1, 128], strides = [1, 1, 1]} : vector<3x3x128xf32> to vector<1x1x128xf32>
    %26 = vector.shape_cast %25 : vector<1x1x128xf32> to vector<128xf32>
    %27 = vector.shape_cast %26 : vector<128xf32> to vector<1x1x128xf32>
    %28 = vector.broadcast %27 : vector<1x1x128xf32> to vector<16x16x128xf32>
    %29 = arith.mulf %24, %28 : vector<16x16x128xf32>
    %30 = arith.addf %23, %29 : vector<16x16x128xf32>
    %c1_11 = arith.constant 1 : index
    %c0_12 = arith.constant 0 : index
    %c0_13 = arith.constant 0 : index
    %31 = vector.load %arg8[%c1_11, %c0_12, %c0_13] : memref<18x18x128xf32, #tpu.memory_space<vmem>>, vector<16x18x128xf32>
    %32 = vector.extract_strided_slice %31 {offsets = [0, 0, 0], sizes = [16, 16, 128], strides = [1, 1, 1]} : vector<16x18x128xf32> to vector<16x16x128xf32>
    %33 = vector.extract_strided_slice %9 {offsets = [1, 0, 0], sizes = [1, 1, 128], strides = [1, 1, 1]} : vector<3x3x128xf32> to vector<1x1x128xf32>
    %34 = vector.shape_cast %33 : vector<1x1x128xf32> to vector<128xf32>
    %35 = vector.shape_cast %34 : vector<128xf32> to vector<1x1x128xf32>
    %36 = vector.broadcast %35 : vector<1x1x128xf32> to vector<16x16x128xf32>
    %37 = arith.mulf %32, %36 : vector<16x16x128xf32>
    %38 = arith.addf %30, %37 : vector<16x16x128xf32>
    %39 = vector.extract_strided_slice %31 {offsets = [0, 1, 0], sizes = [16, 16, 128], strides = [1, 1, 1]} : vector<16x18x128xf32> to vector<16x16x128xf32>
    %40 = vector.extract_strided_slice %9 {offsets = [1, 1, 0], sizes = [1, 1, 128], strides = [1, 1, 1]} : vector<3x3x128xf32> to vector<1x1x128xf32>
    %41 = vector.shape_cast %40 : vector<1x1x128xf32> to vector<128xf32>
    %42 = vector.shape_cast %41 : vector<128xf32> to vector<1x1x128xf32>
    %43 = vector.broadcast %42 : vector<1x1x128xf32> to vector<16x16x128xf32>
    %44 = arith.mulf %39, %43 : vector<16x16x128xf32>
    %45 = arith.addf %38, %44 : vector<16x16x128xf32>
    %46 = vector.extract_strided_slice %31 {offsets = [0, 2, 0], sizes = [16, 16, 128], strides = [1, 1, 1]} : vector<16x18x128xf32> to vector<16x16x128xf32>
    %47 = vector.extract_strided_slice %9 {offsets = [1, 2, 0], sizes = [1, 1, 128], strides = [1, 1, 1]} : vector<3x3x128xf32> to vector<1x1x128xf32>
    %48 = vector.shape_cast %47 : vector<1x1x128xf32> to vector<128xf32>
    %49 = vector.shape_cast %48 : vector<128xf32> to vector<1x1x128xf32>
    %50 = vector.broadcast %49 : vector<1x1x128xf32> to vector<16x16x128xf32>
    %51 = arith.mulf %46, %50 : vector<16x16x128xf32>
    %52 = arith.addf %45, %51 : vector<16x16x128xf32>
    %c2 = arith.constant 2 : index
    %c0_14 = arith.constant 0 : index
    %c0_15 = arith.constant 0 : index
    %53 = vector.load %arg8[%c2, %c0_14, %c0_15] : memref<18x18x128xf32, #tpu.memory_space<vmem>>, vector<16x18x128xf32>
    %54 = vector.extract_strided_slice %53 {offsets = [0, 0, 0], sizes = [16, 16, 128], strides = [1, 1, 1]} : vector<16x18x128xf32> to vector<16x16x128xf32>
    %55 = vector.extract_strided_slice %9 {offsets = [2, 0, 0], sizes = [1, 1, 128], strides = [1, 1, 1]} : vector<3x3x128xf32> to vector<1x1x128xf32>
    %56 = vector.shape_cast %55 : vector<1x1x128xf32> to vector<128xf32>
    %57 = vector.shape_cast %56 : vector<128xf32> to vector<1x1x128xf32>
    %58 = vector.broadcast %57 : vector<1x1x128xf32> to vector<16x16x128xf32>
    %59 = arith.mulf %54, %58 : vector<16x16x128xf32>
    %60 = arith.addf %52, %59 : vector<16x16x128xf32>
    %61 = vector.extract_strided_slice %53 {offsets = [0, 1, 0], sizes = [16, 16, 128], strides = [1, 1, 1]} : vector<16x18x128xf32> to vector<16x16x128xf32>
    %62 = vector.extract_strided_slice %9 {offsets = [2, 1, 0], sizes = [1, 1, 128], strides = [1, 1, 1]} : vector<3x3x128xf32> to vector<1x1x128xf32>
    %63 = vector.shape_cast %62 : vector<1x1x128xf32> to vector<128xf32>
    %64 = vector.shape_cast %63 : vector<128xf32> to vector<1x1x128xf32>
    %65 = vector.broadcast %64 : vector<1x1x128xf32> to vector<16x16x128xf32>
    %66 = arith.mulf %61, %65 : vector<16x16x128xf32>
    %67 = arith.addf %60, %66 : vector<16x16x128xf32>
    %68 = vector.extract_strided_slice %53 {offsets = [0, 2, 0], sizes = [16, 16, 128], strides = [1, 1, 1]} : vector<16x18x128xf32> to vector<16x16x128xf32>
    %69 = vector.extract_strided_slice %9 {offsets = [2, 2, 0], sizes = [1, 1, 128], strides = [1, 1, 1]} : vector<3x3x128xf32> to vector<1x1x128xf32>
    %70 = vector.shape_cast %69 : vector<1x1x128xf32> to vector<128xf32>
    %71 = vector.shape_cast %70 : vector<128xf32> to vector<1x1x128xf32>
    %72 = vector.broadcast %71 : vector<1x1x128xf32> to vector<16x16x128xf32>
    %73 = arith.mulf %68, %72 : vector<16x16x128xf32>
    %74 = arith.addf %67, %73 : vector<16x16x128xf32>
    %75 = vector.shape_cast %74 : vector<16x16x128xf32> to vector<256x128xf32>
    %76 = arith.index_cast %arg1 : i32 to index
    %c0_16 = arith.constant 0 : index
    %c0_17 = arith.constant 0 : index
    %77 = vector.load %arg4[%76, %c0_16, %c0_17] : memref<3x128x128xf32, #tpu.memory_space<vmem>>, vector<1x128x128xf32>
    %78 = vector.shape_cast %77 : vector<1x128x128xf32> to vector<128x128xf32>
    %cst_18 = arith.constant dense<0.000000e+00> : vector<256x128xf32>
    %79 = tpu.matmul %75, %78, %cst_18 {dimension_numbers = #tpu.dot_dimension_numbers<[1], [0], [0], [1], [0, 0, 1, 1], [], []>} : vector<256x128xf32>, vector<128x128xf32>, vector<256x128xf32> -> vector<256x128xf32>
    %80 = arith.index_cast %arg1 : i32 to index
    %c0_19 = arith.constant 0 : index
    %c0_20 = arith.constant 0 : index
    %81 = vector.load %arg5[%80, %c0_19, %c0_20] : memref<3x1x128xf32, #tpu.memory_space<vmem>>, vector<1x1x128xf32>
    %82 = vector.shape_cast %81 : vector<1x1x128xf32> to vector<1x128xf32>
    %83 = vector.broadcast %82 : vector<1x128xf32> to vector<256x128xf32>
    %84 = arith.mulf %79, %83 : vector<256x128xf32>
    %85 = arith.index_cast %arg1 : i32 to index
    %c0_21 = arith.constant 0 : index
    %c0_22 = arith.constant 0 : index
    %86 = vector.load %arg6[%85, %c0_21, %c0_22] : memref<3x1x128xf32, #tpu.memory_space<vmem>>, vector<1x1x128xf32>
    %87 = vector.shape_cast %86 : vector<1x1x128xf32> to vector<1x128xf32>
    %88 = vector.broadcast %87 : vector<1x128xf32> to vector<256x128xf32>
    %89 = arith.addf %84, %88 : vector<256x128xf32>
    %90 = vector.shape_cast %89 : vector<256x128xf32> to vector<16x16x128xf32>
    %c0_23 = arith.constant 0 : index
    %c0_24 = arith.constant 0 : index
    %c0_25 = arith.constant 0 : index
    %91 = vector.load %arg9[%c0_23, %c0_24, %c0_25] : memref<16x16x128xf32, #tpu.memory_space<vmem>>, vector<16x16x128xf32>
    tpu.vector_store %arg9[%c0_23, %c0_24, %c0_25], %90 {strides = array<i32>} : memref<16x16x128xf32, #tpu.memory_space<vmem>>, vector<16x16x128xf32>,
    %c2_i32 = arith.constant 2 : i32
    %92 = arith.cmpi eq, %arg1, %c2_i32 : i32
    %93 = arith.extui %92 : i1 to i32
    %c0_i32_26 = arith.constant 0 : i32
    %94 = arith.cmpi ne, %93, %c0_i32_26 : i32
    scf.if %94 {
      %c0_27 = arith.constant 0 : index
      %c0_28 = arith.constant 0 : index
      %c0_29 = arith.constant 0 : index
      %c0_30 = arith.constant 0 : index
      %95 = vector.load %arg2[%c0_27, %c0_28, %c0_29, %c0_30] : memref<1x16x16x128xf32, #tpu.memory_space<vmem>>, vector<1x16x16x128xf32>
      %96 = vector.shape_cast %95 : vector<1x16x16x128xf32> to vector<16x16x128xf32>
      %cst_31 = arith.constant 0.000000e+00 : f32
      %97 = vector.broadcast %cst_31 : f32 to vector<16x16x128xf32>
      %98 = arith.maximumf %96, %97 : vector<16x16x128xf32>
      %c0_32 = arith.constant 0 : index
      %c0_33 = arith.constant 0 : index
      %c0_34 = arith.constant 0 : index
      %99 = vector.load %arg9[%c0_32, %c0_33, %c0_34] : memref<16x16x128xf32, #tpu.memory_space<vmem>>, vector<16x16x128xf32>
      %100 = arith.addf %98, %99 : vector<16x16x128xf32>
      %c0_35 = arith.constant 0 : index
      %c0_36 = arith.constant 0 : index
      %c0_37 = arith.constant 0 : index
      %c0_38 = arith.constant 0 : index
      %101 = vector.load %arg7[%c0_35, %c0_36, %c0_37, %c0_38] : memref<1x16x16x128xf32, #tpu.memory_space<vmem>>, vector<1x16x16x128xf32>
      %102 = vector.shape_cast %101 : vector<1x16x16x128xf32> to vector<16x16x128xf32>
      %103 = vector.shape_cast %100 : vector<16x16x128xf32> to vector<1x16x16x128xf32>
      tpu.vector_store %arg7[%c0_35, %c0_36, %c0_37, %c0_38], %103 {strides = array<i32>} : memref<1x16x16x128xf32, #tpu.memory_space<vmem>>, vector<1x16x16x128xf32>,
    } else {
    }
    return
  }
  func.func @transform_0(%arg0: i32, %arg1: i32) -> (i32, i32, i32, i32) {
    %c0_i32 = arith.constant 0 : i32
    %c0_i32_0 = arith.constant 0 : i32
    %c0_i32_1 = arith.constant 0 : i32
    %c0_i32_2 = arith.constant 0 : i32
    return %arg0, %c0_i32, %c0_i32_0, %c0_i32_1 : i32, i32, i32, i32
  }
  func.func @transform_1(%arg0: i32, %arg1: i32) -> (i32, i32, i32, i32) {
    %c0_i32 = arith.constant 0 : i32
    %c0_i32_0 = arith.constant 0 : i32
    %c0_i32_1 = arith.constant 0 : i32
    %c0_i32_2 = arith.constant 0 : i32
    %c0_i32_3 = arith.constant 0 : i32
    return %c0_i32, %c0_i32_0, %c0_i32_1, %c0_i32_2 : i32, i32, i32, i32
  }
  func.func @transform_2(%arg0: i32, %arg1: i32) -> (i32, i32, i32) {
    %c0_i32 = arith.constant 0 : i32
    %c0_i32_0 = arith.constant 0 : i32
    %c0_i32_1 = arith.constant 0 : i32
    %c0_i32_2 = arith.constant 0 : i32
    return %c0_i32, %c0_i32_0, %c0_i32_1 : i32, i32, i32
  }
  func.func @transform_3(%arg0: i32, %arg1: i32) -> (i32, i32, i32) {
    %c0_i32 = arith.constant 0 : i32
    %c0_i32_0 = arith.constant 0 : i32
    %c0_i32_1 = arith.constant 0 : i32
    %c0_i32_2 = arith.constant 0 : i32
    return %c0_i32, %c0_i32_0, %c0_i32_1 : i32, i32, i32
  }
  func.func @transform_4(%arg0: i32, %arg1: i32) -> (i32, i32, i32) {
    %c0_i32 = arith.constant 0 : i32
    %c0_i32_0 = arith.constant 0 : i32
    %c0_i32_1 = arith.constant 0 : i32
    %c0_i32_2 = arith.constant 0 : i32
    return %c0_i32, %c0_i32_0, %c0_i32_1 : i32, i32, i32
  }
  func.func @transform_5(%arg0: i32, %arg1: i32) -> (i32, i32, i32, i32) {
    %c0_i32 = arith.constant 0 : i32
    %c0_i32_0 = arith.constant 0 : i32
    %c0_i32_1 = arith.constant 0 : i32
    %c0_i32_2 = arith.constant 0 : i32
    return %arg0, %c0_i32, %c0_i32_0, %c0_i32_1 : i32, i32, i32, i32
  }
}

</mosaic_0001>

<bundles_post_ra>
// kernel: middle_flow.8
= control target key start
LH: loop header
LB: loop body
LE: loop exit
PB: predicated region body
PF: predicated region fallthrough
CT: control target
= control target key end

     0   :  { %s3141_s18 = smov 0   ;;  %s3143_s19 = smov 0   ;;  %s5074_s0 = inlined_call_operand.vmem [shape: f32[2,16,16,128], index: 0, kind: input, shape index: {}]   ;;  %s5075_s1 = inlined_call_operand.vmem [shape: f32[3,3,3,128], index: 1, kind: input, shape index: {}]   ;;  %s5076_s2 = inlined_call_operand.vmem [shape: f32[3,128,128], index: 2, kind: input, shape index: {}]   ;;  %s5077_s3 = inlined_call_operand.vmem [shape: f32[3,1,128], index: 3, kind: input, shape index: {}]   ;;  %s5078_s4 = inlined_call_operand.vmem [shape: f32[3,1,128], index: 4, kind: input, shape index: {}]   ;;  %s5079_s5 = inlined_call_operand.vmem [shape: f32[2,16,16,128], index: 5, kind: output, shape index: {}]  }
   0x1   :  { %s3145_s20 = smov 0   ;;  %s3147_s21 = smov 0  }
   0x2   :  { %s3149_s22 = smov 0  }
   0x3 LB: > { %s24_s23 = sadd.s32 1, %s3100_s20  ;;  %s27_s24 = sadd.s32 1, %s3104_s21  ;;  %s3108_s22 = sphi %s3149_s22, %s15_s22   ;;  %s3104_s21 = sphi %s3147_s21, %s5105_s21   ;;  %s3100_s20 = sphi %s3145_s20, %s5104_s20   ;;  %s3096_s19 = sphi %s3143_s19, %s5103_s19   ;;  %s3092_s18 = sphi %s3141_s18, %s5102_s18  }
   0x4   : > { %p25_p0 = scmp.ge.s32.totalorder %s24_s23, 3  ;;  %p2839_p1 = scmp.ge.s32.totalorder %s3108_s22, 1 }
   0x5   : > { %p199_p2 = scmp.lt.s32.totalorder %s3108_s22, 7 }
   0x6   : > { %s5107_s23 = smov (%p25_p0, %s24_s23), 0  ;;  %s5109_s24 = smov (!%p25_p0, %s27_s24), %s3104_s21 }
   0x7   : > { %p200_p3 = pnand %p2839_p1, %p199_p2  ;;  %p29_p4 = scmp.ge.s32.totalorder %s5109_s24, 2 }
   0x8   : > { %p227_p5 = scmp.lt.s32.totalorder (!%p200_p3), %s3096_s19, 1  ;;  %p2844_p6 = scmp.ne.s32.totalorder (!%p200_p3), %s3092_s18, 0 }
   0x9   : > { %s5111_s24 = smov (%p29_p4, %s5109_s24), 0  ;;  %203 = sbr.rel (%p200_p3) target bundleno = 601 (0x259), region = 40 }
  0x10   : > { %s5113_s19 = smov (!%p227_p5, %s3096_s19), 1  ;;  %240 = sbr.rel (%p2844_p6) target bundleno = 62 (0x3e), region = 44 }
  0x11   : > { %s2851_s25 = sshll.u32 %s5113_s19, 8  ;;  %v3110_v3 = vmov (!%p2844_p6), 0.0  }
  0x12   : > { %s3176_s28 = scalar_lea.vmem %s5074_s0, %s2851_s25  ;;  %s3181_s6 = scalar_lea.vmem %s5079_s5, %s2851_s25  ;;  %241 = vst [vmem:[#allocation2] sm:$0xff] (!%p2844_p6), %v3110_v3  ;;  %242 = vst [vmem:[#allocation2 + $0x8] sm:$0xff] (!%p2844_p6), %v3110_v3 }
  0x13   : > { %v295_v0 = vld [vmem:[%s3176_s28] sm:$0xff] (!%p2844_p6)  ;;  %v296_v1 = vld [vmem:[%s3176_s28 + $0x8] sm:$0xff] (!%p2844_p6)  ;;  %v297_v2 = vld [vmem:[%s3176_s28 + $0x10] sm:$0xff] (!%p2844_p6)  ;;  %243 = vst [vmem:[#allocation2 + $0x10] sm:$0x3] (!%p2844_p6), %v3110_v3 }
  0x14   : > { %244 = vst [vmem:[#allocation2 + $0x18] sm:$0xff] (!%p2844_p6), %v3110_v3  ;;  %245 = vst [vmem:[#allocation2 + $0x20] sm:$0xff] (!%p2844_p6), %v3110_v3  ;;  %v298_v4 = vld [vmem:[%s3176_s28 + $0x18] sm:$0xff] (!%p2844_p6)  ;;  %v299_v5 = vld [vmem:[%s3176_s28 + $0x20] sm:$0xff] (!%p2844_p6) }
  0x15   : > { %246 = vst [vmem:[#allocation2 + $0x28] sm:$0x3] (!%p2844_p6), %v3110_v3  ;;  %247 = vst [vmem:[#allocation2 + $0x30] sm:$0xff] (!%p2844_p6), %v3110_v3  ;;  %v300_v6 = vld [vmem:[%s3176_s28 + $0x28] sm:$0xff] (!%p2844_p6)  ;;  %v301_v7 = vld [vmem:[%s3176_s28 + $0x30] sm:$0xff] (!%p2844_p6) }
  0x16   : > { %248 = vst [vmem:[#allocation2 + $0x38] sm:$0xff] (!%p2844_p6), %v3110_v3  ;;  %249 = vst [vmem:[#allocation2 + $0x40] sm:$0x3] (!%p2844_p6), %v3110_v3  ;;  %v302_v8 = vld [vmem:[%s3176_s28 + $0x38] sm:$0xff] (!%p2844_p6)  ;;  %v303_v9 = vld [vmem:[%s3176_s28 + $0x40] sm:$0xff] (!%p2844_p6) }
  0x17   : > { %250 = vst [vmem:[#allocation2 + $0x48] sm:$0xff] %v3110_v3  ;;  %251 = vst [vmem:[#allocation2 + $0x50] sm:$0xff] %v3110_v3  ;;  %v304_v10 = vld [vmem:[%s3176_s28 + $0x48] sm:$0xff]  ;;  %v305_v11 = vld [vmem:[%s3176_s28 + $0x50] sm:$0xff] }
  0x18   : > { %252 = vst [vmem:[#allocation2 + $0x58] sm:$0x3] %v3110_v3  ;;  %253 = vst [vmem:[#allocation2 + $0x60] sm:$0xff] %v3110_v3  ;;  %v306_v12 = vld [vmem:[%s3176_s28 + $0x58] sm:$0xff]  ;;  %v307_v13 = vld [vmem:[%s3176_s28 + $0x60] sm:$0xff] }
  0x19   : > { %254 = vst [vmem:[#allocation2 + $0x68] sm:$0xff] %v3110_v3  ;;  %255 = vst [vmem:[#allocation2 + $0x70] sm:$0x3] %v3110_v3  ;;  %v308_v14 = vld [vmem:[%s3176_s28 + $0x68] sm:$0xff]  ;;  %v309_v15 = vld [vmem:[%s3176_s28 + $0x70] sm:$0xff] }
  0x1a   : > { %256 = vst [vmem:[#allocation2 + $0x78] sm:$0xff] %v3110_v3  ;;  %257 = vst [vmem:[#allocation2 + $0x80] sm:$0xff] %v3110_v3  ;;  %v310_v16 = vld [vmem:[%s3176_s28 + $0x78] sm:$0xff]  ;;  %v311_v17 = vld [vmem:[%s3176_s28 + $0x80] sm:$0xff] }
  0x1b   : > { %258 = vst [vmem:[#allocation2 + $0x88] sm:$0x3] %v3110_v3  ;;  %259 = vst [vmem:[#allocation2 + $0x90] sm:$0xff] %v3110_v3  ;;  %v312_v18 = vld [vmem:[%s3176_s28 + $0x88] sm:$0xff]  ;;  %v313_v19 = vld [vmem:[%s3176_s28 + $0x90] sm:$0xff] }
  0x1c   : > { %260 = vst [vmem:[#allocation2 + $0x98] sm:$0xff] %v3110_v3  ;;  %261 = vst [vmem:[#allocation2 + $0xa0] sm:$0x3] %v3110_v3  ;;  %v314_v20 = vld [vmem:[%s3176_s28 + $0x98] sm:$0xff]  ;;  %v315_v21 = vld [vmem:[%s3176_s28 + $0xa0] sm:$0xff] }
  0x1d   : > { %262 = vst [vmem:[#allocation2 + $0xa8] sm:$0xff] %v3110_v3  ;;  %263 = vst [vmem:[#allocation2 + $0xb0] sm:$0xff] %v3110_v3  ;;  %v316_v22 = vld [vmem:[%s3176_s28 + $0xa8] sm:$0xff]  ;;  %v317_v23 = vld [vmem:[%s3176_s28 + $0xb0] sm:$0xff] }
  0x1e   : > { %264 = vst [vmem:[#allocation2 + $0xb8] sm:$0x3] %v3110_v3  ;;  %265 = vst [vmem:[#allocation2 + $0xc0] sm:$0xff] %v3110_v3  ;;  %v318_v24 = vld [vmem:[%s3176_s28 + $0xb8] sm:$0xff]  ;;  %v319_v25 = vld [vmem:[%s3176_s28 + $0xc0] sm:$0xff] }
  0x1f   : > { %266 = vst [vmem:[#allocation2 + $0xc8] sm:$0xff] %v3110_v3  ;;  %267 = vst [vmem:[#allocation2 + $0xd0] sm:$0x3] %v3110_v3  ;;  %v320_v26 = vld [vmem:[%s3176_s28 + $0xc8] sm:$0xff]  ;;  %v321_v27 = vld [vmem:[%s3176_s28 + $0xd0] sm:$0xff] }
  0x20   : > { %268 = vst [vmem:[#allocation2 + $0xd8] sm:$0xff] %v3110_v3  ;;  %269 = vst [vmem:[#allocation2 + $0xe0] sm:$0xff] %v3110_v3  ;;  %v322_v28 = vld [vmem:[%s3176_s28 + $0xd8] sm:$0xff]  ;;  %v323_v29 = vld [vmem:[%s3176_s28 + $0xe0] sm:$0xff] }
  0x21   : > { %270 = vst [vmem:[#allocation2 + $0xe8] sm:$0x3] %v3110_v3  ;;  %271 = vst [vmem:[#allocation2 + $0xf0] sm:$0xff] %v3110_v3  ;;  %v324_v30 = vld [vmem:[%s3176_s28 + $0xe8] sm:$0xff]  ;;  %v325_v31 = vld [vmem:[%s3176_s28 + $0xf0] sm:$0xff] }
  0x22   : > { %272 = vst [vmem:[#allocation2 + $0xf8] sm:$0xff] %v3110_v3  ;;  %273 = vst [vmem:[#allocation2 + $0x100] sm:$0x3] %v3110_v3  ;;  %v326_v32 = vld [vmem:[%s3176_s28 + $0xf8] sm:$0xff] }
  0x23   : > { %274 = vst [vmem:[#allocation2 + $0x108] sm:$0xff] %v3110_v3  ;;  %275 = vst [vmem:[#allocation2 + $0x110] sm:$0xff] %v3110_v3 }
  0x24   : > { %276 = vst [vmem:[#allocation2 + $0x118] sm:$0x3] %v3110_v3  ;;  %277 = vst [vmem:[#allocation2 + $0x120] sm:$0xff] %v3110_v3 }
  0x25   : > { %278 = vst [vmem:[#allocation2 + $0x128] sm:$0xff] %v3110_v3  ;;  %279 = vst [vmem:[#allocation2 + $0x130] sm:$0x3] %v3110_v3 }
  0x26   : > { %280 = vst [vmem:[#allocation2 + $0x138] sm:$0xff] %v3110_v3  ;;  %281 = vst [vmem:[#allocation2 + $0x140] sm:$0xff] %v3110_v3 }
  0x27   : > { %282 = vst [vmem:[#allocation2 + $0x148] sm:$0x3] %v3110_v3  ;;  %283 = vst [vmem:[#allocation2 + $0x150] sm:$0xff] %v3110_v3 }
  0x28   : > { %284 = vst [vmem:[#allocation2 + $0x158] sm:$0xff] %v3110_v3  ;;  %285 = vst [vmem:[#allocation2 + $0x160] sm:$0x3] %v3110_v3 }
  0x29   : > { %286 = vst [vmem:[#allocation2 + $0x168] sm:$0xff] %v3110_v3  ;;  %287 = vst [vmem:[#allocation2 + $0x170] sm:$0xff] %v3110_v3 }
  0x2a   : > { %288 = vst [vmem:[#allocation2 + $0x178] sm:$0x3] %v3110_v3  ;;  %289 = vst [vmem:[#allocation2 + $0x180] sm:$0xff] %v3110_v3 }
  0x2b   : > { %290 = vst [vmem:[#allocation2 + $0x188] sm:$0xff] %v3110_v3  ;;  %291 = vst [vmem:[#allocation2 + $0x190] sm:$0x3] %v3110_v3 }
  0x2c   : > { %292 = vst [vmem:[#allocation2 + $0x198] sm:$0xff] %v3110_v3  ;;  %293 = vst [vmem:[#allocation2 + $0x1a0] sm:$0xff] %v3110_v3 }
  0x2d   : > { %294 = vst [vmem:[#allocation2 + $0x1a8] sm:$0x3] %v3110_v3  ;;  %327 = vst [vmem:[#allocation3] sm:$0xff] %v295_v0 }
  0x2e   : > { %328 = vst [vmem:[#allocation3 + $0x8] sm:$0xff] %v296_v1  ;;  %329 = vst [vmem:[#allocation3 + $0x10] sm:$0xff] %v297_v2 }
  0x2f   : > { %330 = vst [vmem:[#allocation3 + $0x18] sm:$0xff] %v298_v4  ;;  %331 = vst [vmem:[#allocation3 + $0x20] sm:$0xff] %v299_v5 }
  0x30   : > { %332 = vst [vmem:[#allocation3 + $0x28] sm:$0xff] %v300_v6  ;;  %333 = vst [vmem:[#allocation3 + $0x30] sm:$0xff] %v301_v7 }
  0x31   : > { %334 = vst [vmem:[#allocation3 + $0x38] sm:$0xff] %v302_v8  ;;  %335 = vst [vmem:[#allocation3 + $0x40] sm:$0xff] %v303_v9 }
  0x32   : > { %336 = vst [vmem:[#allocation3 + $0x48] sm:$0xff] %v304_v10  ;;  %337 = vst [vmem:[#allocation3 + $0x50] sm:$0xff] %v305_v11 }
  0x33   : > { %338 = vst [vmem:[#allocation3 + $0x58] sm:$0xff] %v306_v12  ;;  %339 = vst [vmem:[#allocation3 + $0x60] sm:$0xff] %v307_v13 }
  0x34   : > { %340 = vst [vmem:[#allocation3 + $0x68] sm:$0xff] %v308_v14  ;;  %341 = vst [vmem:[#allocation3 + $0x70] sm:$0xff] %v309_v15 }
  0x35   : > { %342 = vst [vmem:[#allocation3 + $0x78] sm:$0xff] %v310_v16  ;;  %343 = vst [vmem:[#allocation3 + $0x80] sm:$0xff] %v311_v17 }
  0x36   : > { %344 = vst [vmem:[#allocation3 + $0x88] sm:$0xff] %v312_v18  ;;  %345 = vst [vmem:[#allocation3 + $0x90] sm:$0xff] %v313_v19 }
  0x37   : > { %346 = vst [vmem:[#allocation3 + $0x98] sm:$0xff] %v314_v20  ;;  %347 = vst [vmem:[#allocation3 + $0xa0] sm:$0xff] %v315_v21 }
  0x38   : > { %348 = vst [vmem:[#allocation3 + $0xa8] sm:$0xff] %v316_v22  ;;  %349 = vst [vmem:[#allocation3 + $0xb0] sm:$0xff] %v317_v23 }
  0x39   : > { %350 = vst [vmem:[#allocation3 + $0xb8] sm:$0xff] %v318_v24  ;;  %351 = vst [vmem:[#allocation3 + $0xc0] sm:$0xff] %v319_v25 }
  0x3a   : > { %352 = vst [vmem:[#allocation3 + $0xc8] sm:$0xff] %v320_v26  ;;  %353 = vst [vmem:[#allocation3 + $0xd0] sm:$0xff] %v321_v27 }
  0x3b   : > { %354 = vst [vmem:[#allocation3 + $0xd8] sm:$0xff] %v322_v28  ;;  %355 = vst [vmem:[#allocation3 + $0xe0] sm:$0xff] %v323_v29 }
  0x3c   : > { %356 = vst [vmem:[#allocation3 + $0xe8] sm:$0xff] %v324_v30  ;;  %357 = vst [vmem:[#allocation3 + $0xf0] sm:$0xff] %v325_v31 }
  0x3d   : > { %358 = vst [vmem:[#allocation3 + $0xf8] sm:$0xff] %v326_v32 }
  0x3e PF: > { %s2845_s7 = sshll.u32 %s3092_s18, 7  ;;  %v359_v33 = vld [vmem:[#allocation3] sm:$0xff]  ;;  %v360_v34 = vld [vmem:[#allocation3 + $0x8] sm:$0xff]  ;;  %v361_v35 = vld [vmem:[#allocation3 + $0x10] sm:$0xff]  ;;  %s456_s8 = smul.u32 12, %s3092_s18  ;;  %v509_v36 = vlaneseq  ;;  %vm645_vm0 = vcmask 1046528  }
  0x3f   : > { %s3221_s11 = scalar_lea.vmem %s5076_s2, %s2845_s7  ;;  %v362_v37 = vld [vmem:[#allocation3 + $0x18] sm:$0xff]  ;;  %v391_v38 = vmax.f32 %v359_v33, 0.0  ;;  %v392_v39 = vmax.f32 %v360_v34, 0.0  ;;  %v393_v40 = vmax.f32 %v361_v35, 0.0  ;;  %vm890_vm1 = vcmask 1045504   ;;  %v373_v14 = vld [vmem:[#allocation3 + $0x70] sm:$0xff]  ;;  %s2487_s17 = scalar_lea.vmem %s5077_s3, %s3092_s18 }
  0x40   : > { %v2246_v41 = vld [vmem:[%s3221_s11] sm:$0xff]  ;;  %v2247_v42 = vld [vmem:[%s3221_s11 + $0x8] sm:$0xff]  ;;  %v2248_v43 = vld [vmem:[%s3221_s11 + $0x10] sm:$0xff]  ;;  %v394_v44 = vmax.f32 %v362_v37, 0.0  ;;  %v510_v45 = vshrl.u32 %v509_v36, 7  ;;  %s457_s14 = scalar_lea.vmem %s5075_s1, %s456_s8  ;;  %v405_v24 = vmax.f32 %v373_v14, 0.0  ;;  %s2527_s26 = scalar_lea.vmem %s5078_s4, %s3092_s18 }
  0x41   : > { %v2981_v46 = vpack.c.bf16 %v2247_v42, %v2246_v41  ;;  %v2249_v47 = vld [vmem:[%s3221_s11 + $0x18] sm:$0xff]  ;;  %v2250_v48 = vld [vmem:[%s3221_s11 + $0x20] sm:$0xff]  ;;  %v2251_v49 = vld [vmem:[%s3221_s11 + $0x28] sm:$0xff]  ;;  %424 = vst [vmem:[#allocation2 + $0x19] sm:$0xff] %v391_v38  ;;  %p2848_p7 = scmp.ne.s32.totalorder %s3092_s18, 2 }
  0x42   : > { %425 = vst [vmem:[#allocation2 + $0x21] sm:$0xff] %v392_v39  ;;  %426 = vst [vmem:[#allocation2 + $0x31] sm:$0xff] %v393_v40  ;;  %v2985_v50 = vpack.c.bf16 %v2249_v47, %v2248_v43  ;;  %v2252_v51 = vld [vmem:[%s3221_s11 + $0x30] sm:$0xff]  ;;  %v2253_v52 = vld [vmem:[%s3221_s11 + $0x38] sm:$0xff]  ;;  %v511_v54 = vsub.s32 0, %v510_v45  ;;  %v3235_v55 = vsub.s32 1, %v510_v45  ;;  %v2989_v62 = vpack.c.bf16 %v2251_v49, %v2250_v48 }
  0x43   : > { %v2254_v53 = vld [vmem:[%s3221_s11 + $0x40] sm:$0xff]  ;;  %427 = vst [vmem:[#allocation2 + $0x39] sm:$0xff] %v394_v44  ;;  %2982 = vmatprep.subr.bf16.mxu0 %v2981_v46  ;;  %3013 = vmatprep.subr.bf16.mxu1 %v2981_v46  ;;  %v2255_v56 = vld [vmem:[%s3221_s11 + $0x48] sm:$0xff]  ;;  %v2256_v57 = vld [vmem:[%s3221_s11 + $0x50] sm:$0xff]  ;;  %v3242_v61 = vsub.s32 2, %v510_v45  ;;  %v3244_v63 = vpack.c.bf16 %v2253_v52, %v2252_v51 }
  0x44   : > { %v2257_v58 = vld [vmem:[%s3221_s11 + $0x58] sm:$0xff]  ;;  %v461_v59 = vld [vmem:[#allocation2] sm:$0xff]  ;;  %v3240_v60 = vld [vmem:[#allocation2 + $0x8] sm:$0xff]  ;;  %2984 = vmatpush3.bf16.msra.mxu0 %v2981_v46  ;;  %3021 = vmatpush3.bf16.msra.mxu1 %v2981_v46  ;;  %v3249_v3 = vpack.c.bf16 %v2255_v56, %v2254_v53  ;;  %438 = vst [vmem:[#allocation2 + $0xc1] sm:$0xff] %v405_v24 }
  0x45   : > { %v2258_v0 = vld [vmem:[%s3221_s11 + $0x60] sm:$0xff]  ;;  %v2259_v1 = vld [vmem:[%s3221_s11 + $0x68] sm:$0xff]  ;;  %v2260_v2 = vld [vmem:[%s3221_s11 + $0x70] sm:$0xff]  ;;  %2986 = vmatprep.subr.bf16.mxu0 %v2985_v50  ;;  %3014 = vmatprep.subr.bf16.mxu1 %v2985_v50  ;;  %v3251_v4 = vpack.c.bf16 %v2257_v58, %v2256_v57 }
  0x46   : > { %v3253_v5 = vpack.c.bf16 %v2259_v1, %v2258_v0  ;;  %v2261_v6 = vld [vmem:[%s3221_s11 + $0x78] sm:$0xff]  ;;  %v458_v7 = vld [vmem:[%s457_s14] sm:$0x7]  ;;  %v459_v8 = vld [vmem:[%s457_s14 + $0x4] sm:$0x7] }
  0x47   : > { %v3256_v9 = vpack.c.bf16 %v2261_v6, %v2260_v2  ;;  %v460_v10 = vld [vmem:[%s457_s14 + $0x8] sm:$0x7]  ;;  %v3258_v11 = vrot.slane %v458_v7, %v511_v54  ;;  %v3261_v12 = vrot.slane %v458_v7, %v3235_v55  ;;  %v3264_v13 = vrot.slane %v458_v7, %v3242_v61  ;;  %v375_v39 = vld [vmem:[#allocation3 + $0x80] sm:$0xff]  ;;  %v376_v44 = vld [vmem:[#allocation3 + $0x88] sm:$0xff] }
  0x48   : > { %v374_v15 = vld [vmem:[#allocation3 + $0x78] sm:$0xff]  ;;  %v3266_v16 = vrot.slane %v459_v8, %v511_v54  ;;  %v3269_v17 = vrot.slane %v459_v8, %v3235_v55  ;;  %v3272_v18 = vrot.slane %v459_v8, %v3242_v61  ;;  %v3274_v19 = vrot.slane %v460_v10, %v511_v54  ;;  %2988 = vmatpush3.bf16.msra.mxu0 %v2985_v50  ;;  %v3282_v23 = vld [vmem:[#allocation2 + $0x18] sm:$0xff]  ;;  %v377_v45 = vld [vmem:[#allocation3 + $0x90] sm:$0xff] }
  0x49   : > { %3022 = vmatpush3.bf16.msra.mxu1 %v2985_v50  ;;  %v513_v20 = vmul.f32 %v3258_v11, %v461_v59  ;;  %v549_v21 = vmul.f32 %v3261_v12, %v461_v59  ;;  %v3280_v22 = vmul.f32 %v3261_v12, %v3240_v60  ;;  %2990 = vmatprep.subr.bf16.mxu0 %v2989_v62  ;;  %v3289_v27 = vld [vmem:[#allocation2 + $0x20] sm:$0xff]  ;;  %v406_v29 = vmax.f32 %v374_v15, 0.0  ;;  %v3307_v38 = vld [vmem:[#allocation2 + $0x30] sm:$0xff]  ;;  %v378_v50 = vld [vmem:[#allocation3 + $0x98] sm:$0xff] }
  0x4a   : > { %3015 = vmatprep.subr.bf16.mxu1 %v2989_v62  ;;  %v794_v25 = vmul.f32 %v3264_v13, %v461_v59  ;;  %v3287_v26 = vmul.f32 %v3264_v13, %v3240_v60  ;;  %v1087_v28 = vmul.f32 %v3266_v16, %v3282_v23  ;;  %v1155_v32 = vmul.f32 %v3269_v17, %v3282_v23  ;;  %v363_v56 = vld [vmem:[#allocation3 + $0x20] sm:$0xff]  ;;  %v3335_v59 = vld [vmem:[#allocation2 + $0x38] sm:$0xff] }
  0x4b   : > { %v646_v30 = vrot.slane %v549_v21, 1  ;;  %v647_v31 = vrot.slane %v3280_v22, 1  ;;  %v3298_v33 = vmul.f32 %v3269_v17, %v3289_v27  ;;  %v1399_v36 = vmul.f32 %v3272_v18, %v3282_v23  ;;  %439 = vst [vmem:[#allocation2 + $0xc9] sm:$0xff] %v406_v29  ;;  %v485_v7 = vld [vmem:[#allocation2 + $0xc0] sm:$0xff] }
  0x4c   : > { %v891_v34 = vrot.slane %v794_v25, 2  ;;  %v892_v35 = vrot.slane %v3287_v26, 2  ;;  %v3305_v37 = vmul.f32 %v3272_v18, %v3289_v27  ;;  %2992 = vmatpush3.bf16.msra.mxu0 %v2989_v62  ;;  %v1251_v41 = vrot.slane %v1155_v32, 1  ;;  %v463_v32 = vld [vmem:[#allocation2 + $0x10] sm:$0x3] }
  0x4d   : > { %3023 = vmatpush3.bf16.msra.mxu1 %v2989_v62  ;;  %v648_v40 = vsel %vm645_vm0, %v646_v30, %v647_v31  ;;  %v1252_v42 = vrot.slane %v3298_v33, 1  ;;  %v3315_v43 = vmul.f32 %v3274_v19, %v3307_v38  ;;  %2994 = vmatprep.subr.bf16.mxu0 %v3244_v63  ;;  %v1495_v48 = vrot.slane %v1399_v36, 2 }
  0x4e   : > { %3016 = vmatprep.subr.bf16.mxu1 %v3244_v63  ;;  %v758_v46 = vadd.f32 %v648_v40, %v513_v20  ;;  %v893_v47 = vsel %vm890_vm1, %v891_v34, %v892_v35  ;;  %v1496_v49 = vrot.slane %v3305_v37, 2  ;;  %v3327_v52 = vrot.slane %v460_v10, %v3235_v55  ;;  %v3377_v40 = vld [vmem:[#allocation2 + $0x28] sm:$0x3] }
  0x4f   : > { %v1253_v51 = vsel %vm645_vm0, %v1251_v41, %v1252_v42  ;;  %v3330_v53 = vrot.slane %v460_v10, %v3242_v61  ;;  %v407_v54 = vmax.f32 %v375_v39, 0.0  ;;  %v408_v62 = vmax.f32 %v376_v44, 0.0  ;;  %v364_v10 = vld [vmem:[#allocation3 + $0x28] sm:$0xff] }
  0x50   : > { %v1003_v57 = vadd.f32 %v893_v47, %v758_v46  ;;  %v1497_v58 = vsel %vm890_vm1, %v1495_v48, %v1496_v49  ;;  %v409_v0 = vmax.f32 %v377_v45, 0.0  ;;  %2996 = vmatpush3.bf16.msra.mxu0 %v3244_v63  ;;  %v1760_v55 = vmul.f32 %v3327_v52, %v3307_v38 }
  0x51   : > { %3024 = vmatpush3.bf16.msra.mxu1 %v3244_v63  ;;  %v3343_v61 = vmul.f32 %v3327_v52, %v3335_v59  ;;  %v2004_v1 = vmul.f32 %v3330_v53, %v3307_v38  ;;  %v410_v2 = vmax.f32 %v378_v50, 0.0  ;;  %440 = vst [vmem:[#allocation2 + $0xd9] sm:$0xff] %v407_v54  ;;  %2998 = vmatprep.subr.bf16.mxu0 %v3249_v3  ;;  %441 = vst [vmem:[#allocation2 + $0xe1] sm:$0xff] %v408_v62 }
  0x52   : > { %3017 = vmatprep.subr.bf16.mxu1 %v3249_v3  ;;  %v1119_v6 = vadd.f32 %v1087_v28, %v1003_v57  ;;  %v3351_v63 = vmul.f32 %v3330_v53, %v3335_v59  ;;  %442 = vst [vmem:[#allocation2 + $0xf1] sm:$0xff] %v409_v0  ;;  %v3355_v8 = vmul.f32 %v3258_v11, %v3240_v60  ;;  %v395_v14 = vmax.f32 %v363_v56, 0.0  ;;  %v3358_v24 = vld [vmem:[#allocation2 + $0xc8] sm:$0xff] }
  0x53   : > { %v1856_v15 = vrot.slane %v1760_v55, 1  ;;  %v1857_v20 = vrot.slane %v3343_v61, 1  ;;  %v2100_v21 = vrot.slane %v2004_v1, 2  ;;  %443 = vst [vmem:[#allocation2 + $0xf9] sm:$0xff] %v410_v2  ;;  %v529_v25 = vmul.f32 %v3258_v11, %v485_v7 }
  0x54   : > { %v1363_v28 = vadd.f32 %v1253_v51, %v1119_v6  ;;  %v2101_v29 = vrot.slane %v3351_v63, 2  ;;  %v573_v30 = vmul.f32 %v3261_v12, %v485_v7  ;;  %v3365_v60 = vmul.f32 %v3261_v12, %v3358_v24  ;;  %428 = vst [vmem:[#allocation2 + $0x49] sm:$0xff] %v395_v14  ;;  %3000 = vmatpush3.bf16.msra.mxu0 %v3249_v3 }
  0x55   : > { %3025 = vmatpush3.bf16.msra.mxu1 %v3249_v3  ;;  %v1858_v34 = vsel %vm645_vm0, %v1856_v15, %v1857_v20  ;;  %v818_v36 = vmul.f32 %v3264_v13, %v485_v7  ;;  %v3375_v39 = vmul.f32 %v3264_v13, %v3358_v24  ;;  %v396_v41 = vmax.f32 %v364_v10, 0.0  ;;  %3002 = vmatprep.subr.bf16.mxu0 %v3251_v4 }
  0x56   : > { %3018 = vmatprep.subr.bf16.mxu1 %v3251_v4  ;;  %v1607_v44 = vadd.f32 %v1497_v58, %v1363_v28  ;;  %v2102_v3 = vsel %vm890_vm1, %v2100_v21, %v2101_v29  ;;  %v686_v45 = vrot.slane %v573_v30, 1  ;;  %v687_v46 = vrot.slane %v3365_v60, 1 }
  0x57   : > { %v931_v47 = vrot.slane %v818_v36, 2  ;;  %v932_v48 = vrot.slane %v3375_v39, 2  ;;  %v551_v50 = vmul.f32 %v3261_v12, %v463_v32  ;;  %v796_v51 = vmul.f32 %v3264_v13, %v463_v32  ;;  %429 = vst [vmem:[#allocation2 + $0x51] sm:$0xff] %v396_v41 }
  0x58   : > { %v1724_v54 = vadd.f32 %v3315_v43, %v1607_v44  ;;  %v688_v56 = vsel %vm645_vm0, %v686_v45, %v687_v46  ;;  %v3392_v57 = vld [vmem:[#allocation2 + $0xd8] sm:$0xff]  ;;  %v1088_v58 = vmul.f32 %v3266_v16, %v3289_v27  ;;  %v1157_v62 = vmul.f32 %v3269_v17, %v3377_v40  ;;  %3004 = vmatpush3.bf16.msra.mxu0 %v3251_v4  ;;  %v3403_v55 = vld [vmem:[#allocation2 + $0xe0] sm:$0xff] }
  0x59   : > { %3026 = vmatpush3.bf16.msra.mxu1 %v3251_v4  ;;  %v774_v0 = vadd.f32 %v688_v56, %v529_v25  ;;  %v933_v43 = vsel %vm890_vm1, %v931_v47, %v932_v48  ;;  %v1103_v1 = vmul.f32 %v3266_v16, %v3392_v57  ;;  %v649_v2 = vrot.slane %v551_v50, 1  ;;  %3006 = vmatprep.subr.bf16.mxu0 %v3253_v5  ;;  %v3415_v10 = vld [vmem:[#allocation2 + $0xf0] sm:$0xff] }
  0x5a   : > { %3019 = vmatprep.subr.bf16.mxu1 %v3253_v5  ;;  %v1968_v6 = vadd.f32 %v1858_v34, %v1724_v54  ;;  %v1179_v7 = vmul.f32 %v3269_v17, %v3392_v57  ;;  %v3413_v4 = vmul.f32 %v3269_v17, %v3403_v55  ;;  %v894_v14 = vrot.slane %v796_v51, 2  ;;  %v3426_v36 = vld [vmem:[#allocation2 + $0xf8] sm:$0xff] }
  0x5b   : > { %v1019_v15 = vadd.f32 %v933_v43, %v774_v0  ;;  %v1423_v21 = vmul.f32 %v3272_v18, %v3392_v57  ;;  %v3421_v25 = vmul.f32 %v3272_v18, %v3403_v55  ;;  %v1708_v28 = vmul.f32 %v3274_v19, %v3415_v10 }
  0x5c   : > { %v2212_v30 = vadd.f32 %v2102_v3, %v1968_v6  ;;  %v1291_v32 = vrot.slane %v1179_v7, 1  ;;  %v1292_v34 = vrot.slane %v3413_v4, 1  ;;  %v1784_v41 = vmul.f32 %v3327_v52, %v3415_v10  ;;  %3008 = vmatpush3.bf16.msra.mxu0 %v3253_v5  ;;  %v1642_v6 = vld [vmem:[#allocation2 + $0x40] sm:$0x3] }
  0x5d   : > { %3027 = vmatpush3.bf16.msra.mxu1 %v3253_v5  ;;  %v1135_v44 = vadd.f32 %v1103_v1, %v1019_v15  ;;  %v1535_v45 = vrot.slane %v1423_v21, 2  ;;  %v1536_v47 = vrot.slane %v3421_v25, 2  ;;  %v3435_v50 = vmul.f32 %v3327_v52, %v3426_v36  ;;  %3010 = vmatprep.subr.bf16.mxu0 %v3256_v9 }
  0x5e   : > { %3020 = vmatprep.subr.bf16.mxu1 %v3256_v9  ;;  %v1293_v3 = vsel %vm645_vm0, %v1291_v32, %v1292_v34  ;;  %v1896_v51 = vrot.slane %v1784_v41, 1  ;;  %v2028_v5 = vmul.f32 %v3330_v53, %v3415_v10  ;;  %v3446_v54 = vmul.f32 %v3330_v53, %v3426_v36  ;;  %2933 = vmatprep.mubr.f32.mxu0 %v2212_v30  ;;  %v487_v41 = vld [vmem:[#allocation2 + $0xd0] sm:$0x3] }
  0x5f   : > { %v1379_v56 = vadd.f32 %v1293_v3, %v1135_v44  ;;  %v1537_v0 = vsel %vm890_vm1, %v1535_v45, %v1536_v47  ;;  %v1897_v43 = vrot.slane %v3435_v50, 1  ;;  %v650_v1 = vsel %vm645_vm0, %v647_v31, %v649_v2 }
  0x60   : > { %v2140_v7 = vrot.slane %v2028_v5, 2  ;;  %v2141_v15 = vrot.slane %v3446_v54, 2  ;;  %v759_v21 = vadd.f32 %v650_v1, %v3355_v8  ;;  %v895_v30 = vsel %vm890_vm1, %v892_v35, %v894_v14  ;;  %3012 = vmatpush3.bf16.msra.mxu0 %v3256_v9 }
  0x61   : > { %3028 = vmatpush3.bf16.msra.mxu1 %v3256_v9  ;;  %v1623_v32 = vadd.f32 %v1537_v0, %v1379_v56  ;;  %v1898_v22 = vsel %vm645_vm0, %v1896_v51, %v1897_v43  ;;  %v1254_v31 = vrot.slane %v1157_v62, 1  ;;  %v1401_v2 = vmul.f32 %v3272_v18, %v3377_v40  ;;  %v1061_v56 = vld [vmem:[#allocation2 + $0xe8] sm:$0x3] }
  0x62   : > { %v2142_v26 = vsel %vm890_vm1, %v2140_v7, %v2141_v15  ;;  %v1004_v8 = vadd.f32 %v895_v30, %v759_v21  ;;  %v1693_v35 = vmul.f32 %v3274_v19, %v3335_v59  ;;  %v1762_v9 = vmul.f32 %v3327_v52, %v1642_v6  ;;  %v1666_v7 = vld [vmem:[#allocation2 + $0x100] sm:$0x3] }
  0x63   : > { %v1740_v14 = vadd.f32 %v1708_v28, %v1623_v32  ;;  %v1255_v44 = vsel %vm645_vm0, %v1252_v42, %v1254_v31  ;;  %v1498_v62 = vrot.slane %v1401_v2, 2  ;;  %v2006_v45 = vmul.f32 %v3330_v53, %v1642_v6 }
  0x64   : > { %v1120_v40 = vadd.f32 %v1088_v58, %v1004_v8  ;;  %v1859_v3 = vrot.slane %v1762_v9, 1  ;;  %v530_v51 = vmul.f32 %v3258_v11, %v3358_v24  ;;  %v575_v5 = vmul.f32 %v3261_v12, %v487_v41 }
  0x65   : > { %v1984_v0 = vadd.f32 %v1898_v22, %v1740_v14  ;;  %v1499_v28 = vsel %vm890_vm1, %v1496_v49, %v1498_v62  ;;  %v2103_v1 = vrot.slane %v2006_v45, 2  ;;  %v820_v33 = vmul.f32 %v3264_v13, %v487_v41 }
  0x66   : > { %v1364_v42 = vadd.f32 %v1255_v44, %v1120_v40  ;;  %v1860_v58 = vsel %vm645_vm0, %v1857_v20, %v1859_v3  ;;  %v689_v6 = vrot.slane %v575_v5, 1  ;;  %v1104_v24 = vmul.f32 %v3266_v16, %v3403_v55 }
  0x67   : > { %v2228_v21 = vadd.f32 %v2142_v26, %v1984_v0  ;;  %v2104_v37 = vsel %vm890_vm1, %v2101_v29, %v2103_v1  ;;  %v934_v30 = vrot.slane %v820_v33, 2  ;;  %v1181_v49 = vmul.f32 %v3269_v17, %v1061_v56 }
  0x68   : > { %v1608_v32 = vadd.f32 %v1499_v28, %v1364_v42  ;;  %v690_v61 = vsel %vm645_vm0, %v687_v46, %v689_v6  ;;  %v1425_v20 = vmul.f32 %v3272_v18, %v1061_v56  ;;  %v1709_v22 = vmul.f32 %v3274_v19, %v3426_v36 }
  0x69   : > { %2957 = vmatprep.mubr.f32.mxu1 %v2228_v21  ;;  %v775_v31 = vadd.f32 %v690_v61, %v530_v51  ;;  %v935_v63 = vsel %vm890_vm1, %v932_v48, %v934_v30  ;;  %v1294_v29 = vrot.slane %v1181_v49, 1  ;;  %v1786_v2 = vmul.f32 %v3327_v52, %v1666_v7 }
  0x6a   : > { %v1725_v41 = vadd.f32 %v1693_v35, %v1608_v32  ;;  %v1538_v26 = vrot.slane %v1425_v20, 2  ;;  %v2030_v60 = vmul.f32 %v3330_v53, %v1666_v7  ;;  %v515_v46 = vmul.f32 %v3282_v23, %v3258_v11  ;;  %v3558_v32 = vld [vmem:[#allocation2 + $0x50] sm:$0xff] }
  0x6b   : > { %v1020_v8 = vadd.f32 %v935_v63, %v775_v31  ;;  %v1295_v9 = vsel %vm645_vm0, %v1292_v34, %v1294_v29  ;;  %v1899_v14 = vrot.slane %v1786_v2, 1  ;;  %v552_v39 = vmul.f32 %v3282_v23, %v3261_v12  ;;  %v379_v20 = vld [vmem:[#allocation3 + $0xa0] sm:$0xff]  ;;  %v380_v2 = vld [vmem:[#allocation3 + $0xa8] sm:$0xff] }
  0x6c   : > { %v1969_v48 = vadd.f32 %v1860_v58, %v1725_v41  ;;  %v1539_v35 = vsel %vm890_vm1, %v1536_v47, %v1538_v26  ;;  %v2143_v44 = vrot.slane %v2030_v60, 2  ;;  %v3516_v62 = vmul.f32 %v3289_v27, %v3261_v12  ;;  %v3549_v58 = vld [vmem:[#allocation2 + $0x48] sm:$0xff] }
  0x6d   : > { %v1136_v45 = vadd.f32 %v1104_v24, %v1020_v8  ;;  %v1900_v4 = vsel %vm645_vm0, %v1897_v43, %v1899_v14  ;;  %v651_v34 = vrot.slane %v552_v39, 1  ;;  %v797_v40 = vmul.f32 %v3282_v23, %v3264_v13 }
  0x6e   : > { %v2213_v3 = vadd.f32 %v2104_v37, %v1969_v48  ;;  %v2144_v25 = vsel %vm890_vm1, %v2141_v15, %v2143_v44  ;;  %v652_v47 = vrot.slane %v3516_v62, 1  ;;  %v3529_v51 = vmul.f32 %v3289_v27, %v3264_v13 }
  0x6f   : > { %v1380_v5 = vadd.f32 %v1295_v9, %v1136_v45  ;;  %v896_v56 = vrot.slane %v797_v40, 2  ;;  %v1089_v50 = vmul.f32 %v3307_v38, %v3266_v16  ;;  %v1158_v43 = vmul.f32 %v3307_v38, %v3269_v17 }
  0x70   : > { %2934 = vmatmul.mubr.f32.vlgmr.msra.gmra.mrb[0].mxu0 %v2213_v3  ;;  %v653_v23 = vsel %vm645_vm0, %v651_v34, %v652_v47  ;;  %v897_v54 = vrot.slane %v3529_v51, 2  ;;  %v3541_v15 = vmul.f32 %v3335_v59, %v3269_v17  ;;  %v1402_v0 = vmul.f32 %v3307_v38, %v3272_v18 }
  0x71   : > { %v1624_v28 = vadd.f32 %v1539_v35, %v1380_v5  ;;  %v760_v1 = vadd.f32 %v653_v23, %v515_v46  ;;  %v1256_v33 = vrot.slane %v1158_v43, 1  ;;  %v3547_v42 = vmul.f32 %v3335_v59, %v3272_v18 }
  0x72   : > { %v898_v6 = vsel %vm890_vm1, %v896_v56, %v897_v54  ;;  %v1257_v24 = vrot.slane %v3541_v15, 1  ;;  %v1500_v7 = vrot.slane %v1402_v0, 2  ;;  %v1694_v21 = vmul.f32 %v3274_v19, %v3549_v58 }
  0x73   : > { %v1741_v37 = vadd.f32 %v1709_v22, %v1624_v28  ;;  %v1005_v30 = vadd.f32 %v898_v6, %v760_v1  ;;  %v1501_v49 = vrot.slane %v3547_v42, 2  ;;  %v1763_v61 = vmul.f32 %v3327_v52, %v3549_v58 }
  0x74   : > { %v1258_v31 = vsel %vm645_vm0, %v1256_v33, %v1257_v24  ;;  %v3567_v63 = vmul.f32 %v3327_v52, %v3558_v32  ;;  %v2007_v22 = vmul.f32 %v3330_v53, %v3549_v58  ;;  %v3573_v29 = vmul.f32 %v3330_v53, %v3558_v32 }
  0x75   : > { %v1985_v41 = vadd.f32 %v1900_v4, %v1741_v37  ;;  %v1121_v26 = vadd.f32 %v1089_v50, %v1005_v30  ;;  %v1502_v60 = vsel %vm890_vm1, %v1500_v7, %v1501_v49  ;;  %v1861_v46 = vrot.slane %v1763_v61, 1  ;;  %v466_v7 = vld [vmem:[#allocation2 + $0x28] sm:$0x3] }
  0x76   : > { %v1862_v8 = vrot.slane %v3567_v63, 1  ;;  %v2105_v9 = vrot.slane %v2007_v22, 2  ;;  %v2106_v14 = vrot.slane %v3573_v29, 2  ;;  %v411_v39 = vmax.f32 %v379_v20, 0.0 }
  0x77   : > { %v2229_v48 = vadd.f32 %v2144_v25, %v1985_v41  ;;  %v1365_v35 = vadd.f32 %v1258_v31, %v1121_v26  ;;  %v412_v44 = vmax.f32 %v380_v2, 0.0  ;;  %v531_v45 = vmul.f32 %v3392_v57, %v3258_v11 }
  0x78   : > { %v1863_v4 = vsel %vm645_vm0, %v1861_v46, %v1862_v8  ;;  %v2107_v34 = vsel %vm890_vm1, %v2105_v9, %v2106_v14  ;;  %444 = vst [vmem:[#allocation2 + $0x109] sm:$0xff] %v411_v39  ;;  %v576_v40 = vmul.f32 %v3392_v57, %v3261_v12  ;;  %v3592_v3 = vmul.f32 %v3403_v55, %v3261_v12 }
  0x79   : > { %2958 = vmatmul.mubr.f32.vlgmr.msra.gmra.mrb[0].mxu1 %v2229_v48  ;;  %v1609_v25 = vadd.f32 %v1502_v60, %v1365_v35  ;;  %445 = vst [vmem:[#allocation2 + $0x111] sm:$0xff] %v412_v44  ;;  %v821_v5 = vmul.f32 %v3392_v57, %v3264_v13  ;;  %v3598_v56 = vmul.f32 %v3403_v55, %v3264_v13  ;;  %v1040_v44 = vld [vmem:[#allocation2 + $0x40] sm:$0x3] }
  0x7a   : > { %v1105_v50 = vmul.f32 %v3415_v10, %v3266_v16  ;;  %v691_v43 = vrot.slane %v576_v40, 1  ;;  %v692_v23 = vrot.slane %v3592_v3, 1  ;;  %v1182_v0 = vmul.f32 %v3415_v10, %v3269_v17 }
  0x7b   : > { %v3607_v28 = vmul.f32 %v3426_v36, %v3269_v17  ;;  %v1726_v1 = vadd.f32 %v1694_v21, %v1609_v25  ;;  %v936_v33 = vrot.slane %v821_v5, 2  ;;  %v937_v57 = vrot.slane %v3598_v56, 2 }
  0x7c   : > { %v1426_v6 = vmul.f32 %v3415_v10, %v3272_v18  ;;  %v693_v37 = vsel %vm645_vm0, %v691_v43, %v692_v23  ;;  %v1296_v30 = vrot.slane %v1182_v0, 1  ;;  %v3618_v20 = vmul.f32 %v3426_v36, %v3272_v18 }
  0x7d   : > { %v1297_v61 = vrot.slane %v3607_v28, 1  ;;  %v1970_v31 = vadd.f32 %v1863_v4, %v1726_v1  ;;  %v776_v21 = vadd.f32 %v693_v37, %v531_v45  ;;  %v938_v22 = vsel %vm890_vm1, %v936_v33, %v937_v57 }
  0x7e   : > { %v1540_v2 = vrot.slane %v1426_v6, 2  ;;  %v1541_v26 = vrot.slane %v3618_v20, 2  ;;  %v516_v60 = vmul.f32 %v3289_v27, %v3258_v11  ;;  %v554_v46 = vmul.f32 %v3261_v12, %v466_v7 }
  0x7f   : > { %v1298_v41 = vsel %vm645_vm0, %v1296_v30, %v1297_v61  ;;  %v2214_v9 = vadd.f32 %v2107_v34, %v1970_v31  ;;  %v1021_v39 = vadd.f32 %v938_v22, %v776_v21  ;;  %v3630_v48 = vld [vmem:[#allocation2 + $0x108] sm:$0xff]  ;;  %v799_v35 = vmul.f32 %v3264_v13, %v466_v7  ;;  %v1645_v22 = vld [vmem:[#allocation2 + $0x58] sm:$0x3] }
  0x80   : > { %v1090_v45 = vmul.f32 %v3335_v59, %v3266_v16  ;;  %v1542_v4 = vsel %vm890_vm1, %v1540_v2, %v1541_v26  ;;  %v3638_v40 = vld [vmem:[#allocation2 + $0x110] sm:$0xff]  ;;  %v1710_v27 = vmul.f32 %v3274_v19, %v3630_v48  ;;  %v1787_v34 = vmul.f32 %v3327_v52, %v3630_v48  ;;  %v1669_v42 = vld [vmem:[#allocation2 + $0x118] sm:$0x3] }
  0x81   : > { %v2031_v25 = vmul.f32 %v3330_v53, %v3630_v48  ;;  %2936 = vmatprep.mubr.f32.mxu0 %v2214_v9  ;;  %v1137_v5 = vadd.f32 %v1105_v50, %v1021_v39  ;;  %v3648_v43 = vmul.f32 %v3327_v52, %v3638_v40  ;;  %v3652_v0 = vmul.f32 %v3330_v53, %v3638_v40 }
  0x82   : > { %v654_v1 = vrot.slane %v554_v46, 1  ;;  %v1901_v33 = vrot.slane %v1787_v34, 1  ;;  %v899_v7 = vrot.slane %v799_v35, 2  ;;  %v1160_v37 = vmul.f32 %v3269_v17, %v1040_v44  ;;  %v490_v35 = vld [vmem:[#allocation2 + $0xe8] sm:$0x3] }
  0x83   : > { %v2145_v6 = vrot.slane %v2031_v25, 2  ;;  %v1381_v30 = vadd.f32 %v1298_v41, %v1137_v5  ;;  %v1902_v31 = vrot.slane %v3648_v43, 1  ;;  %v2146_v21 = vrot.slane %v3652_v0, 2 }
  0x84   : > { %v655_v50 = vsel %vm645_vm0, %v652_v47, %v654_v1  ;;  %v900_v46 = vsel %vm890_vm1, %v897_v54, %v899_v7  ;;  %v1259_v9 = vrot.slane %v1160_v37, 1  ;;  %v1404_v39 = vmul.f32 %v3272_v18, %v1040_v44 }
  0x85   : > { %v761_v2 = vadd.f32 %v655_v50, %v516_v60  ;;  %v1625_v34 = vadd.f32 %v1542_v4, %v1381_v30  ;;  %v1903_v41 = vsel %vm645_vm0, %v1901_v33, %v1902_v31  ;;  %v2147_v62 = vsel %vm890_vm1, %v2145_v6, %v2146_v21  ;;  %v1064_v33 = vld [vmem:[#allocation2 + $0x100] sm:$0x3] }
  0x86   : > { %v1695_v47 = vmul.f32 %v3274_v19, %v3558_v32  ;;  %v1260_v51 = vsel %vm645_vm0, %v1257_v24, %v1259_v9  ;;  %v1503_v54 = vrot.slane %v1404_v39, 2  ;;  %v1765_v44 = vmul.f32 %v3327_v52, %v1645_v22 }
  0x87   : > { %v1006_v60 = vadd.f32 %v900_v46, %v761_v2  ;;  %v1742_v4 = vadd.f32 %v1710_v27, %v1625_v34  ;;  %v2009_v25 = vmul.f32 %v3330_v53, %v1645_v22  ;;  %v532_v5 = vmul.f32 %v3403_v55, %v3258_v11 }
  0x88   : > { %v578_v1 = vmul.f32 %v3261_v12, %v490_v35  ;;  %v1504_v7 = vsel %vm890_vm1, %v1501_v49, %v1503_v54  ;;  %v1864_v15 = vrot.slane %v1765_v44, 1  ;;  %v823_v24 = vmul.f32 %v3264_v13, %v490_v35  ;;  %v365_v35 = vld [vmem:[#allocation3 + $0x30] sm:$0xff] }
  0x89   : > { %v1122_v6 = vadd.f32 %v1090_v45, %v1006_v60  ;;  %v1986_v37 = vadd.f32 %v1903_v41, %v1742_v4  ;;  %v2108_v30 = vrot.slane %v2009_v25, 2  ;;  %v1106_v27 = vmul.f32 %v3426_v36, %v3266_v16  ;;  %v366_v60 = vld [vmem:[#allocation3 + $0x38] sm:$0xff] }
  0x8a   : > { %v694_v50 = vrot.slane %v578_v1, 1  ;;  %v1865_v55 = vsel %vm645_vm0, %v1862_v8, %v1864_v15  ;;  %v939_v2 = vrot.slane %v823_v24, 2  ;;  %v1184_v45 = vmul.f32 %v3269_v17, %v1064_v33 }
  0x8b   : > { %v1366_v22 = vadd.f32 %v1260_v51, %v1122_v6  ;;  %v2230_v46 = vadd.f32 %v2147_v62, %v1986_v37  ;;  %v2109_v49 = vsel %vm890_vm1, %v2106_v14, %v2108_v30  ;;  %v1428_v39 = vmul.f32 %v3272_v18, %v1064_v33 }
  0x8c   : > { %v695_v9 = vsel %vm645_vm0, %v692_v23, %v694_v50  ;;  %v940_v8 = vsel %vm890_vm1, %v937_v57, %v939_v2  ;;  %v1299_v41 = vrot.slane %v1184_v45, 1  ;;  %v1711_v29 = vmul.f32 %v3274_v19, %v3638_v40 }
  0x8d   : > { %v1610_v34 = vadd.f32 %v1504_v7, %v1366_v22  ;;  %v777_v63 = vadd.f32 %v695_v9, %v532_v5  ;;  %2960 = vmatprep.mubr.f32.mxu1 %v2230_v46  ;;  %v1543_v62 = vrot.slane %v1428_v39, 2  ;;  %v1789_v14 = vmul.f32 %v3327_v52, %v1669_v42  ;;  %v382_v22 = vld [vmem:[#allocation3 + $0xb8] sm:$0xff] }
  0x8e   : > { %v2033_v3 = vmul.f32 %v3330_v53, %v1669_v42  ;;  %v1300_v54 = vsel %vm645_vm0, %v1297_v61, %v1299_v41  ;;  %v397_v56 = vmax.f32 %v365_v35, 0.0  ;;  %v398_v25 = vmax.f32 %v366_v60, 0.0 }
  0x8f   : > { %v1727_v23 = vadd.f32 %v1695_v47, %v1610_v34  ;;  %v1022_v51 = vadd.f32 %v940_v8, %v777_v63  ;;  %v1544_v57 = vsel %vm890_vm1, %v1541_v26, %v1543_v62  ;;  %v1904_v44 = vrot.slane %v1789_v14, 1 }
  0x90   : > { %v2148_v4 = vrot.slane %v2033_v3, 2  ;;  %430 = vst [vmem:[#allocation2 + $0x61] sm:$0xff] %v397_v56  ;;  %v517_v33 = vmul.f32 %v3307_v38, %v3258_v11  ;;  %v555_v47 = vmul.f32 %v3307_v38, %v3261_v12  ;;  %431 = vst [vmem:[#allocation2 + $0x69] sm:$0xff] %v398_v25  ;;  %v3722_v20 = vmul.f32 %v3335_v59, %v3261_v12 }
  0x91   : > { %v1971_v5 = vadd.f32 %v1865_v55, %v1727_v23  ;;  %v1138_v1 = vadd.f32 %v1106_v27, %v1022_v51  ;;  %v1905_v28 = vsel %vm645_vm0, %v1902_v31, %v1904_v44  ;;  %v800_v26 = vmul.f32 %v3307_v38, %v3264_v13  ;;  %v381_v31 = vld [vmem:[#allocation3 + $0xb0] sm:$0xff] }
  0x92   : > { %v2149_v61 = vsel %vm890_vm1, %v2146_v21, %v2148_v4  ;;  %v656_v15 = vrot.slane %v555_v47, 1  ;;  %v3728_v43 = vmul.f32 %v3335_v59, %v3264_v13  ;;  %v657_v0 = vrot.slane %v3722_v20, 1 }
  0x93   : > { %v2215_v6 = vadd.f32 %v2109_v49, %v1971_v5  ;;  %v1382_v7 = vadd.f32 %v1300_v54, %v1138_v1  ;;  %v901_v24 = vrot.slane %v800_v26, 2  ;;  %v1091_v21 = vmul.f32 %v3549_v58, %v3266_v16 }
  0x94   : > { %v1161_v37 = vmul.f32 %v3549_v58, %v3269_v17  ;;  %v902_v38 = vrot.slane %v3728_v43, 2  ;;  %v3738_v50 = vmul.f32 %v3558_v32, %v3269_v17  ;;  %v1405_v27 = vmul.f32 %v3549_v58, %v3272_v18 }
  0x95   : > { %2937 = vmatmul.mubr.f32.gmra.mrb[2].mxu0 %v2215_v6  ;;  %v1626_v30 = vadd.f32 %v1544_v57, %v1382_v7  ;;  %v658_v55 = vsel %vm645_vm0, %v656_v15, %v657_v0  ;;  %v3747_v45 = vmul.f32 %v3558_v32, %v3272_v18  ;;  %v413_v42 = vmax.f32 %v381_v31, 0.0 }
  0x96   : > { %v1261_v2 = vrot.slane %v1161_v37, 1  ;;  %v762_v49 = vadd.f32 %v658_v55, %v517_v33  ;;  %v903_v9 = vsel %vm890_vm1, %v901_v24, %v902_v38  ;;  %v1262_v39 = vrot.slane %v3738_v50, 1 }
  0x97   : > { %v1743_v46 = vadd.f32 %v1711_v29, %v1626_v30  ;;  %v1505_v35 = vrot.slane %v1405_v27, 2  ;;  %v1506_v34 = vrot.slane %v3747_v45, 2  ;;  %v3754_v63 = vld [vmem:[#allocation2 + $0x60] sm:$0xff]  ;;  %v414_v8 = vmax.f32 %v382_v22, 0.0  ;;  %446 = vst [vmem:[#allocation2 + $0x121] sm:$0xff] %v413_v42  ;;  %v3761_v14 = vld [vmem:[#allocation2 + $0x68] sm:$0xff] }
  0x98   : > { %v533_v41 = vmul.f32 %v3415_v10, %v3258_v11  ;;  %v1007_v62 = vadd.f32 %v903_v9, %v762_v49  ;;  %v1263_v29 = vsel %vm645_vm0, %v1261_v2, %v1262_v39  ;;  %v1696_v3 = vmul.f32 %v3274_v19, %v3754_v63 }
  0x99   : > { %v1987_v60 = vadd.f32 %v1905_v28, %v1743_v46  ;;  %v1507_v23 = vsel %vm890_vm1, %v1505_v35, %v1506_v34  ;;  %v1766_v51 = vmul.f32 %v3327_v52, %v3754_v63  ;;  %v3772_v54 = vmul.f32 %v3327_v52, %v3761_v14  ;;  %447 = vst [vmem:[#allocation2 + $0x129] sm:$0xff] %v414_v8 }
  0x9a   : > { %v2010_v56 = vmul.f32 %v3330_v53, %v3754_v63  ;;  %v1123_v44 = vadd.f32 %v1091_v21, %v1007_v62  ;;  %v3778_v4 = vmul.f32 %v3330_v53, %v3761_v14  ;;  %v579_v25 = vmul.f32 %v3415_v10, %v3261_v12 }
  0x9b   : > { %v2231_v57 = vadd.f32 %v2149_v61, %v1987_v60  ;;  %v1866_v5 = vrot.slane %v1766_v51, 1  ;;  %v1867_v1 = vrot.slane %v3772_v54, 1  ;;  %v3785_v47 = vmul.f32 %v3426_v36, %v3261_v12 }
  0x9c   : > { %v2110_v33 = vrot.slane %v2010_v56, 2  ;;  %v1367_v28 = vadd.f32 %v1263_v29, %v1123_v44  ;;  %v2111_v61 = vrot.slane %v3778_v4, 2  ;;  %v696_v26 = vrot.slane %v579_v25, 1 }
  0x9d   : > { %2961 = vmatmul.mubr.f32.gmra.mrb[2].mxu1 %v2231_v57  ;;  %v824_v6 = vmul.f32 %v3415_v10, %v3264_v13  ;;  %v1868_v7 = vsel %vm645_vm0, %v1866_v5, %v1867_v1  ;;  %v697_v15 = vrot.slane %v3785_v47, 1  ;;  %v3796_v31 = vmul.f32 %v3426_v36, %v3264_v13 }
  0x9e   : > { %v1107_v24 = vmul.f32 %v3630_v48, %v3266_v16  ;;  %v1611_v21 = vadd.f32 %v1507_v23, %v1367_v28  ;;  %v2112_v37 = vsel %vm890_vm1, %v2110_v33, %v2111_v61  ;;  %v1185_v10 = vmul.f32 %v3630_v48, %v3269_v17  ;;  %v3819_v35 = vld [vmem:[#allocation2 + $0x120] sm:$0xff] }
  0x9f   : > { %v941_v30 = vrot.slane %v824_v6, 2  ;;  %v698_v27 = vsel %vm645_vm0, %v696_v26, %v697_v15  ;;  %v942_v22 = vrot.slane %v3796_v31, 2  ;;  %v3811_v55 = vmul.f32 %v3638_v40, %v3269_v17  ;;  %v469_v33 = vld [vmem:[#allocation2 + $0x40] sm:$0x3] }
  0xa0   : > { %v1429_v2 = vmul.f32 %v3630_v48, %v3272_v18  ;;  %v1728_v42 = vadd.f32 %v1696_v3, %v1611_v21  ;;  %v778_v46 = vadd.f32 %v698_v27, %v533_v41  ;;  %v1301_v49 = vrot.slane %v1185_v10, 1  ;;  %v3828_v51 = vld [vmem:[#allocation2 + $0x128] sm:$0xff]  ;;  %v1043_v21 = vld [vmem:[#allocation2 + $0x58] sm:$0x3]  ;;  %v1672_v45 = vld [vmem:[#allocation2 + $0x130] sm:$0x3] }
  0xa1   : > { %v3817_v9 = vmul.f32 %v3638_v40, %v3272_v18  ;;  %v943_v8 = vsel %vm890_vm1, %v941_v30, %v942_v22  ;;  %v1302_v60 = vrot.slane %v3811_v55, 1  ;;  %v1712_v29 = vmul.f32 %v3274_v19, %v3819_v35 }
  0xa2   : > { %v1545_v62 = vrot.slane %v1429_v2, 2  ;;  %v1972_v23 = vadd.f32 %v1868_v7, %v1728_v42  ;;  %v1023_v3 = vadd.f32 %v943_v8, %v778_v46  ;;  %v1790_v56 = vmul.f32 %v3327_v52, %v3819_v35 }
  0xa3   : > { %v5081_v41 = vrot.slane %v3817_v9, 2  ;;  %v1303_v57 = vsel %vm645_vm0, %v1301_v49, %v1302_v60  ;;  %v3837_v44 = vmul.f32 %v3327_v52, %v3828_v51  ;;  %v2034_v25 = vmul.f32 %v3330_v53, %v3819_v35  ;;  %v1648_v49 = vld [vmem:[#allocation2 + $0x70] sm:$0x3] }
  0xa4   : > { %v3843_v5 = vmul.f32 %v3330_v53, %v3828_v51  ;;  %v2216_v28 = vadd.f32 %v2112_v37, %v1972_v23  ;;  %v1139_v26 = vadd.f32 %v1107_v24, %v1023_v3  ;;  %v1906_v7 = vrot.slane %v1790_v56, 1 }
  0xa5   : > { %v1547_v6 = vsel %vm890_vm1, %v1545_v62, %v5081_v41  ;;  %v5080_v30 = vrot.slane %v3837_v44, 1  ;;  %v2150_v10 = vrot.slane %v2034_v25, 2  ;;  %v518_v2 = vmul.f32 %v3335_v59, %v3258_v11 }
  0xa6   : > { %v2151_v27 = vrot.slane %v3843_v5, 2  ;;  %2939 = vmatprep.mubr.f32.mxu0 %v2216_v28  ;;  %v1383_v42 = vadd.f32 %v1303_v57, %v1139_v26  ;;  %v557_v46 = vmul.f32 %v3261_v12, %v469_v33  ;;  %v802_v24 = vmul.f32 %v3264_v13, %v469_v33 }
  0xa7   : > { %v1092_v37 = vmul.f32 %v3558_v32, %v3266_v16  ;;  %v1908_v8 = vsel %vm645_vm0, %v1906_v7, %v5080_v30  ;;  %v1163_v59 = vmul.f32 %v3269_v17, %v1043_v21  ;;  %v1407_v23 = vmul.f32 %v3272_v18, %v1043_v21  ;;  %v493_v30 = vld [vmem:[#allocation2 + $0x100] sm:$0x3] }
  0xa8   : > { %v2152_v62 = vsel %vm890_vm1, %v2150_v10, %v2151_v27  ;;  %v1627_v3 = vadd.f32 %v1547_v6, %v1383_v42  ;;  %v659_v56 = vrot.slane %v557_v46, 1  ;;  %v904_v57 = vrot.slane %v802_v24, 2  ;;  %v1067_v42 = vld [vmem:[#allocation2 + $0x118] sm:$0x3] }
  0xa9   : > { %v1697_v25 = vmul.f32 %v3274_v19, %v3761_v14  ;;  %v1264_v33 = vrot.slane %v1163_v59, 1  ;;  %v1508_v28 = vrot.slane %v1407_v23, 2  ;;  %v1768_v26 = vmul.f32 %v3327_v52, %v1648_v49 }
  0xaa   : > { %v2012_v7 = vmul.f32 %v3330_v53, %v1648_v49  ;;  %v1744_v41 = vadd.f32 %v1712_v29, %v1627_v3  ;;  %v660_v10 = vsel %vm645_vm0, %v657_v0, %v659_v56  ;;  %v905_v6 = vsel %vm890_vm1, %v902_v38, %v904_v57  ;;  %v368_v56 = vld [vmem:[#allocation3 + $0x48] sm:$0xff] }
  0xab   : > { %v534_v21 = vmul.f32 %v3426_v36, %v3258_v11  ;;  %v763_v46 = vadd.f32 %v660_v10, %v518_v2  ;;  %v1265_v24 = vsel %vm645_vm0, %v1262_v39, %v1264_v33  ;;  %v1509_v29 = vsel %vm890_vm1, %v1506_v34, %v1508_v28 }
  0xac   : > { %v1869_v20 = vrot.slane %v1768_v26, 1  ;;  %v1988_v49 = vadd.f32 %v1908_v8, %v1744_v41  ;;  %v2113_v0 = vrot.slane %v2012_v7, 2  ;;  %v581_v43 = vmul.f32 %v3261_v12, %v493_v30 }
  0xad   : > { %v826_v38 = vmul.f32 %v3264_v13, %v493_v30  ;;  %v1008_v59 = vadd.f32 %v905_v6, %v763_v46  ;;  %v1108_v50 = vmul.f32 %v3638_v40, %v3266_v16  ;;  %v1187_v39 = vmul.f32 %v3269_v17, %v1067_v42 }
  0xae   : > { %v1870_v36 = vsel %vm645_vm0, %v1867_v1, %v1869_v20  ;;  %v2232_v2 = vadd.f32 %v2152_v62, %v1988_v49  ;;  %v2114_v34 = vsel %vm890_vm1, %v2111_v61, %v2113_v0  ;;  %v699_v41 = vrot.slane %v581_v43, 1  ;;  %v367_v1 = vld [vmem:[#allocation3 + $0x40] sm:$0xff] }
  0xaf   : > { %v944_v8 = vrot.slane %v826_v38, 2  ;;  %v1124_v23 = vadd.f32 %v1092_v37, %v1008_v59  ;;  %v1304_v30 = vrot.slane %v1187_v39, 1  ;;  %v1431_v3 = vmul.f32 %v3272_v18, %v1067_v42  ;;  %v383_v39 = vld [vmem:[#allocation3 + $0xc0] sm:$0xff] }
  0xb0   : > { %v1713_v54 = vmul.f32 %v3274_v19, %v3828_v51  ;;  %2963 = vmatprep.mubr.f32.mxu1 %v2232_v2  ;;  %v700_v62 = vsel %vm645_vm0, %v697_v15, %v699_v41  ;;  %v1792_v61 = vmul.f32 %v3327_v52, %v1672_v45  ;;  %v2036_v37 = vmul.f32 %v3330_v53, %v1672_v45 }
  0xb1   : > { %v945_v4 = vsel %vm890_vm1, %v942_v22, %v944_v8  ;;  %v1368_v57 = vadd.f32 %v1265_v24, %v1124_v23  ;;  %v779_v33 = vadd.f32 %v700_v62, %v534_v21  ;;  %v1305_v28 = vsel %vm645_vm0, %v1302_v60, %v1304_v30  ;;  %v384_v8 = vld [vmem:[#allocation3 + $0xc8] sm:$0xff] }
  0xb2   : > { %v1548_v26 = vrot.slane %v1431_v3, 2  ;;  %v1909_v7 = vrot.slane %v1792_v61, 1  ;;  %v2153_v10 = vrot.slane %v2036_v37, 2  ;;  %v399_v47 = vmax.f32 %v367_v1, 0.0 }
  0xb3   : > { %v400_v6 = vmax.f32 %v368_v56, 0.0  ;;  %v1612_v15 = vadd.f32 %v1509_v29, %v1368_v57  ;;  %v1024_v42 = vadd.f32 %v945_v4, %v779_v33  ;;  %v5091_v31 = vrot.slane %v3817_v9, 2 }
  0xb4   : > { %v519_v46 = vmul.f32 %v3549_v58, %v3258_v11  ;;  %v5092_v21 = vrot.slane %v3837_v44, 1  ;;  %v2154_v60 = vsel %vm890_vm1, %v2151_v27, %v2153_v10  ;;  %432 = vst [vmem:[#allocation2 + $0x79] sm:$0xff] %v399_v47  ;;  %v558_v24 = vmul.f32 %v3549_v58, %v3261_v12 }
  0xb5   : > { %v1549_v22 = vsel %vm890_vm1, %v5091_v31, %v1548_v26  ;;  %433 = vst [vmem:[#allocation2 + $0x81] sm:$0xff] %v400_v6  ;;  %v3922_v9 = vmul.f32 %v3558_v32, %v3261_v12  ;;  %v1729_v29 = vadd.f32 %v1697_v25, %v1612_v15  ;;  %v1140_v20 = vadd.f32 %v1108_v50, %v1024_v42 }
  0xb6   : > { %v1910_v55 = vsel %vm645_vm0, %v5092_v21, %v1909_v7  ;;  %v803_v44 = vmul.f32 %v3549_v58, %v3264_v13  ;;  %v3928_v49 = vmul.f32 %v3558_v32, %v3264_v13  ;;  %v661_v5 = vrot.slane %v558_v24, 1 }
  0xb7   : > { %v662_v27 = vrot.slane %v3922_v9, 1  ;;  %v1093_v0 = vmul.f32 %v3754_v63, %v3266_v16  ;;  %v1164_v43 = vmul.f32 %v3754_v63, %v3269_v17  ;;  %v1973_v38 = vadd.f32 %v1870_v36, %v1729_v29 }
  0xb8   : > { %v1384_v59 = vadd.f32 %v1305_v28, %v1140_v20  ;;  %v906_v25 = vrot.slane %v803_v44, 2  ;;  %v907_v50 = vrot.slane %v3928_v49, 2  ;;  %v3941_v45 = vmul.f32 %v3761_v14, %v3269_v17 }
  0xb9   : > { %v663_v58 = vsel %vm645_vm0, %v661_v5, %v662_v27  ;;  %v1266_v2 = vrot.slane %v1164_v43, 1  ;;  %v1408_v41 = vmul.f32 %v3754_v63, %v3272_v18  ;;  %v2217_v23 = vadd.f32 %v2114_v34, %v1973_v38 }
  0xba   : > { %v1628_v36 = vadd.f32 %v1549_v22, %v1384_v59  ;;  %v764_v30 = vadd.f32 %v663_v58, %v519_v46  ;;  %v908_v3 = vsel %vm890_vm1, %v906_v25, %v907_v50  ;;  %v1267_v1 = vrot.slane %v3941_v45, 1 }
  0xbb   : > { %v3951_v56 = vmul.f32 %v3761_v14, %v3272_v18  ;;  %v1510_v62 = vrot.slane %v1408_v41, 2  ;;  %v415_v4 = vmax.f32 %v383_v39, 0.0  ;;  %2940 = vmatmul.mubr.f32.gmra.mrb[4].mxu0 %v2217_v23  ;;  %v3953_v57 = vld [vmem:[#allocation2 + $0x78] sm:$0xff]  ;;  %v416_v34 = vmax.f32 %v384_v8, 0.0 }
  0xbc   : > { %v1745_v61 = vadd.f32 %v1713_v54, %v1628_v36  ;;  %v1009_v37 = vadd.f32 %v908_v3, %v764_v30  ;;  %v535_v33 = vmul.f32 %v3630_v48, %v3258_v11  ;;  %v1268_v28 = vsel %vm645_vm0, %v1266_v2, %v1267_v1  ;;  %v3961_v7 = vld [vmem:[#allocation2 + $0x80] sm:$0xff] }
  0xbd   : > { %v1511_v26 = vrot.slane %v3951_v56, 2  ;;  %v1698_v10 = vmul.f32 %v3274_v19, %v3953_v57  ;;  %v1769_v54 = vmul.f32 %v3327_v52, %v3953_v57  ;;  %448 = vst [vmem:[#allocation2 + $0x139] sm:$0xff] %v415_v4  ;;  %v3969_v15 = vmul.f32 %v3327_v52, %v3961_v7  ;;  %449 = vst [vmem:[#allocation2 + $0x141] sm:$0xff] %v416_v34 }
  0xbe   : > { %v1989_v47 = vadd.f32 %v1910_v55, %v1745_v61  ;;  %v1125_v6 = vadd.f32 %v1093_v0, %v1009_v37  ;;  %v2013_v42 = vmul.f32 %v3330_v53, %v3953_v57  ;;  %v3978_v46 = vmul.f32 %v3330_v53, %v3961_v7 }
  0xbf   : > { %v1512_v31 = vsel %vm890_vm1, %v1510_v62, %v1511_v26  ;;  %v1871_v22 = vrot.slane %v1769_v54, 1  ;;  %v582_v21 = vmul.f32 %v3630_v48, %v3261_v12  ;;  %v1872_v29 = vrot.slane %v3969_v15, 1 }
  0xc0   : > { %v2233_v55 = vadd.f32 %v2154_v60, %v1989_v47  ;;  %v1369_v24 = vadd.f32 %v1268_v28, %v1125_v6  ;;  %v2115_v20 = vrot.slane %v2013_v42, 2  ;;  %v2116_v44 = vrot.slane %v3978_v46, 2 }
  0xc1   : > { %v3986_v5 = vmul.f32 %v3638_v40, %v3261_v12  ;;  %v701_v0 = vrot.slane %v582_v21, 1  ;;  %v827_v43 = vmul.f32 %v3630_v48, %v3264_v13  ;;  %v1873_v60 = vsel %vm645_vm0, %v1871_v22, %v1872_v29  ;;  %v472_v22 = vld [vmem:[#allocation2 + $0x58] sm:$0x3] }
  0xc2   : > { %2964 = vmatmul.mubr.f32.gmra.mrb[4].mxu1 %v2233_v55  ;;  %v1613_v38 = vadd.f32 %v1512_v31, %v1369_v24  ;;  %v3995_v59 = vmul.f32 %v3638_v40, %v3264_v13  ;;  %v1109_v25 = vmul.f32 %v3819_v35, %v3266_v16  ;;  %v2117_v39 = vsel %vm890_vm1, %v2115_v20, %v2116_v44 }
  0xc3   : > { %v702_v58 = vrot.slane %v3986_v5, 1  ;;  %v946_v48 = vrot.slane %v827_v43, 2  ;;  %v1188_v2 = vmul.f32 %v3819_v35, %v3269_v17  ;;  %v4008_v23 = vmul.f32 %v3828_v51, %v3269_v17 }
  0xc4   : > { %v1730_v41 = vadd.f32 %v1698_v10, %v1613_v38  ;;  %v947_v8 = vrot.slane %v3995_v59, 2  ;;  %v1432_v36 = vmul.f32 %v3819_v35, %v3272_v18  ;;  %v4012_v30 = vld [vmem:[#allocation2 + $0x138] sm:$0xff]  ;;  %v4019_v4 = vmul.f32 %v3828_v51, %v3272_v18  ;;  %v4027_v54 = vld [vmem:[#allocation2 + $0x140] sm:$0xff] }
  0xc5   : > { %v703_v3 = vsel %vm645_vm0, %v701_v0, %v702_v58  ;;  %v1306_v62 = vrot.slane %v1188_v2, 1  ;;  %v1714_v61 = vmul.f32 %v3274_v19, %v4012_v30  ;;  %v1307_v10 = vrot.slane %v4008_v23, 1 }
  0xc6   : > { %v1974_v37 = vadd.f32 %v1873_v60, %v1730_v41  ;;  %v780_v34 = vadd.f32 %v703_v3, %v535_v33  ;;  %v948_v28 = vsel %vm890_vm1, %v946_v48, %v947_v8  ;;  %v1550_v47 = vrot.slane %v1432_v36, 2  ;;  %v1046_v60 = vld [vmem:[#allocation2 + $0x70] sm:$0x3]  ;;  %v1651_v36 = vld [vmem:[#allocation2 + $0x88] sm:$0x3] }
  0xc7   : > { %v5084_v6 = vrot.slane %v4019_v4, 2  ;;  %v1793_v42 = vmul.f32 %v3327_v52, %v4012_v30  ;;  %v4034_v31 = vmul.f32 %v3327_v52, %v4027_v54  ;;  %v1308_v55 = vsel %vm645_vm0, %v1306_v62, %v1307_v10 }
  0xc8   : > { %v2218_v33 = vadd.f32 %v2117_v39, %v1974_v37  ;;  %v1025_v21 = vadd.f32 %v948_v28, %v780_v34  ;;  %v2037_v24 = vmul.f32 %v3330_v53, %v4012_v30  ;;  %v4047_v38 = vmul.f32 %v3330_v53, %v4027_v54 }
  0xc9   : > { %v1552_v20 = vsel %vm890_vm1, %v1550_v47, %v5084_v6  ;;  %v1911_v0 = vrot.slane %v1793_v42, 1  ;;  %v5082_v43 = vrot.slane %v4034_v31, 1  ;;  %v520_v2 = vmul.f32 %v3558_v32, %v3258_v11 }
  0xca   : > { %2942 = vmatprep.mubr.f32.mxu0 %v2218_v33  ;;  %v1141_v39 = vadd.f32 %v1109_v25, %v1025_v21  ;;  %v2155_v48 = vrot.slane %v2037_v24, 2  ;;  %v560_v41 = vmul.f32 %v3261_v12, %v472_v22  ;;  %v5083_v62 = vrot.slane %v4047_v38, 2 }
  0xcb   : > { %v1913_v3 = vsel %vm645_vm0, %v1911_v0, %v5082_v43  ;;  %v805_v37 = vmul.f32 %v3264_v13, %v472_v22  ;;  %v1094_v34 = vmul.f32 %v3761_v14, %v3266_v16  ;;  %v1166_v47 = vmul.f32 %v3269_v17, %v1046_v60 }
  0xcc   : > { %v1385_v28 = vadd.f32 %v1308_v55, %v1141_v39  ;;  %v664_v25 = vrot.slane %v560_v41, 1  ;;  %v1410_v32 = vmul.f32 %v3272_v18, %v1046_v60  ;;  %v2157_v42 = vsel %vm890_vm1, %v2155_v48, %v5083_v62  ;;  %v496_v41 = vld [vmem:[#allocation2 + $0x118] sm:$0x3]  ;;  %v1070_v62 = vld [vmem:[#allocation2 + $0x130] sm:$0x3] }
  0xcd   : > { %v909_v33 = vrot.slane %v805_v37, 2  ;;  %v1699_v21 = vmul.f32 %v3274_v19, %v3961_v7  ;;  %v1771_v24 = vmul.f32 %v3327_v52, %v1651_v36  ;;  %v1269_v0 = vrot.slane %v1166_v47, 1 }
  0xce   : > { %v1629_v22 = vadd.f32 %v1552_v20, %v1385_v28  ;;  %v665_v55 = vsel %vm645_vm0, %v662_v27, %v664_v25  ;;  %v1513_v39 = vrot.slane %v1410_v32, 2  ;;  %v2015_v37 = vmul.f32 %v3330_v53, %v1651_v36 }
  0xcf   : > { %v765_v43 = vadd.f32 %v665_v55, %v520_v2  ;;  %v910_v60 = vsel %vm890_vm1, %v907_v50, %v909_v33  ;;  %v1874_v48 = vrot.slane %v1771_v24, 1  ;;  %v1270_v20 = vsel %vm645_vm0, %v1267_v1, %v1269_v0  ;;  %v370_v24 = vld [vmem:[#allocation3 + $0x58] sm:$0xff] }
  0xd0   : > { %v1746_v6 = vadd.f32 %v1714_v61, %v1629_v22  ;;  %v1514_v9 = vsel %vm890_vm1, %v1511_v26, %v1513_v39  ;;  %v536_v27 = vmul.f32 %v3638_v40, %v3258_v11  ;;  %v2118_v50 = vrot.slane %v2015_v37, 2  ;;  %v1675_v26 = vld [vmem:[#allocation2 + $0x148] sm:$0x3] }
  0xd1   : > { %v1010_v2 = vadd.f32 %v910_v60, %v765_v43  ;;  %v1875_v49 = vsel %vm645_vm0, %v1872_v29, %v1874_v48  ;;  %v584_v36 = vmul.f32 %v3261_v12, %v496_v41  ;;  %v829_v45 = vmul.f32 %v3264_v13, %v496_v41 }
  0xd2   : > { %v1990_v61 = vadd.f32 %v1913_v3, %v1746_v6  ;;  %v1110_v1 = vmul.f32 %v3828_v51, %v3266_v16  ;;  %v1190_v56 = vmul.f32 %v3269_v17, %v1070_v62  ;;  %v2119_v40 = vsel %vm890_vm1, %v2116_v44, %v2118_v50  ;;  %v369_v3 = vld [vmem:[#allocation3 + $0x50] sm:$0xff] }
  0xd3   : > { %v1126_v28 = vadd.f32 %v1094_v34, %v1010_v2  ;;  %v704_v15 = vrot.slane %v584_v36, 1  ;;  %v1434_v29 = vmul.f32 %v3272_v18, %v1070_v62  ;;  %v949_v25 = vrot.slane %v829_v45, 2 }
  0xd4   : > { %v2234_v43 = vadd.f32 %v2157_v42, %v1990_v61  ;;  %v1309_v47 = vrot.slane %v1190_v56, 1  ;;  %v1715_v6 = vmul.f32 %v3274_v19, %v4027_v54  ;;  %v1795_v46 = vmul.f32 %v3327_v52, %v1675_v26 }
  0xd5   : > { %v1370_v32 = vadd.f32 %v1270_v20, %v1126_v28  ;;  %v705_v33 = vsel %vm645_vm0, %v702_v58, %v704_v15  ;;  %v1553_v34 = vrot.slane %v1434_v29, 2  ;;  %v950_v62 = vsel %vm890_vm1, %v947_v8, %v949_v25  ;;  %v386_v29 = vld [vmem:[#allocation3 + $0xd8] sm:$0xff] }
  0xd6   : > { %2966 = vmatprep.mubr.f32.mxu1 %v2234_v43  ;;  %v781_v44 = vadd.f32 %v705_v33, %v536_v27  ;;  %v1310_v42 = vsel %vm645_vm0, %v1307_v10, %v1309_v47  ;;  %v2039_v22 = vmul.f32 %v3330_v53, %v1675_v26  ;;  %v5093_v5 = vrot.slane %v4019_v4, 2  ;;  %v385_v26 = vld [vmem:[#allocation3 + $0xd0] sm:$0xff] }
  0xd7   : > { %v1614_v55 = vadd.f32 %v1514_v9, %v1370_v32  ;;  %v1914_v0 = vrot.slane %v1795_v46, 1  ;;  %v401_v39 = vmax.f32 %v369_v3, 0.0  ;;  %v402_v48 = vmax.f32 %v370_v24, 0.0 }
  0xd8   : > { %v1554_v58 = vsel %vm890_vm1, %v5093_v5, %v1553_v34  ;;  %v1026_v41 = vadd.f32 %v950_v62, %v781_v44  ;;  %v2158_v60 = vrot.slane %v2039_v22, 2  ;;  %v521_v59 = vmul.f32 %v3754_v63, %v3258_v11 }
  0xd9   : > { %v1731_v8 = vadd.f32 %v1699_v21, %v1614_v55  ;;  %v5094_v23 = vrot.slane %v4034_v31, 1  ;;  %434 = vst [vmem:[#allocation2 + $0x91] sm:$0xff] %v401_v39  ;;  %v561_v37 = vmul.f32 %v3754_v63, %v3261_v12  ;;  %v4119_v4 = vmul.f32 %v3761_v14, %v3261_v12  ;;  %435 = vst [vmem:[#allocation2 + $0x99] sm:$0xff] %v402_v48 }
  0xda   : > { %v1142_v20 = vadd.f32 %v1110_v1, %v1026_v41  ;;  %v5095_v9 = vrot.slane %v4047_v38, 2  ;;  %v806_v21 = vmul.f32 %v3754_v63, %v3264_v13  ;;  %v4128_v31 = vmul.f32 %v3761_v14, %v3264_v13 }
  0xdb   : > { %v1915_v10 = vsel %vm645_vm0, %v5094_v23, %v1914_v0  ;;  %v1975_v2 = vadd.f32 %v1875_v49, %v1731_v8  ;;  %v666_v50 = vrot.slane %v561_v37, 1  ;;  %v667_v36 = vrot.slane %v4119_v4, 1 }
  0xdc   : > { %v2159_v27 = vsel %vm890_vm1, %v5095_v9, %v2158_v60  ;;  %v1095_v61 = vmul.f32 %v3953_v57, %v3266_v16  ;;  %v1386_v45 = vadd.f32 %v1310_v42, %v1142_v20  ;;  %v911_v1 = vrot.slane %v806_v21, 2 }
  0xdd   : > { %v912_v38 = vrot.slane %v4128_v31, 2  ;;  %v1167_v56 = vmul.f32 %v3953_v57, %v3269_v17  ;;  %v2219_v63 = vadd.f32 %v2119_v40, %v1975_v2  ;;  %v668_v28 = vsel %vm645_vm0, %v666_v50, %v667_v36 }
  0xde   : > { %v4141_v49 = vmul.f32 %v3961_v7, %v3269_v17  ;;  %v1411_v15 = vmul.f32 %v3953_v57, %v3272_v18  ;;  %v1630_v43 = vadd.f32 %v1554_v58, %v1386_v45  ;;  %v766_v25 = vadd.f32 %v668_v28, %v521_v59 }
  0xdf   : > { %v913_v47 = vsel %vm890_vm1, %v911_v1, %v912_v38  ;;  %v1271_v3 = vrot.slane %v1167_v56, 1  ;;  %2943 = vmatmul.mubr.f32.gmra.mrb[6].mxu0 %v2219_v63  ;;  %v4151_v32 = vmul.f32 %v3961_v7, %v3272_v18  ;;  %v417_v34 = vmax.f32 %v385_v26, 0.0 }
  0xe0   : > { %v1272_v40 = vrot.slane %v4141_v49, 1  ;;  %v1515_v33 = vrot.slane %v1411_v15, 2  ;;  %v1747_v46 = vadd.f32 %v1715_v6, %v1630_v43  ;;  %v1011_v24 = vadd.f32 %v913_v47, %v766_v25  ;;  %v4153_v44 = vld [vmem:[#allocation2 + $0x90] sm:$0xff]  ;;  %v4161_v5 = vld [vmem:[#allocation2 + $0x98] sm:$0xff] }
  0xe1   : > { %v418_v62 = vmax.f32 %v386_v29, 0.0  ;;  %v537_v42 = vmul.f32 %v3819_v35, %v3258_v11  ;;  %v1516_v55 = vrot.slane %v4151_v32, 2  ;;  %v1700_v58 = vmul.f32 %v3274_v19, %v4153_v44  ;;  %450 = vst [vmem:[#allocation2 + $0x151] sm:$0xff] %v417_v34 }
  0xe2   : > { %v1273_v22 = vsel %vm645_vm0, %v1271_v3, %v1272_v40  ;;  %v1772_v6 = vmul.f32 %v3327_v52, %v4153_v44  ;;  %v1991_v0 = vadd.f32 %v1915_v10, %v1747_v46  ;;  %v1127_v39 = vadd.f32 %v1095_v61, %v1011_v24 }
  0xe3   : > { %v4169_v41 = vmul.f32 %v3327_v52, %v4161_v5  ;;  %v2016_v60 = vmul.f32 %v3330_v53, %v4153_v44  ;;  %451 = vst [vmem:[#allocation2 + $0x159] sm:$0xff] %v418_v62  ;;  %v1517_v48 = vsel %vm890_vm1, %v1515_v33, %v1516_v55  ;;  %v4178_v8 = vmul.f32 %v3330_v53, %v4161_v5 }
  0xe4   : > { %v1876_v59 = vrot.slane %v1772_v6, 1  ;;  %v585_v23 = vmul.f32 %v3819_v35, %v3261_v12  ;;  %v2235_v10 = vadd.f32 %v2159_v27, %v1991_v0  ;;  %v1371_v37 = vadd.f32 %v1273_v22, %v1127_v39 }
  0xe5   : > { %v1877_v20 = vrot.slane %v4169_v41, 1  ;;  %v2120_v9 = vrot.slane %v2016_v60, 2  ;;  %v2121_v21 = vrot.slane %v4178_v8, 2  ;;  %v4186_v2 = vmul.f32 %v3828_v51, %v3261_v12 }
  0xe6   : > { %v706_v50 = vrot.slane %v585_v23, 1  ;;  %v830_v61 = vmul.f32 %v3819_v35, %v3264_v13  ;;  %2967 = vmatmul.mubr.f32.gmra.mrb[6].mxu1 %v2235_v10  ;;  %v1615_v45 = vadd.f32 %v1517_v48, %v1371_v37  ;;  %v4195_v1 = vmul.f32 %v3828_v51, %v3264_v13 }
  0xe7   : > { %v1878_v27 = vsel %vm645_vm0, %v1876_v59, %v1877_v20  ;;  %v1111_v56 = vmul.f32 %v4012_v30, %v3266_v16  ;;  %v2122_v26 = vsel %vm890_vm1, %v2120_v9, %v2121_v21  ;;  %v707_v63 = vrot.slane %v4186_v2, 1  ;;  %v475_v59 = vld [vmem:[#allocation2 + $0x70] sm:$0x3] }
  0xe8   : > { %v951_v35 = vrot.slane %v830_v61, 2  ;;  %v1191_v28 = vmul.f32 %v4012_v30, %v3269_v17  ;;  %v1732_v15 = vadd.f32 %v1700_v58, %v1615_v45  ;;  %v952_v29 = vrot.slane %v4195_v1, 2  ;;  %v4212_v47 = vld [vmem:[#allocation2 + $0x150] sm:$0xff] }
  0xe9   : > { %v4208_v43 = vmul.f32 %v4027_v54, %v3269_v17  ;;  %v1435_v25 = vmul.f32 %v4012_v30, %v3272_v18  ;;  %v708_v3 = vsel %vm645_vm0, %v706_v50, %v707_v63  ;;  %v4219_v34 = vmul.f32 %v4027_v54, %v3272_v18 }
  0xea   : > { %v1311_v33 = vrot.slane %v1191_v28, 1  ;;  %v1716_v46 = vmul.f32 %v3274_v19, %v4212_v47  ;;  %v1976_v24 = vadd.f32 %v1878_v27, %v1732_v15  ;;  %v782_v62 = vadd.f32 %v708_v3, %v537_v42  ;;  %v4227_v6 = vld [vmem:[#allocation2 + $0x158] sm:$0xff]  ;;  %v1049_v27 = vld [vmem:[#allocation2 + $0x88] sm:$0x3] }
  0xeb   : > { %v953_v22 = vsel %vm890_vm1, %v951_v35, %v952_v29  ;;  %v1312_v58 = vrot.slane %v4208_v43, 1  ;;  %v1555_v0 = vrot.slane %v1435_v25, 2  ;;  %v5087_v39 = vrot.slane %v4219_v34, 2  ;;  %v1654_v25 = vld [vmem:[#allocation2 + $0xa0] sm:$0x3] }
  0xec   : > { %v1796_v60 = vmul.f32 %v3327_v52, %v4212_v47  ;;  %v4234_v48 = vmul.f32 %v3327_v52, %v4227_v6  ;;  %v2220_v42 = vadd.f32 %v2122_v26, %v1976_v24  ;;  %v1027_v23 = vadd.f32 %v953_v22, %v782_v62 }
  0xed   : > { %v1313_v10 = vsel %vm645_vm0, %v1311_v33, %v1312_v58  ;;  %v2040_v37 = vmul.f32 %v3330_v53, %v4212_v47  ;;  %v1557_v9 = vsel %vm890_vm1, %v1555_v0, %v5087_v39  ;;  %v4247_v45 = vmul.f32 %v3330_v53, %v4227_v6 }
  0xee   : > { %v1916_v50 = vrot.slane %v1796_v60, 1  ;;  %v5085_v61 = vrot.slane %v4234_v48, 1  ;;  %2945 = vmatprep.mubr.f32.mxu0 %v2220_v42  ;;  %v1143_v26 = vadd.f32 %v1111_v56, %v1027_v23  ;;  %v522_v28 = vmul.f32 %v3761_v14, %v3258_v11 }
  0xef   : > { %v2160_v35 = vrot.slane %v2040_v37, 2  ;;  %v563_v15 = vmul.f32 %v3261_v12, %v475_v59  ;;  %v5086_v33 = vrot.slane %v4247_v45, 2  ;;  %v808_v24 = vmul.f32 %v3264_v13, %v475_v59 }
  0xf0   : > { %v1918_v3 = vsel %vm645_vm0, %v1916_v50, %v5085_v61  ;;  %v1096_v62 = vmul.f32 %v3961_v7, %v3266_v16  ;;  %v1387_v22 = vadd.f32 %v1313_v10, %v1143_v26  ;;  %v1169_v0 = vmul.f32 %v3269_v17, %v1049_v27 }
  0xf1   : > { %v669_v56 = vrot.slane %v563_v15, 1  ;;  %v1413_v14 = vmul.f32 %v3272_v18, %v1049_v27  ;;  %v2162_v60 = vsel %vm890_vm1, %v2160_v35, %v5086_v33  ;;  %v914_v42 = vrot.slane %v808_v24, 2  ;;  %v499_v15 = vld [vmem:[#allocation2 + $0x130] sm:$0x3]  ;;  %v1073_v33 = vld [vmem:[#allocation2 + $0x148] sm:$0x3] }
  0xf2   : > { %v1701_v23 = vmul.f32 %v3274_v19, %v4161_v5  ;;  %v1774_v37 = vmul.f32 %v3327_v52, %v1654_v25  ;;  %v1631_v59 = vadd.f32 %v1557_v9, %v1387_v22  ;;  %v1274_v50 = vrot.slane %v1169_v0, 1 }
  0xf3   : > { %v670_v10 = vsel %vm645_vm0, %v667_v36, %v669_v56  ;;  %v1518_v26 = vrot.slane %v1413_v14, 2  ;;  %v915_v27 = vsel %vm890_vm1, %v912_v38, %v914_v42  ;;  %v2018_v24 = vmul.f32 %v3330_v53, %v1654_v25 }
  0xf4   : > { %v767_v61 = vadd.f32 %v670_v10, %v522_v28  ;;  %v1879_v35 = vrot.slane %v1774_v37, 1  ;;  %v1748_v39 = vadd.f32 %v1716_v46, %v1631_v59  ;;  %v1275_v9 = vsel %vm645_vm0, %v1272_v40, %v1274_v50  ;;  %v372_v37 = vld [vmem:[#allocation3 + $0x68] sm:$0xff] }
  0xf5   : > { %v1519_v4 = vsel %vm890_vm1, %v1516_v55, %v1518_v26  ;;  %v538_v36 = vmul.f32 %v3828_v51, %v3258_v11  ;;  %v2123_v38 = vrot.slane %v2018_v24, 2  ;;  %v587_v25 = vmul.f32 %v3261_v12, %v499_v15  ;;  %v1678_v55 = vld [vmem:[#allocation2 + $0x160] sm:$0x3] }
  0xf6   : > { %v1012_v28 = vadd.f32 %v915_v27, %v767_v61  ;;  %v1880_v31 = vsel %vm645_vm0, %v1877_v20, %v1879_v35  ;;  %v1992_v46 = vadd.f32 %v1918_v3, %v1748_v39  ;;  %v832_v49 = vmul.f32 %v3264_v13, %v499_v15  ;;  %v371_v3 = vld [vmem:[#allocation3 + $0x60] sm:$0xff] }
  0xf7   : > { %v1112_v40 = vmul.f32 %v4027_v54, %v3266_v16  ;;  %v1193_v32 = vmul.f32 %v3269_v17, %v1073_v33  ;;  %v2124_v51 = vsel %vm890_vm1, %v2121_v21, %v2123_v38  ;;  %v709_v41 = vrot.slane %v587_v25, 1 }
  0xf8   : > { %v1128_v22 = vadd.f32 %v1096_v62, %v1012_v28  ;;  %v1437_v20 = vmul.f32 %v3272_v18, %v1073_v33  ;;  %v2236_v61 = vadd.f32 %v2162_v60, %v1992_v46  ;;  %v954_v56 = vrot.slane %v832_v49, 2 }
  0xf9   : > { %v1314_v0 = vrot.slane %v1193_v32, 1  ;;  %v1717_v39 = vmul.f32 %v3274_v19, %v4227_v6  ;;  %v710_v42 = vsel %vm645_vm0, %v707_v63, %v709_v41  ;;  %v1798_v8 = vmul.f32 %v3327_v52, %v1678_v55 }
  0xfa   : > { %v1372_v14 = vadd.f32 %v1275_v9, %v1128_v22  ;;  %v1558_v62 = vrot.slane %v1437_v20, 2  ;;  %2969 = vmatprep.mubr.f32.mxu1 %v2236_v61  ;;  %v783_v21 = vadd.f32 %v710_v42, %v538_v36  ;;  %v955_v33 = vsel %vm890_vm1, %v952_v29, %v954_v56  ;;  %v388_v20 = vld [vmem:[#allocation3 + $0xe8] sm:$0xff] }
  0xfb   : > { %v1315_v60 = vsel %vm645_vm0, %v1312_v58, %v1314_v0  ;;  %v2042_v59 = vmul.f32 %v3330_v53, %v1678_v55  ;;  %v5096_v2 = vrot.slane %v4219_v34, 2  ;;  %v1919_v50 = vrot.slane %v1798_v8, 1  ;;  %v387_v55 = vld [vmem:[#allocation3 + $0xe0] sm:$0xff] }
  0xfc   : > { %v1616_v10 = vadd.f32 %v1519_v4, %v1372_v14  ;;  %v403_v26 = vmax.f32 %v371_v3, 0.0  ;;  %v1028_v15 = vadd.f32 %v955_v33, %v783_v21  ;;  %v404_v35 = vmax.f32 %v372_v37, 0.0 }
  0xfd   : > { %v1559_v63 = vsel %vm890_vm1, %v5096_v2, %v1558_v62  ;;  %v2163_v27 = vrot.slane %v2042_v59, 2  ;;  %v523_v1 = vmul.f32 %v3953_v57, %v3258_v11  ;;  %v5097_v43 = vrot.slane %v4234_v48, 1 }
  0xfe   : > { %v1733_v29 = vadd.f32 %v1701_v23, %v1616_v10  ;;  %436 = vst [vmem:[#allocation2 + $0xa9] sm:$0xff] %v403_v26  ;;  %v564_v24 = vmul.f32 %v3953_v57, %v3261_v12  ;;  %v4319_v34 = vmul.f32 %v3961_v7, %v3261_v12  ;;  %v1144_v9 = vadd.f32 %v1112_v40, %v1028_v15 }
  0xff   : > { %v1920_v58 = vsel %vm645_vm0, %v5097_v43, %v1919_v50  ;;  %v5098_v4 = vrot.slane %v4247_v45, 2  ;;  %437 = vst [vmem:[#allocation2 + $0xb1] sm:$0xff] %v404_v35  ;;  %v809_v23 = vmul.f32 %v3953_v57, %v3264_v13  ;;  %v4328_v48 = vmul.f32 %v3961_v7, %v3264_v13 }
 0x100   : > { %v1977_v28 = vadd.f32 %v1880_v31, %v1733_v29  ;;  %v671_v38 = vrot.slane %v564_v24, 1  ;;  %v672_v25 = vrot.slane %v4319_v34, 1  ;;  %v1097_v46 = vmul.f32 %v4153_v44, %v3266_v16 }
 0x101   : > { %v2164_v36 = vsel %vm890_vm1, %v5098_v4, %v2163_v27  ;;  %v1388_v49 = vadd.f32 %v1315_v60, %v1144_v9  ;;  %v916_v40 = vrot.slane %v809_v23, 2  ;;  %v917_v45 = vrot.slane %v4328_v48, 2 }
 0x102   : > { %v1170_v32 = vmul.f32 %v4153_v44, %v3269_v17  ;;  %v2221_v57 = vadd.f32 %v2124_v51, %v1977_v28  ;;  %v673_v22 = vsel %vm645_vm0, %v671_v38, %v672_v25  ;;  %v4341_v31 = vmul.f32 %v4161_v5, %v3269_v17 }
 0x103   : > { %v1414_v41 = vmul.f32 %v4153_v44, %v3272_v18  ;;  %v1632_v61 = vadd.f32 %v1559_v63, %v1388_v49  ;;  %v768_v56 = vadd.f32 %v673_v22, %v523_v1  ;;  %v918_v0 = vsel %vm890_vm1, %v916_v40, %v917_v45 }
 0x104   : > { %v1276_v3 = vrot.slane %v1170_v32, 1  ;;  %2946 = vmatmul.mubr.f32.gmra.mrb[8].mxu0 %v2221_v57  ;;  %v1277_v51 = vrot.slane %v4341_v31, 1  ;;  %v4351_v14 = vmul.f32 %v4161_v5, %v3272_v18  ;;  %v419_v62 = vmax.f32 %v387_v55, 0.0 }
 0x105   : > { %v1520_v42 = vrot.slane %v1414_v41, 2  ;;  %v1749_v8 = vadd.f32 %v1717_v39, %v1632_v61  ;;  %v1013_v37 = vadd.f32 %v918_v0, %v768_v56  ;;  %v4353_v21 = vld [vmem:[#allocation2 + $0xa8] sm:$0xff]  ;;  %v420_v33 = vmax.f32 %v388_v20, 0.0 }
 0x106   : > { %v539_v60 = vmul.f32 %v4012_v30, %v3258_v11  ;;  %v1278_v59 = vsel %vm645_vm0, %v1276_v3, %v1277_v51  ;;  %v1521_v10 = vrot.slane %v4351_v14, 2  ;;  %v4361_v2 = vld [vmem:[#allocation2 + $0xb0] sm:$0xff]  ;;  %v1702_v63 = vmul.f32 %v3274_v19, %v4353_v21  ;;  %452 = vst [vmem:[#allocation2 + $0x169] sm:$0xff] %v419_v62 }
 0x107   : > { %v1775_v39 = vmul.f32 %v3327_v52, %v4353_v21  ;;  %v1993_v50 = vadd.f32 %v1920_v58, %v1749_v8  ;;  %v1129_v26 = vadd.f32 %v1097_v46, %v1013_v37  ;;  %v4369_v15 = vmul.f32 %v3327_v52, %v4361_v2  ;;  %453 = vst [vmem:[#allocation2 + $0x171] sm:$0xff] %v420_v33 }
 0x108   : > { %v2019_v27 = vmul.f32 %v3330_v53, %v4353_v21  ;;  %v1522_v35 = vsel %vm890_vm1, %v1520_v42, %v1521_v10  ;;  %v4378_v29 = vmul.f32 %v3330_v53, %v4361_v2  ;;  %v588_v43 = vmul.f32 %v4012_v30, %v3261_v12 }
 0x109   : > { %v1881_v1 = vrot.slane %v1775_v39, 1  ;;  %v2237_v58 = vadd.f32 %v2164_v36, %v1993_v50  ;;  %v1373_v24 = vadd.f32 %v1278_v59, %v1129_v26  ;;  %v1882_v9 = vrot.slane %v4369_v15, 1 }
 0x10a   : > { %v2125_v4 = vrot.slane %v2019_v27, 2  ;;  %v2126_v23 = vrot.slane %v4378_v29, 2  ;;  %v4386_v28 = vmul.f32 %v4027_v54, %v3261_v12  ;;  %v711_v38 = vrot.slane %v588_v43, 1 }
 0x10b   : > { %v833_v46 = vmul.f32 %v4012_v30, %v3264_v13  ;;  %2970 = vmatmul.mubr.f32.gmra.mrb[8].mxu1 %v2237_v58  ;;  %v1617_v49 = vadd.f32 %v1522_v35, %v1373_v24  ;;  %v1883_v36 = vsel %vm645_vm0, %v1881_v1, %v1882_v9  ;;  %v4395_v40 = vmul.f32 %v4027_v54, %v3264_v13  ;;  %v478_v1 = vld [vmem:[#allocation2 + $0x88] sm:$0x3] }
 0x10c   : > { %v1113_v32 = vmul.f32 %v4212_v47, %v3266_v16  ;;  %v2127_v55 = vsel %vm890_vm1, %v2125_v4, %v2126_v23  ;;  %v712_v57 = vrot.slane %v4386_v28, 1  ;;  %v1194_v22 = vmul.f32 %v4212_v47, %v3269_v17 }
 0x10d   : > { %v956_v30 = vrot.slane %v833_v46, 2  ;;  %v1734_v41 = vadd.f32 %v1702_v63, %v1617_v49  ;;  %v957_v20 = vrot.slane %v4395_v40, 2  ;;  %v4408_v61 = vmul.f32 %v4227_v6, %v3269_v17  ;;  %v4412_v0 = vld [vmem:[#allocation2 + $0x168] sm:$0xff] }
 0x10e   : > { %v1438_v56 = vmul.f32 %v4212_v47, %v3272_v18  ;;  %v713_v3 = vsel %vm645_vm0, %v711_v38, %v712_v57  ;;  %v1316_v42 = vrot.slane %v1194_v22, 1  ;;  %v4419_v62 = vmul.f32 %v4227_v6, %v3272_v18  ;;  %v4427_v39 = vld [vmem:[#allocation2 + $0x170] sm:$0xff] }
 0x10f   : > { %v1718_v8 = vmul.f32 %v3274_v19, %v4412_v0  ;;  %v1978_v37 = vadd.f32 %v1883_v36, %v1734_v41  ;;  %v784_v33 = vadd.f32 %v713_v3, %v539_v60  ;;  %v958_v59 = vsel %vm890_vm1, %v956_v30, %v957_v20  ;;  %v1052_v36 = vld [vmem:[#allocation2 + $0xa0] sm:$0x3] }
 0x110   : > { %v1317_v63 = vrot.slane %v4408_v61, 1  ;;  %v1560_v50 = vrot.slane %v1438_v56, 2  ;;  %v5090_v26 = vrot.slane %v4419_v62, 2  ;;  %v1799_v27 = vmul.f32 %v3327_v52, %v4412_v0  ;;  %v1657_v56 = vld [vmem:[#allocation2 + $0xb8] sm:$0x3] }
 0x111   : > { %v4434_v35 = vmul.f32 %v3327_v52, %v4427_v39  ;;  %v2222_v60 = vadd.f32 %v2127_v55, %v1978_v37  ;;  %v1029_v43 = vadd.f32 %v958_v59, %v784_v33  ;;  %v2043_v24 = vmul.f32 %v3330_v53, %v4412_v0 }
 0x112   : > { %v1318_v58 = vsel %vm645_vm0, %v1316_v42, %v1317_v63  ;;  %v1562_v4 = vsel %vm890_vm1, %v1560_v50, %v5090_v26  ;;  %v1921_v38 = vrot.slane %v1799_v27, 1  ;;  %v4447_v49 = vmul.f32 %v3330_v53, %v4427_v39 }
 0x113   : > { %v5088_v46 = vrot.slane %v4434_v35, 1  ;;  %2948 = vmatprep.mubr.f32.mxu0 %v2222_v60  ;;  %v1145_v55 = vadd.f32 %v1113_v32, %v1029_v43  ;;  %v2165_v30 = vrot.slane %v2043_v24, 2  ;;  %v524_v22 = vmul.f32 %v3961_v7, %v3258_v11 }
 0x114   : > { %v566_v41 = vmul.f32 %v3261_v12, %v478_v1  ;;  %v5089_v42 = vrot.slane %v4447_v49, 2  ;;  %v811_v37 = vmul.f32 %v3264_v13, %v478_v1  ;;  %v1098_v33 = vmul.f32 %v4161_v5, %v3266_v16 }
 0x115   : > { %v1923_v3 = vsel %vm645_vm0, %v1921_v38, %v5088_v46  ;;  %v1389_v59 = vadd.f32 %v1318_v58, %v1145_v55  ;;  %v1172_v50 = vmul.f32 %v3269_v17, %v1052_v36  ;;  %v1416_v7 = vmul.f32 %v3272_v18, %v1052_v36 }
 0x116   : > { %v674_v32 = vrot.slane %v566_v41, 1  ;;  %v2167_v27 = vsel %vm890_vm1, %v2165_v30, %v5089_v42  ;;  %v919_v60 = vrot.slane %v811_v37, 2  ;;  %v1703_v43 = vmul.f32 %v3274_v19, %v4361_v2  ;;  %v502_v41 = vld [vmem:[#allocation2 + $0x148] sm:$0x3]  ;;  %v1076_v42 = vld [vmem:[#allocation2 + $0x160] sm:$0x3] }
 0x117   : > { %v1777_v24 = vmul.f32 %v3327_v52, %v1657_v56  ;;  %v1633_v1 = vadd.f32 %v1562_v4, %v1389_v59  ;;  %v1279_v38 = vrot.slane %v1172_v50, 1  ;;  %v1523_v55 = vrot.slane %v1416_v7, 2 }
 0x118   : > { %v675_v58 = vsel %vm645_vm0, %v672_v25, %v674_v32  ;;  %v920_v36 = vsel %vm890_vm1, %v917_v45, %v919_v60  ;;  %v2021_v37 = vmul.f32 %v3330_v53, %v1657_v56  ;;  %v540_v25 = vmul.f32 %v4027_v54, %v3258_v11 }
 0x119   : > { %v769_v46 = vadd.f32 %v675_v58, %v524_v22  ;;  %v1884_v30 = vrot.slane %v1777_v24, 1  ;;  %v1750_v26 = vadd.f32 %v1718_v8, %v1633_v1  ;;  %v1280_v4 = vsel %vm645_vm0, %v1277_v51, %v1279_v38 }
 0x11a   : > { %v1524_v34 = vsel %vm890_vm1, %v1521_v10, %v1523_v55  ;;  %v2128_v45 = vrot.slane %v2021_v37, 2  ;;  %v590_v56 = vmul.f32 %v3261_v12, %v502_v41  ;;  %v835_v31 = vmul.f32 %v3264_v13, %v502_v41  ;;  %v1681_v10 = vld [vmem:[#allocation2 + $0x178] sm:$0x3] }
 0x11b   : > { %v1014_v22 = vadd.f32 %v920_v36, %v769_v46  ;;  %v1885_v48 = vsel %vm645_vm0, %v1882_v9, %v1884_v30  ;;  %v1994_v8 = vadd.f32 %v1923_v3, %v1750_v26  ;;  %v1114_v51 = vmul.f32 %v4227_v6, %v3266_v16 }
 0x11c   : > { %v1196_v14 = vmul.f32 %v3269_v17, %v1076_v42  ;;  %v2129_v54 = vsel %vm890_vm1, %v2126_v23, %v2128_v45  ;;  %v714_v15 = vrot.slane %v590_v56, 1  ;;  %v1440_v9 = vmul.f32 %v3272_v18, %v1076_v42 }
 0x11d   : > { %v1130_v59 = vadd.f32 %v1098_v33, %v1014_v22  ;;  %v2238_v46 = vadd.f32 %v2167_v27, %v1994_v8  ;;  %v959_v32 = vrot.slane %v835_v31, 2  ;;  %v1719_v26 = vmul.f32 %v3274_v19, %v4427_v39 }
 0x11e   : > { %v1319_v50 = vrot.slane %v1196_v14, 1  ;;  %v715_v7 = vsel %vm645_vm0, %v712_v57, %v714_v15  ;;  %v1563_v60 = vrot.slane %v1440_v9, 2  ;;  %v1801_v33 = vmul.f32 %v3327_v52, %v1681_v10 }
 0x11f   : > { %v1374_v3 = vadd.f32 %v1280_v4, %v1130_v59  ;;  %2972 = vmatprep.mubr.f32.mxu1 %v2238_v46  ;;  %v785_v29 = vadd.f32 %v715_v7, %v540_v25  ;;  %v960_v23 = vsel %vm890_vm1, %v957_v20, %v959_v32  ;;  %v2045_v27 = vmul.f32 %v3330_v53, %v1681_v10  ;;  %v4553_v46 = vld [vmem:[#allocation2 + $0xc0] sm:$0xff] }
 0x120   : > { %v1320_v42 = vsel %vm645_vm0, %v1317_v63, %v1319_v50  ;;  %v5099_v28 = vrot.slane %v4419_v62, 2  ;;  %v1924_v1 = vrot.slane %v1801_v33, 1  ;;  %v525_v58 = vmul.f32 %v4153_v44, %v3258_v11  ;;  %v4555_v50 = vld [vmem:[#allocation2 + $0xc8] sm:$0xff] }
 0x121   : > { %v1618_v24 = vadd.f32 %v1524_v34, %v1374_v3  ;;  %v1030_v38 = vadd.f32 %v960_v23, %v785_v29  ;;  %v2168_v55 = vrot.slane %v2045_v27, 2  ;;  %v567_v40 = vmul.f32 %v4153_v44, %v3261_v12  ;;  %v390_v27 = vld [vmem:[#allocation3 + $0xf8] sm:$0xff] }
 0x122   : > { %v1564_v57 = vsel %vm890_vm1, %v5099_v28, %v1563_v60  ;;  %v4516_v20 = vmul.f32 %v4161_v5, %v3261_v12  ;;  %v5100_v63 = vrot.slane %v4434_v35, 1  ;;  %v812_v41 = vmul.f32 %v4153_v44, %v3264_v13  ;;  %v389_v60 = vld [vmem:[#allocation3 + $0xf0] sm:$0xff] }
 0x123   : > { %v1735_v61 = vadd.f32 %v1703_v43, %v1618_v24  ;;  %v4525_v36 = vmul.f32 %v4161_v5, %v3264_v13  ;;  %v1146_v30 = vadd.f32 %v1114_v51, %v1030_v38  ;;  %v5101_v37 = vrot.slane %v4447_v49, 2 }
 0x124   : > { %v1925_v62 = vsel %vm645_vm0, %v5100_v63, %v1924_v1  ;;  %v676_v34 = vrot.slane %v567_v40, 1  ;;  %v677_v25 = vrot.slane %v4516_v20, 1  ;;  %v921_v22 = vrot.slane %v812_v41, 2 }
 0x125   : > { %v2169_v4 = vsel %vm890_vm1, %v5101_v37, %v2168_v55  ;;  %v1979_v43 = vadd.f32 %v1885_v48, %v1735_v61  ;;  %v922_v35 = vrot.slane %v4525_v36, 2  ;;  %v1099_v45 = vmul.f32 %v4353_v21, %v3266_v16 }
 0x126   : > { %v1390_v44 = vadd.f32 %v1320_v42, %v1146_v30  ;;  %v678_v56 = vsel %vm645_vm0, %v676_v34, %v677_v25  ;;  %v1173_v49 = vmul.f32 %v4353_v21, %v3269_v17  ;;  %v4541_v8 = vmul.f32 %v4361_v2, %v3269_v17 }
 0x127   : > { %v2223_v31 = vadd.f32 %v2129_v54, %v1979_v43  ;;  %v770_v48 = vadd.f32 %v678_v56, %v525_v58  ;;  %v923_v51 = vsel %vm890_vm1, %v921_v22, %v922_v35  ;;  %v1417_v14 = vmul.f32 %v4353_v21, %v3272_v18 }
 0x128   : > { %v1634_v10 = vadd.f32 %v1564_v57, %v1390_v44  ;;  %v1281_v59 = vrot.slane %v1173_v49, 1  ;;  %v1282_v15 = vrot.slane %v4541_v8, 1  ;;  %v4551_v9 = vmul.f32 %v4361_v2, %v3272_v18 }
 0x129   : > { %2949 = vmatmul.mubr.f32.gmra.mrb[10].mxu0 %v2223_v31  ;;  %v1015_v54 = vadd.f32 %v923_v51, %v770_v48  ;;  %v1525_v32 = vrot.slane %v1417_v14, 2  ;;  %v1704_v3 = vmul.f32 %v3274_v19, %v4553_v46  ;;  %v1778_v7 = vmul.f32 %v3327_v52, %v4553_v46 }
 0x12a   : > { %v1751_v33 = vadd.f32 %v1719_v26, %v1634_v10  ;;  %v1283_v29 = vsel %vm645_vm0, %v1281_v59, %v1282_v15  ;;  %v1526_v23 = vrot.slane %v4551_v9, 2  ;;  %v4567_v42 = vmul.f32 %v3327_v52, %v4555_v50 }
 0x12b   : > { %v1131_v24 = vadd.f32 %v1099_v45, %v1015_v54  ;;  %v1886_v28 = vrot.slane %v1778_v7, 1  ;;  %v2022_v57 = vmul.f32 %v3330_v53, %v4553_v46  ;;  %v4573_v1 = vmul.f32 %v3330_v53, %v4555_v50  ;;  %v481_v7 = vld [vmem:[#allocation2 + $0xa0] sm:$0x3] }
 0x12c   : > { %v1995_v26 = vadd.f32 %v1925_v62, %v1751_v33  ;;  %v1527_v58 = vsel %vm890_vm1, %v1525_v32, %v1526_v23  ;;  %v1887_v38 = vrot.slane %v4567_v42, 1  ;;  %v421_v55 = vmax.f32 %v389_v60, 0.0 }
 0x12d   : > { %v1375_v40 = vadd.f32 %v1283_v29, %v1131_v24  ;;  %v2130_v61 = vrot.slane %v2022_v57, 2  ;;  %v2131_v63 = vrot.slane %v4573_v1, 2  ;;  %v422_v41 = vmax.f32 %v390_v27, 0.0 }
 0x12e   : > { %v2239_v30 = vadd.f32 %v2169_v4, %v1995_v26  ;;  %v1888_v37 = vsel %vm645_vm0, %v1886_v28, %v1887_v38  ;;  %454 = vst [vmem:[#allocation2 + $0x181] sm:$0xff] %v421_v55  ;;  %v541_v62 = vmul.f32 %v4212_v47, %v3258_v11  ;;  %v591_v34 = vmul.f32 %v4212_v47, %v3261_v12 }
 0x12f   : > { %v1619_v43 = vadd.f32 %v1527_v58, %v1375_v40  ;;  %v2132_v22 = vsel %vm890_vm1, %v2130_v61, %v2131_v63  ;;  %455 = vst [vmem:[#allocation2 + $0x189] sm:$0xff] %v422_v41  ;;  %v4592_v4 = vmul.f32 %v4227_v6, %v3261_v12  ;;  %v836_v45 = vmul.f32 %v4212_v47, %v3264_v13 }
 0x130   : > { %2973 = vmatmul.mubr.f32.gmra.mrb[10].mxu1 %v2239_v30  ;;  %v716_v44 = vrot.slane %v591_v34, 1  ;;  %v4598_v56 = vmul.f32 %v4227_v6, %v3264_v13  ;;  %v1115_v49 = vmul.f32 %v4412_v0, %v3266_v16  ;;  %v1197_v31 = vmul.f32 %v4412_v0, %v3269_v17 }
 0x131   : > { %v1736_v48 = vadd.f32 %v1704_v3, %v1619_v43  ;;  %v717_v51 = vrot.slane %v4592_v4, 1  ;;  %v961_v14 = vrot.slane %v836_v45, 2  ;;  %v4607_v10 = vmul.f32 %v4427_v39, %v3269_v17 }
 0x132   : > { %v962_v47 = vrot.slane %v4598_v56, 2  ;;  %v1321_v59 = vrot.slane %v1197_v31, 1  ;;  %v1441_v54 = vmul.f32 %v4412_v0, %v3272_v18  ;;  %v4614_v32 = vmul.f32 %v4427_v39, %v3272_v18 }
 0x133   : > { %v1980_v60 = vadd.f32 %v1888_v37, %v1736_v48  ;;  %v718_v3 = vsel %vm645_vm0, %v716_v44, %v717_v51  ;;  %v1322_v33 = vrot.slane %v4607_v10, 1  ;;  %v526_v29 = vmul.f32 %v4161_v5, %v3258_v11  ;;  %v1055_v44 = vld [vmem:[#allocation2 + $0xb8] sm:$0x3] }
 0x134   : > { %v786_v27 = vadd.f32 %v718_v3, %v541_v62  ;;  %v963_v24 = vsel %vm890_vm1, %v961_v14, %v962_v47  ;;  %v1565_v28 = vrot.slane %v1441_v54, 2  ;;  %v1566_v57 = vrot.slane %v4614_v32, 2 }
 0x135   : > { %v2224_v26 = vadd.f32 %v2132_v22, %v1980_v60  ;;  %v1323_v58 = vsel %vm645_vm0, %v1321_v59, %v1322_v33  ;;  %v4629_v55 = vld [vmem:[#allocation2 + $0x180] sm:$0xff]  ;;  %v569_v40 = vmul.f32 %v3261_v12, %v481_v7  ;;  %v814_v61 = vmul.f32 %v3264_v13, %v481_v7 }
 0x136   : > { %v1031_v5 = vadd.f32 %v963_v24, %v786_v27  ;;  %v1567_v41 = vsel %vm890_vm1, %v1565_v28, %v1566_v57  ;;  %v4636_v30 = vld [vmem:[#allocation2 + $0x188] sm:$0xff]  ;;  %v1720_v37 = vmul.f32 %v3274_v19, %v4629_v55  ;;  %v1802_v62 = vmul.f32 %v3327_v52, %v4629_v55  ;;  %v1660_v27 = vld [vmem:[#allocation2 + $0xd0] sm:$0x3] }
 0x137   : > { %2951 = vmatprep.mubr.f32.mxu0 %v2224_v26  ;;  %v4644_v34 = vmul.f32 %v3327_v52, %v4636_v30  ;;  %v2046_v43 = vmul.f32 %v3330_v53, %v4629_v55  ;;  %v4650_v22 = vmul.f32 %v3330_v53, %v4636_v30  ;;  %v679_v45 = vrot.slane %v569_v40, 1  ;;  %v505_v40 = vld [vmem:[#allocation2 + $0x160] sm:$0x3] }
 0x138   : > { %v1147_v31 = vadd.f32 %v1115_v49, %v1031_v5  ;;  %v1926_v48 = vrot.slane %v1802_v62, 1  ;;  %v924_v14 = vrot.slane %v814_v61, 2  ;;  %v1100_v59 = vmul.f32 %v4361_v2, %v3266_v16 }
 0x139   : > { %v1927_v54 = vrot.slane %v4644_v34, 1  ;;  %v2170_v7 = vrot.slane %v2046_v43, 2  ;;  %v2171_v60 = vrot.slane %v4650_v22, 2  ;;  %v680_v3 = vsel %vm645_vm0, %v677_v25, %v679_v45  ;;  %v1661_v22 = vld [vmem:[#allocation2 + $0xd8] sm:$0xff] }
 0x13a   : > { %v1391_v24 = vadd.f32 %v1323_v58, %v1147_v31  ;;  %v771_v28 = vadd.f32 %v680_v3, %v526_v29  ;;  %v925_v49 = vsel %vm890_vm1, %v922_v35, %v924_v14  ;;  %v1175_v26 = vmul.f32 %v3269_v17, %v1055_v44 }
 0x13b   : > { %v1928_v61 = vsel %vm645_vm0, %v1926_v48, %v1927_v54  ;;  %v2172_v20 = vsel %vm890_vm1, %v2170_v7, %v2171_v60  ;;  %v1419_v25 = vmul.f32 %v3272_v18, %v1055_v44  ;;  %v1780_v36 = vmul.f32 %v3327_v52, %v1660_v27 }
 0x13c   : > { %v1635_v5 = vadd.f32 %v1567_v41, %v1391_v24  ;;  %v1016_v58 = vadd.f32 %v925_v49, %v771_v28  ;;  %v1284_v29 = vrot.slane %v1175_v26, 1  ;;  %v2024_v35 = vmul.f32 %v3330_v53, %v1660_v27  ;;  %v1079_v41 = vld [vmem:[#allocation2 + $0x178] sm:$0x3] }
 0x13d   : > { %v1528_v62 = vrot.slane %v1419_v25, 2  ;;  %v542_v43 = vmul.f32 %v4227_v6, %v3258_v11  ;;  %v593_v45 = vmul.f32 %v3261_v12, %v505_v40  ;;  %v1889_v44 = vrot.slane %v1780_v36, 1 }
 0x13e   : > { %v1752_v31 = vadd.f32 %v1720_v37, %v1635_v5  ;;  %v1132_v48 = vadd.f32 %v1100_v59, %v1016_v58  ;;  %v1285_v14 = vsel %vm645_vm0, %v1282_v15, %v1284_v29  ;;  %v2133_v3 = vrot.slane %v2024_v35, 2  ;;  %v1684_v15 = vld [vmem:[#allocation2 + $0x190] sm:$0x3] }
 0x13f   : > { %v1529_v7 = vsel %vm890_vm1, %v1526_v23, %v1528_v62  ;;  %v719_v24 = vrot.slane %v593_v45, 1  ;;  %v838_v27 = vmul.f32 %v3264_v13, %v505_v40  ;;  %v1705_v37 = vmul.f32 %v3274_v19, %v4555_v50 }
 0x140   : > { %v1996_v28 = vadd.f32 %v1928_v61, %v1752_v31  ;;  %v1376_v6 = vadd.f32 %v1285_v14, %v1132_v48  ;;  %v1890_v8 = vsel %vm645_vm0, %v1887_v38, %v1889_v44  ;;  %v1116_v23 = vmul.f32 %v4427_v39, %v3266_v16 }
 0x141   : > { %v720_v9 = vsel %vm645_vm0, %v717_v51, %v719_v24  ;;  %v964_v59 = vrot.slane %v838_v27, 2  ;;  %v1199_v49 = vmul.f32 %v3269_v17, %v1079_v41  ;;  %v1443_v25 = vmul.f32 %v3272_v18, %v1079_v41 }
 0x142   : > { %v2240_v26 = vadd.f32 %v2172_v20, %v1996_v28  ;;  %v1620_v40 = vadd.f32 %v1529_v7, %v1376_v6  ;;  %v787_v61 = vadd.f32 %v720_v9, %v542_v43  ;;  %v2134_v42 = vsel %vm890_vm1, %v2131_v63, %v2133_v3  ;;  %v4744_v6 = vld [vmem:[#allocation2 + $0xe0] sm:$0xff] }
 0x143   : > { %v965_v38 = vsel %vm890_vm1, %v962_v47, %v964_v59  ;;  %v1324_v4 = vrot.slane %v1199_v49, 1  ;;  %v1804_v51 = vmul.f32 %v3327_v52, %v1684_v15  ;;  %v1568_v29 = vrot.slane %v1443_v25, 2  ;;  %v4711_v45 = vpop.f32.mrb[0].mxu0 }
 0x144   : > { %2975 = vmatprep.mubr.f32.mxu1 %v2240_v26  ;;  %v1737_v5 = vadd.f32 %v1705_v37, %v1620_v40  ;;  %v1032_v58 = vadd.f32 %v965_v38, %v787_v61  ;;  %v2048_v20 = vmul.f32 %v3330_v53, %v1684_v15  ;;  %v1721_v1 = vmul.f32 %v3274_v19, %v4636_v30  ;;  %v4722_v14 = vpop.f32.mrb[1].mxu0 }
 0x145   : > { %v1325_v36 = vsel %vm645_vm0, %v1322_v33, %v1324_v4  ;;  %v1929_v63 = vrot.slane %v1804_v51, 1  ;;  %v570_v56 = vmul.f32 %v4353_v21, %v3261_v12  ;;  %v527_v43 = vmul.f32 %v4353_v21, %v3258_v11 }
 0x146   : > { %v1981_v47 = vadd.f32 %v1890_v8, %v1737_v5  ;;  %v1148_v62 = vadd.f32 %v1116_v23, %v1032_v58  ;;  %v2173_v35 = vrot.slane %v2048_v20, 2  ;;  %v1569_v10 = vsel %vm890_vm1, %v1566_v57, %v1568_v29 }
 0x147   : > { %v4718_v33 = vmul.f32 %v4361_v2, %v3261_v12  ;;  %v681_v31 = vrot.slane %v570_v56, 1  ;;  %v815_v48 = vmul.f32 %v4353_v21, %v3264_v13  ;;  %v1930_v7 = vsel %vm645_vm0, %v1927_v54, %v1929_v63 }
 0x148   : > { %v2225_v44 = vadd.f32 %v2134_v42, %v1981_v47  ;;  %v1392_v41 = vadd.f32 %v1325_v36, %v1148_v62  ;;  %v4729_v32 = vmul.f32 %v4361_v2, %v3264_v13  ;;  %v2174_v57 = vsel %vm890_vm1, %v2171_v60, %v2173_v35 }
 0x149   : > { %v682_v3 = vrot.slane %v4718_v33, 1  ;;  %v926_v24 = vrot.slane %v815_v48, 2  ;;  %v1176_v21 = vmul.f32 %v4553_v46, %v3269_v17  ;;  %v4740_v54 = vmul.f32 %v4555_v50, %v3269_v17  ;;  %v1082_v33 = vld [vmem:[#allocation2 + $0x190] sm:$0x3] }
 0x14a   : > { %2952 = vmatmul.mubr.f32.gmra.mrb[12].mxu0 %v2225_v44  ;;  %v1636_v27 = vadd.f32 %v1569_v10, %v1392_v41  ;;  %v927_v34 = vrot.slane %v4729_v32, 2  ;;  %v1420_v28 = vmul.f32 %v4553_v46, %v3272_v18  ;;  %v1101_v37 = vmul.f32 %v4553_v46, %v3266_v16 }
 0x14b   : > { %v683_v60 = vsel %vm645_vm0, %v681_v31, %v682_v3  ;;  %v1286_v8 = vrot.slane %v1176_v21, 1  ;;  %v4753_v15 = vmul.f32 %v4555_v50, %v3272_v18  ;;  %v1287_v49 = vrot.slane %v4740_v54, 1 }
 0x14c   : > { %v1753_v9 = vadd.f32 %v1721_v1, %v1636_v27  ;;  %v772_v59 = vadd.f32 %v683_v60, %v527_v43  ;;  %v928_v23 = vsel %vm890_vm1, %v926_v24, %v927_v34  ;;  %v1530_v26 = vrot.slane %v1420_v28, 2  ;;  %v4775_v20 = vpop.f32.mrb[0].mxu1  ;;  %v1685_v60 = vld [vmem:[#allocation2 + $0x198] sm:$0xff] }
 0x14d   : > { %v1531_v40 = vrot.slane %v4753_v15, 2  ;;  %v1781_v61 = vmul.f32 %v3327_v52, %v1661_v22  ;;  %v4763_v46 = vmul.f32 %v3327_v52, %v4744_v6  ;;  %v1706_v38 = vmul.f32 %v3274_v19, %v1661_v22  ;;  %v4780_v47 = vpop.f32.mrb[1].mxu1 }
 0x14e   : > { %v1997_v25 = vadd.f32 %v1930_v7, %v1753_v9  ;;  %v1017_v42 = vadd.f32 %v928_v23, %v772_v59  ;;  %v2025_v4 = vmul.f32 %v3330_v53, %v1661_v22  ;;  %v1288_v51 = vsel %vm645_vm0, %v1286_v8, %v1287_v49  ;;  %v4819_v23 = vld [vmem:[#allocation2 + $0x1a0] sm:$0xff] }
 0x14f   : > { %v1891_v5 = vrot.slane %v1781_v61, 1  ;;  %v1892_v58 = vrot.slane %v4763_v46, 1  ;;  %v4773_v29 = vmul.f32 %v3330_v53, %v4744_v6  ;;  %v1532_v63 = vsel %vm890_vm1, %v1530_v26, %v1531_v40 }
 0x150   : > { %v2241_v36 = vadd.f32 %v2174_v57, %v1997_v25  ;;  %v1133_v1 = vadd.f32 %v1101_v37, %v1017_v42  ;;  %v2135_v56 = vrot.slane %v2025_v4, 2  ;;  %v543_v35 = vmul.f32 %v4412_v0, %v3258_v11 }
 0x151   : > { %v1893_v62 = vsel %vm645_vm0, %v1891_v5, %v1892_v58  ;;  %v594_v43 = vmul.f32 %v4412_v0, %v3261_v12  ;;  %v4791_v10 = vmul.f32 %v4427_v39, %v3261_v12  ;;  %v2136_v48 = vrot.slane %v4773_v29, 2 }
 0x152   : > { %2976 = vmatmul.mubr.f32.gmra.mrb[12].mxu1 %v2241_v36  ;;  %v1377_v31 = vadd.f32 %v1288_v51, %v1133_v1  ;;  %v839_v44 = vmul.f32 %v4412_v0, %v3264_v13  ;;  %v4798_v41 = vmul.f32 %v4427_v39, %v3264_v13  ;;  %v1117_v24 = vmul.f32 %v4629_v55, %v3266_v16 }
 0x153   : > { %v721_v7 = vrot.slane %v594_v43, 1  ;;  %v722_v57 = vrot.slane %v4791_v10, 1  ;;  %v1200_v21 = vmul.f32 %v4629_v55, %v3269_v17  ;;  %v4808_v0 = vmul.f32 %v4636_v30, %v3269_v17 }
 0x154   : > { %v1621_v27 = vadd.f32 %v1532_v63, %v1377_v31  ;;  %v966_v28 = vrot.slane %v839_v44, 2  ;;  %v967_v22 = vrot.slane %v4798_v41, 2  ;;  %v1444_v9 = vmul.f32 %v4629_v55, %v3272_v18  ;;  %v484_v63 = vld [vmem:[#allocation2 + $0xb8] sm:$0x3]  ;;  %v1058_v44 = vld [vmem:[#allocation2 + $0xd0] sm:$0x3] }
 0x155   : > { %v723_v37 = vsel %vm645_vm0, %v721_v7, %v722_v57  ;;  %v1326_v8 = vrot.slane %v1200_v21, 1  ;;  %v4817_v59 = vmul.f32 %v4636_v30, %v3272_v18  ;;  %v1327_v42 = vrot.slane %v4808_v0, 1 }
 0x156   : > { %v1738_v26 = vadd.f32 %v1706_v38, %v1621_v27  ;;  %v788_v61 = vadd.f32 %v723_v37, %v543_v35  ;;  %v968_v25 = vsel %vm890_vm1, %v966_v28, %v967_v22  ;;  %v2137_v4 = vsel %vm890_vm1, %v2135_v56, %v2136_v48 }
 0x157   : > { %v1570_v51 = vrot.slane %v1444_v9, 2  ;;  %v1571_v55 = vrot.slane %v4817_v59, 2  ;;  %v1805_v5 = vmul.f32 %v3327_v52, %v1685_v60  ;;  %v4832_v38 = vmul.f32 %v3327_v52, %v4819_v23  ;;  %v1663_v9 = vld [vmem:[#allocation2 + $0xe8] sm:$0x3] }
 0x158   : > { %v1982_v36 = vadd.f32 %v1893_v62, %v1738_v26  ;;  %v1033_v1 = vadd.f32 %v968_v25, %v788_v61  ;;  %v1328_v35 = vsel %vm645_vm0, %v1326_v8, %v1327_v42  ;;  %v1722_v43 = vmul.f32 %v3274_v19, %v1685_v60 }
 0x159   : > { %v2049_v56 = vmul.f32 %v3330_v53, %v1685_v60  ;;  %v4841_v31 = vmul.f32 %v3330_v53, %v4819_v23  ;;  %v1931_v21 = vrot.slane %v1805_v5, 1  ;;  %v1932_v27 = vrot.slane %v4832_v38, 1 }
 0x15a   : > { %v2226_v62 = vadd.f32 %v2137_v4, %v1982_v36  ;;  %v1149_v7 = vadd.f32 %v1117_v24, %v1033_v1  ;;  %v1572_v28 = vsel %vm890_vm1, %v1570_v51, %v1571_v55  ;;  %v528_v37 = vmul.f32 %v4361_v2, %v3258_v11 }
 0x15b   : > { %v572_v8 = vmul.f32 %v3261_v12, %v484_v63  ;;  %v817_v60 = vmul.f32 %v3264_v13, %v484_v63  ;;  %v2175_v61 = vrot.slane %v2049_v56, 2  ;;  %v2176_v24 = vrot.slane %v4841_v31, 2  ;;  %v508_v63 = vld [vmem:[#allocation2 + $0x178] sm:$0x3] }
 0x15c   : > { %2954 = vmatprep.mubr.f32.mxu0 %v2226_v62  ;;  %v1393_v26 = vadd.f32 %v1328_v35, %v1149_v7  ;;  %v1178_v25 = vmul.f32 %v3269_v17, %v1058_v44  ;;  %v1422_v36 = vmul.f32 %v3272_v18, %v1058_v44  ;;  %v1933_v2 = vsel %vm645_vm0, %v1931_v21, %v1932_v27 }
 0x15d   : > { %v684_v4 = vrot.slane %v572_v8, 1  ;;  %v929_v5 = vrot.slane %v817_v60, 2  ;;  %v1783_v1 = vmul.f32 %v3327_v52, %v1663_v9  ;;  %v2027_v44 = vmul.f32 %v3330_v53, %v1663_v9 }
 0x15e   : > { %v1637_v51 = vadd.f32 %v1572_v28, %v1393_v26  ;;  %v1289_v62 = vrot.slane %v1178_v25, 1  ;;  %v2177_v21 = vsel %vm890_vm1, %v2175_v61, %v2176_v24  ;;  %v1102_v8 = vmul.f32 %v4555_v50, %v3266_v16 }
 0x15f   : > { %v685_v35 = vsel %vm645_vm0, %v682_v3, %v684_v4  ;;  %v930_v56 = vsel %vm890_vm1, %v927_v34, %v929_v5  ;;  %v1533_v60 = vrot.slane %v1422_v36, 2  ;;  %v1707_v32 = vmul.f32 %v3274_v19, %v4744_v6 }
 0x160   : > { %v1754_v7 = vadd.f32 %v1722_v43, %v1637_v51  ;;  %v773_v28 = vadd.f32 %v685_v35, %v528_v37  ;;  %v1894_v3 = vrot.slane %v1783_v1, 1  ;;  %v596_v34 = vmul.f32 %v3261_v12, %v508_v63 }
 0x161   : > { %v544_v37 = vmul.f32 %v4427_v39, %v3258_v11  ;;  %v841_v26 = vmul.f32 %v3264_v13, %v508_v63  ;;  %v1290_v50 = vsel %vm645_vm0, %v1287_v49, %v1289_v62  ;;  %v2138_v61 = vrot.slane %v2027_v44, 2  ;;  %v1687_v11 = vld [vmem:[#allocation2 + $0x1a8] sm:$0x3]  ;;  %v4889_v39 = vld [vmem:[%s2487_s17] ss:$0 sm:$0xff] }
 0x162   : > { %v1998_v43 = vadd.f32 %v1933_v2, %v1754_v7  ;;  %v1018_v9 = vadd.f32 %v930_v56, %v773_v28  ;;  %v724_v6 = vrot.slane %v596_v34, 1  ;;  %v1202_v25 = vmul.f32 %v3269_v17, %v1082_v33 }
 0x163   : > { %v969_v5 = vrot.slane %v841_v26, 2  ;;  %v1446_v36 = vmul.f32 %v3272_v18, %v1082_v33  ;;  %v1534_v13 = vsel %vm890_vm1, %v1531_v40, %v1533_v60  ;;  %v1895_v17 = vsel %vm645_vm0, %v1892_v58, %v1894_v3  ;;  %v4905_v40 = vld [vmem:[%s2527_s26] ss:$0 sm:$0xff] }
 0x164   : > { %v2242_v12 = vadd.f32 %v2177_v21, %v1998_v43  ;;  %v1134_v4 = vadd.f32 %v1102_v8, %v1018_v9  ;;  %v725_v54 = vsel %vm645_vm0, %v722_v57, %v724_v6  ;;  %v1329_v49 = vrot.slane %v1202_v25, 1 }
 0x165   : > { %v789_v2 = vadd.f32 %v725_v54, %v544_v37  ;;  %v970_v18 = vsel %vm890_vm1, %v967_v22, %v969_v5  ;;  %v1118_v15 = vmul.f32 %v4636_v30, %v3266_v16  ;;  %v2139_v46 = vsel %vm890_vm1, %v2136_v48, %v2138_v61 }
 0x166   : > { %2978 = vmatprep.mubr.f32.mxu1 %v2242_v12  ;;  %v1378_v51 = vadd.f32 %v1290_v50, %v1134_v4  ;;  %v1573_v58 = vrot.slane %v1446_v36, 2  ;;  %v1807_v10 = vmul.f32 %v3327_v52, %v1687_v11  ;;  %v2496_v57 = vmul.f32 %v4711_v45, %v4889_v39 }
 0x167   : > { %v1034_v63 = vadd.f32 %v970_v18, %v789_v2  ;;  %v1723_v41 = vmul.f32 %v3274_v19, %v4819_v23  ;;  %v2512_v16 = vmul.f32 %v4775_v20, %v4889_v39  ;;  %v1330_v30 = vsel %vm645_vm0, %v1327_v42, %v1329_v49 }
 0x168   : > { %v1622_v1 = vadd.f32 %v1534_v13, %v1378_v51  ;;  %v2051_v29 = vmul.f32 %v3330_v53, %v1687_v11  ;;  %v2536_v48 = vadd.f32 %v4905_v40, %v2496_v57  ;;  %v2495_v52 = vmul.f32 %v4889_v39, %v4722_v14  ;;  %v2938_v23 = vpop.f32.mrb[2].mxu0 }
 0x169   : > { %v1150_v22 = vadd.f32 %v1118_v15, %v1034_v63  ;;  %v2552_v35 = vadd.f32 %v4905_v40, %v2512_v16  ;;  %v2511_v19 = vmul.f32 %v4889_v39, %v4780_v47  ;;  %v1574_v20 = vsel %vm890_vm1, %v1571_v55, %v1573_v58  ;;  %v2338_v56 = vpop.f32.mrb[3].mxu0 }
 0x16a   : > { %v1739_v45 = vadd.f32 %v1707_v32, %v1622_v1  ;;  %v1934_v0 = vrot.slane %v1807_v10, 1  ;;  %2568 = vst [vmem:[#allocation3 + $0x8] sm:$0xff] %v2536_v48  ;;  %v2535_v53 = vadd.f32 %v4905_v40, %v2495_v52  ;;  %v2498_v42 = vmul.f32 %v2938_v23, %v4889_v39 }
 0x16b   : > { %v1394_v62 = vadd.f32 %v1330_v30, %v1150_v22  ;;  %2584 = vst [vmem:[#allocation3 + $0x88] sm:$0xff] %v2552_v35  ;;  %v2551_v44 = vadd.f32 %v4905_v40, %v2511_v19  ;;  %v2497_v7 = vmul.f32 %v4889_v39, %v2338_v56  ;;  %v2178_v47 = vrot.slane %v2051_v29, 2 }
 0x16c   : > { %v1983_v14 = vadd.f32 %v1895_v17, %v1739_v45  ;;  %2567 = vst [vmem:[#allocation3] sm:$0xff] %v2535_v53  ;;  %v2538_v59 = vadd.f32 %v4905_v40, %v2498_v42  ;;  %v1935_v8 = vsel %vm645_vm0, %v1932_v27, %v1934_v0 }
 0x16d   : > { %v1638_v55 = vadd.f32 %v1574_v20, %v1394_v62  ;;  %2583 = vst [vmem:[#allocation3 + $0x80] sm:$0xff] %v2551_v44  ;;  %v2537_v28 = vadd.f32 %v4905_v40, %v2497_v7  ;;  %v2179_v60 = vsel %vm890_vm1, %v2176_v24, %v2178_v47 }
 0x16e   : > { %v2227_v21 = vadd.f32 %v2139_v46, %v1983_v14  ;;  %2570 = vst [vmem:[#allocation3 + $0x18] sm:$0xff] %v2538_v59 }
 0x16f   : > { %v1755_v33 = vadd.f32 %v1723_v41, %v1638_v55  ;;  %2569 = vst [vmem:[#allocation3 + $0x10] sm:$0xff] %v2537_v28 }
 0x170   : > { %2955 = vmatmul.mubr.f32.gmra.mrb[14].mxu0 %v2227_v21  ;;  %v2962_v3 = vpop.f32.mrb[2].mxu1 }
 0x171   : > { %v1999_v32 = vadd.f32 %v1935_v8, %v1755_v33  ;;  %v2514_v34 = vmul.f32 %v2962_v3, %v4889_v39  ;;  %v2418_v43 = vpop.f32.mrb[3].mxu1 }
 0x172   : > { %v2513_v37 = vmul.f32 %v4889_v39, %v2418_v43 }
 0x173   : > { %v2243_v9 = vadd.f32 %v2179_v60, %v1999_v32  ;;  %v2554_v38 = vadd.f32 %v4905_v40, %v2514_v34 }
 0x174   : > { %v2553_v27 = vadd.f32 %v4905_v40, %v2513_v37 }
 0x175   : > { %2979 = vmatmul.mubr.f32.gmra.mrb[14].mxu1 %v2243_v9  ;;  %2586 = vst [vmem:[#allocation3 + $0x98] sm:$0xff] %v2554_v38 }
 0x176   : > { %2585 = vst [vmem:[#allocation3 + $0x90] sm:$0xff] %v2553_v27 }
 0x18e   : > { %v2941_v26 = vpop.f32.mrb[4].mxu0 }
 0x18f   : > { %v2500_v31 = vmul.f32 %v2941_v26, %v4889_v39  ;;  %v2348_v50 = vpop.f32.mrb[5].mxu0 }
 0x190   : > { %v2499_v24 = vmul.f32 %v4889_v39, %v2348_v50 }
 0x191   : > { %v2540_v61 = vadd.f32 %v4905_v40, %v2500_v31 }
 0x192   : > { %v2539_v6 = vadd.f32 %v4905_v40, %v2499_v24 }
 0x193   : > { %2572 = vst [vmem:[#allocation3 + $0x28] sm:$0xff] %v2540_v61 }
 0x194   : > { %2571 = vst [vmem:[#allocation3 + $0x20] sm:$0xff] %v2539_v6 }
 0x195   : > { %v2965_v25 = vpop.f32.mrb[4].mxu1 }
 0x196   : > { %v2516_v12 = vmul.f32 %v2965_v25, %v4889_v39  ;;  %v2428_v4 = vpop.f32.mrb[5].mxu1 }
 0x197   : > { %v2515_v5 = vmul.f32 %v4889_v39, %v2428_v4 }
 0x198   : > { %v2556_v36 = vadd.f32 %v4905_v40, %v2516_v12 }
 0x199   : > { %v2555_v11 = vadd.f32 %v4905_v40, %v2515_v5 }
 0x19a   : > { %2588 = vst [vmem:[#allocation3 + $0xa8] sm:$0xff] %v2556_v36  ;;  %v2603_v36 = vld [vmem:[%s3176_s28] sm:$0xff] (!%p2848_p7) }
 0x19b   : > { %2587 = vst [vmem:[#allocation3 + $0xa0] sm:$0xff] %v2555_v11  ;;  %v2667_v11 = vld [vmem:[#allocation3] sm:$0xff] (!%p2848_p7) }
 0x1b2   : > { %v2944_v13 = vpop.f32.mrb[6].mxu0 }
 0x1b3   : > { %v2502_v17 = vmul.f32 %v2944_v13, %v4889_v39  ;;  %v2358_v54 = vpop.f32.mrb[7].mxu0  ;;  %v2604_v13 = vld [vmem:[%s3176_s28 + $0x8] sm:$0xff] (!%p2848_p7) }
 0x1b4   : > { %v2501_v49 = vmul.f32 %v4889_v39, %v2358_v54  ;;  %v2668_v54 = vld [vmem:[#allocation3 + $0x8] sm:$0xff] (!%p2848_p7) }
 0x1b5   : > { %v2542_v51 = vadd.f32 %v4905_v40, %v2502_v17  ;;  %v2635_v17 = vmax.f32 (!%p2848_p7), %v2603_v36, 0.0  ;;  %v2683_v36 = vld [vmem:[#allocation3 + $0x80] sm:$0xff] (!%p2848_p7) }
 0x1b6   : > { %v2541_v2 = vadd.f32 %v4905_v40, %v2501_v49  ;;  %v2605_v49 = vld [vmem:[%s3176_s28 + $0x10] sm:$0xff] (!%p2848_p7) }
 0x1b7   : > { %2574 = vst [vmem:[#allocation3 + $0x38] sm:$0xff] %v2542_v51  ;;  %v2637_v51 = vmax.f32 (!%p2848_p7), %v2605_v49, 0.0  ;;  %v2685_v49 = vld [vmem:[#allocation3 + $0x90] sm:$0xff] (!%p2848_p7) }
 0x1b8   : > { %2573 = vst [vmem:[#allocation3 + $0x30] sm:$0xff] %v2541_v2  ;;  %v2606_v2 = vld [vmem:[%s3176_s28 + $0x18] sm:$0xff] (!%p2848_p7) }
 0x1b9   : > { %v2968_v18 = vpop.f32.mrb[6].mxu1 }
 0x1ba   : > { %v2518_v15 = vmul.f32 %v2968_v18, %v4889_v39  ;;  %v2438_v46 = vpop.f32.mrb[7].mxu1  ;;  %v2670_v18 = vld [vmem:[#allocation3 + $0x18] sm:$0xff] (!%p2848_p7) }
 0x1bb   : > { %v2517_v58 = vmul.f32 %v4889_v39, %v2438_v46  ;;  %v2699_v46 = vadd.f32 (!%p2848_p7), %v2667_v11, %v2635_v17  ;;  %v2620_v11 = vld [vmem:[%s3176_s28 + $0x88] sm:$0xff] (!%p2848_p7) }
 0x1bc   : > { %v2558_v10 = vadd.f32 %v4905_v40, %v2518_v15  ;;  %v2607_v15 = vld [vmem:[%s3176_s28 + $0x20] sm:$0xff] (!%p2848_p7) }
 0x1bd   : > { %v2557_v57 = vadd.f32 %v4905_v40, %v2517_v58  ;;  %2731 = vst [vmem:[%s3181_s6] sm:$0xff] (!%p2848_p7), %v2699_v46  ;;  %v2686_v46 = vld [vmem:[#allocation3 + $0x98] sm:$0xff] (!%p2848_p7) }
 0x1be   : > { %2590 = vst [vmem:[#allocation3 + $0xb8] sm:$0xff] %v2558_v10  ;;  %v2638_v10 = vmax.f32 (!%p2848_p7), %v2606_v2, 0.0 }
 0x1bf   : > { %2589 = vst [vmem:[#allocation3 + $0xb0] sm:$0xff] %v2557_v57  ;;  %v2639_v57 = vmax.f32 (!%p2848_p7), %v2607_v15, 0.0 }
 0x1d7   : > { %v2947_v1 = vpop.f32.mrb[8].mxu0 }
 0x1d8   : > { %v2504_v63 = vmul.f32 %v2947_v1, %v4889_v39  ;;  %v2368_v41 = vpop.f32.mrb[9].mxu0  ;;  %v2671_v1 = vld [vmem:[#allocation3 + $0x20] sm:$0xff] (!%p2848_p7) }
 0x1d9   : > { %v2503_v16 = vmul.f32 %v4889_v39, %v2368_v41  ;;  %v2672_v41 = vld [vmem:[#allocation3 + $0x28] sm:$0xff] (!%p2848_p7) }
 0x1da   : > { %v2544_v30 = vadd.f32 %v4905_v40, %v2504_v63  ;;  %v2608_v63 = vld [vmem:[%s3176_s28 + $0x28] sm:$0xff] (!%p2848_p7) }
 0x1db   : > { %v2543_v29 = vadd.f32 %v4905_v40, %v2503_v16 }
 0x1dc   : > { %2576 = vst [vmem:[#allocation3 + $0x48] sm:$0xff] %v2544_v30  ;;  %v2640_v30 = vmax.f32 (!%p2848_p7), %v2608_v63, 0.0  ;;  %v2624_v63 = vld [vmem:[%s3176_s28 + $0xa8] sm:$0xff] (!%p2848_p7) }
 0x1dd   : > { %2575 = vst [vmem:[#allocation3 + $0x40] sm:$0xff] %v2543_v29  ;;  %v2609_v29 = vld [vmem:[%s3176_s28 + $0x30] sm:$0xff] (!%p2848_p7) }
 0x1de   : > { %v2971_v48 = vpop.f32.mrb[8].mxu1 }
 0x1df   : > { %v2520_v52 = vmul.f32 %v2971_v48, %v4889_v39  ;;  %v2448_v45 = vpop.f32.mrb[9].mxu1  ;;  %v2673_v48 = vld [vmem:[#allocation3 + $0x30] sm:$0xff] (!%p2848_p7) }
 0x1e0   : > { %v2519_v22 = vmul.f32 %v4889_v39, %v2448_v45  ;;  %v2702_v45 = vadd.f32 (!%p2848_p7), %v2670_v18, %v2638_v10  ;;  %v2687_v10 = vld [vmem:[#allocation3 + $0xa0] sm:$0xff] (!%p2848_p7) }
 0x1e1   : > { %v2560_v35 = vadd.f32 %v4905_v40, %v2520_v52  ;;  %v2610_v52 = vld [vmem:[%s3176_s28 + $0x38] sm:$0xff] (!%p2848_p7) }
 0x1e2   : > { %v2559_v19 = vadd.f32 %v4905_v40, %v2519_v22  ;;  %v2703_v22 = vadd.f32 (!%p2848_p7), %v2671_v1, %v2639_v57  ;;  %2734 = vst [vmem:[%s3181_s6 + $0x18] sm:$0xff] (!%p2848_p7), %v2702_v45  ;;  %v2689_v45 = vld [vmem:[#allocation3 + $0xb0] sm:$0xff] (!%p2848_p7) }
 0x1e3   : > { %2592 = vst [vmem:[#allocation3 + $0xc8] sm:$0xff] %v2560_v35  ;;  %v2641_v35 = vmax.f32 (!%p2848_p7), %v2609_v29, 0.0 }
 0x1e4   : > { %2591 = vst [vmem:[#allocation3 + $0xc0] sm:$0xff] %v2559_v19  ;;  %v2642_v19 = vmax.f32 (!%p2848_p7), %v2610_v52, 0.0  ;;  %2735 = vst [vmem:[%s3181_s6 + $0x20] sm:$0xff] (!%p2848_p7), %v2703_v22  ;;  %v2626_v22 = vld [vmem:[%s3176_s28 + $0xb8] sm:$0xff] (!%p2848_p7) }
 0x1fc   : > { %v2950_v23 = vpop.f32.mrb[10].mxu0 }
 0x1fd   : > { %v2506_v20 = vmul.f32 %v2950_v23, %v4889_v39  ;;  %v2378_v0 = vpop.f32.mrb[11].mxu0  ;;  %v2674_v23 = vld [vmem:[#allocation3 + $0x38] sm:$0xff] (!%p2848_p7) }
 0x1fe   : > { %v2505_v53 = vmul.f32 %v4889_v39, %v2378_v0  ;;  %v2675_v0 = vld [vmem:[#allocation3 + $0x40] sm:$0xff] (!%p2848_p7) }
 0x1ff   : > { %v2546_v42 = vadd.f32 %v4905_v40, %v2506_v20  ;;  %v2611_v20 = vld [vmem:[%s3176_s28 + $0x40] sm:$0xff] (!%p2848_p7) }
 0x200   : > { %v2545_v56 = vadd.f32 %v4905_v40, %v2505_v53  ;;  %v2704_v53 = vadd.f32 (!%p2848_p7), %v2672_v41, %v2640_v30  ;;  %v2688_v41 = vld [vmem:[#allocation3 + $0xa8] sm:$0xff] (!%p2848_p7) }
 0x201   : > { %2578 = vst [vmem:[#allocation3 + $0x58] sm:$0xff] %v2546_v42  ;;  %v2643_v42 = vmax.f32 (!%p2848_p7), %v2611_v20, 0.0  ;;  %v2627_v20 = vld [vmem:[%s3176_s28 + $0xc0] sm:$0xff] (!%p2848_p7) }
 0x202   : > { %2577 = vst [vmem:[#allocation3 + $0x50] sm:$0xff] %v2545_v56  ;;  %v2612_v56 = vld [vmem:[%s3176_s28 + $0x48] sm:$0xff] (!%p2848_p7)  ;;  %2736 = vst [vmem:[%s3181_s6 + $0x28] sm:$0xff] (!%p2848_p7), %v2704_v53 }
 0x203   : > { %v2974_v14 = vpop.f32.mrb[10].mxu1  ;;  %v2628_v53 = vld [vmem:[%s3176_s28 + $0xc8] sm:$0xff] (!%p2848_p7) }
 0x204   : > { %v2522_v62 = vmul.f32 %v2974_v14, %v4889_v39  ;;  %v2458_v44 = vpop.f32.mrb[11].mxu1  ;;  %v2676_v14 = vld [vmem:[#allocation3 + $0x48] sm:$0xff] (!%p2848_p7) }
 0x205   : > { %v2521_v7 = vmul.f32 %v4889_v39, %v2458_v44  ;;  %v2705_v44 = vadd.f32 (!%p2848_p7), %v2673_v48, %v2641_v35  ;;  %v2656_v48 = vmax.f32 (!%p2848_p7), %v2624_v63, 0.0  ;;  %v2690_v35 = vld [vmem:[#allocation3 + $0xb8] sm:$0xff] (!%p2848_p7) }
 0x206   : > { %v2562_v47 = vadd.f32 %v4905_v40, %v2522_v62  ;;  %v2613_v62 = vld [vmem:[%s3176_s28 + $0x50] sm:$0xff] (!%p2848_p7) }
 0x207   : > { %v2561_v59 = vadd.f32 %v4905_v40, %v2521_v7  ;;  %v2706_v7 = vadd.f32 (!%p2848_p7), %v2674_v23, %v2642_v19  ;;  %2737 = vst [vmem:[%s3181_s6 + $0x30] sm:$0xff] (!%p2848_p7), %v2705_v44  ;;  %v2658_v23 = vmax.f32 (!%p2848_p7), %v2626_v22, 0.0  ;;  %v2692_v44 = vld [vmem:[#allocation3 + $0xc8] sm:$0xff] (!%p2848_p7) }
 0x208   : > { %2594 = vst [vmem:[#allocation3 + $0xd8] sm:$0xff] %v2562_v47  ;;  %v2644_v47 = vmax.f32 (!%p2848_p7), %v2612_v56, 0.0 }
 0x209   : > { %2593 = vst [vmem:[#allocation3 + $0xd0] sm:$0xff] %v2561_v59  ;;  %v2645_v59 = vmax.f32 (!%p2848_p7), %v2613_v62, 0.0  ;;  %2738 = vst [vmem:[%s3181_s6 + $0x38] sm:$0xff] (!%p2848_p7), %v2706_v7  ;;  %v2660_v62 = vmax.f32 (!%p2848_p7), %v2628_v53, 0.0  ;;  %v2629_v7 = vld [vmem:[%s3176_s28 + $0xd0] sm:$0xff] (!%p2848_p7) }
 0x21d   : > { %v2953_v21 = vpop.f32.mrb[12].mxu0 }
 0x21e   : > { %v2508_v55 = vmul.f32 %v2953_v21, %v4889_v39  ;;  %v2388_v28 = vpop.f32.mrb[13].mxu0  ;;  %v2677_v21 = vld [vmem:[#allocation3 + $0x50] sm:$0xff] (!%p2848_p7) }
 0x21f   : > { %v2507_v8 = vmul.f32 %v4889_v39, %v2388_v28  ;;  %v2678_v28 = vld [vmem:[#allocation3 + $0x58] sm:$0xff] (!%p2848_p7) }
 0x220   : > { %v2548_v33 = vadd.f32 %v4905_v40, %v2508_v55  ;;  %v2614_v55 = vld [vmem:[%s3176_s28 + $0x58] sm:$0xff] (!%p2848_p7) }
 0x221   : > { %v2547_v60 = vadd.f32 %v4905_v40, %v2507_v8  ;;  %v2707_v8 = vadd.f32 (!%p2848_p7), %v2675_v0, %v2643_v42  ;;  %v2691_v0 = vld [vmem:[#allocation3 + $0xc0] sm:$0xff] (!%p2848_p7)  ;;  %v2720_v42 = vadd.f32 (!%p2848_p7), %v2688_v41, %v2656_v48 }
 0x222   : > { %2580 = vst [vmem:[#allocation3 + $0x68] sm:$0xff] %v2548_v33  ;;  %v2646_v33 = vmax.f32 (!%p2848_p7), %v2614_v55, 0.0  ;;  %v2630_v55 = vld [vmem:[%s3176_s28 + $0xd8] sm:$0xff] (!%p2848_p7) }
 0x223   : > { %2579 = vst [vmem:[#allocation3 + $0x60] sm:$0xff] %v2547_v60  ;;  %v2615_v60 = vld [vmem:[%s3176_s28 + $0x60] sm:$0xff] (!%p2848_p7)  ;;  %2739 = vst [vmem:[%s3181_s6 + $0x40] sm:$0xff] (!%p2848_p7), %v2707_v8 }
 0x224   : > { %v2631_v8 = vld [vmem:[%s3176_s28 + $0xe0] sm:$0xff] (!%p2848_p7)  ;;  %2752 = vst [vmem:[%s3181_s6 + $0xa8] sm:$0xff] (!%p2848_p7), %v2720_v42 }
 0x225   : > { %v2977_v32 = vpop.f32.mrb[12].mxu1 }
 0x226   : > { %v2524_v3 = vmul.f32 %v2977_v32, %v4889_v39  ;;  %v2468_v34 = vpop.f32.mrb[13].mxu1 }
 0x227   : > { %v2523_v43 = vmul.f32 %v4889_v39, %v2468_v34  ;;  %v2708_v34 = vadd.f32 (!%p2848_p7), %v2676_v14, %v2644_v47  ;;  %v2659_v14 = vmax.f32 (!%p2848_p7), %v2627_v20, 0.0  ;;  %v2693_v47 = vld [vmem:[#allocation3 + $0xd0] sm:$0xff] (!%p2848_p7) }
 0x228   : > { %v2564_v9 = vadd.f32 %v4905_v40, %v2524_v3  ;;  %v2616_v3 = vld [vmem:[%s3176_s28 + $0x68] sm:$0xff] (!%p2848_p7) }
 0x229   : > { %v2563_v37 = vadd.f32 %v4905_v40, %v2523_v43  ;;  %v2709_v43 = vadd.f32 (!%p2848_p7), %v2677_v21, %v2645_v59  ;;  %2740 = vst [vmem:[%s3181_s6 + $0x48] sm:$0xff] (!%p2848_p7), %v2708_v34  ;;  %v2722_v59 = vadd.f32 (!%p2848_p7), %v2690_v35, %v2658_v23  ;;  %v2661_v21 = vmax.f32 (!%p2848_p7), %v2629_v7, 0.0 }
 0x22a   : > { %2596 = vst [vmem:[#allocation3 + $0xe8] sm:$0xff] %v2564_v9  ;;  %v2679_v32 = vld [vmem:[#allocation3 + $0x60] sm:$0xff] (!%p2848_p7)  ;;  %v2647_v9 = vmax.f32 (!%p2848_p7), %v2615_v60, 0.0  ;;  %v2724_v60 = vadd.f32 (!%p2848_p7), %v2692_v44, %v2660_v62 }
 0x22b   : > { %2595 = vst [vmem:[#allocation3 + $0xe0] sm:$0xff] %v2563_v37  ;;  %v2648_v37 = vmax.f32 (!%p2848_p7), %v2616_v3, 0.0  ;;  %2741 = vst [vmem:[%s3181_s6 + $0x50] sm:$0xff] (!%p2848_p7), %v2709_v43  ;;  %v2663_v3 = vmax.f32 (!%p2848_p7), %v2631_v8, 0.0  ;;  %v2632_v43 = vld [vmem:[%s3176_s28 + $0xe8] sm:$0xff] (!%p2848_p7) }
 0x22c   : > { %2754 = vst [vmem:[%s3181_s6 + $0xb8] sm:$0xff] (!%p2848_p7), %v2722_v59  ;;  %2756 = vst [vmem:[%s3181_s6 + $0xc8] sm:$0xff] (!%p2848_p7), %v2724_v60 }
 0x232   : > { %v2695_v34 = vld [vmem:[#allocation3 + $0xe0] sm:$0xff] (!%p2848_p7) }
 0x243   : > { %v2956_v38 = vpop.f32.mrb[14].mxu0 }
 0x244   : > { %v2510_v27 = vmul.f32 %v2956_v38, %v4889_v39  ;;  %v2398_v26 = vpop.f32.mrb[15].mxu0  ;;  %v2680_v38 = vld [vmem:[#allocation3 + $0x68] sm:$0xff] (!%p2848_p7) }
 0x245   : > { %v2509_v31 = vmul.f32 %v4889_v39, %v2398_v26 }
 0x246   : > { %v2550_v50 = vadd.f32 %v4905_v40, %v2510_v27  ;;  %v2617_v27 = vld [vmem:[%s3176_s28 + $0x70] sm:$0xff] (!%p2848_p7) }
 0x247   : > { %v2549_v24 = vadd.f32 %v4905_v40, %v2509_v31  ;;  %v2710_v31 = vadd.f32 (!%p2848_p7), %v2678_v28, %v2646_v33  ;;  %v2694_v28 = vld [vmem:[#allocation3 + $0xd8] sm:$0xff] (!%p2848_p7)  ;;  %v2723_v33 = vadd.f32 (!%p2848_p7), %v2691_v0, %v2659_v14 }
 0x248   : > { %2582 = vst [vmem:[#allocation3 + $0x78] sm:$0xff] %v2550_v50  ;;  %v2980_v61 = vpop.f32.mrb[14].mxu1  ;;  %2602 = sbr.rel (%p2848_p7) target bundleno = 601 (0x259), region = 48  ;;  %v2649_v50 = vmax.f32 (!%p2848_p7), %v2617_v27, 0.0  ;;  %v2633_v27 = vld [vmem:[%s3176_s28 + $0xf0] sm:$0xff] (!%p2848_p7) }
 0x249   : > { %2581 = vst [vmem:[#allocation3 + $0x70] sm:$0xff] %v2549_v24  ;;  %v2526_v6 = vmul.f32 %v2980_v61, %v4889_v39  ;;  %v2478_v25 = vpop.f32.mrb[15].mxu1  ;;  %v2618_v24 = vld [vmem:[%s3176_s28 + $0x78] sm:$0xff] (!%p2848_p7)  ;;  %2742 = vst [vmem:[%s3181_s6 + $0x58] sm:$0xff] (!%p2848_p7), %v2710_v31 }
 0x24a   : > { %v2525_v12 = vmul.f32 %v4889_v39, %v2478_v25  ;;  %v2636_v39 = vmax.f32 (!%p2848_p7), %v2604_v13, 0.0  ;;  %v2711_v25 = vadd.f32 (!%p2848_p7), %v2679_v32, %v2647_v9  ;;  %v2684_v13 = vld [vmem:[#allocation3 + $0x88] sm:$0xff] (!%p2848_p7)  ;;  %v2662_v32 = vmax.f32 (!%p2848_p7), %v2630_v55, 0.0  ;;  %2755 = vst [vmem:[%s3181_s6 + $0xc0] sm:$0xff] (!%p2848_p7), %v2723_v33 }
 0x24b   : > { %v2566_v4 = vadd.f32 %v4905_v40, %v2526_v6  ;;  %v2619_v6 = vld [vmem:[%s3176_s28 + $0x80] sm:$0xff] (!%p2848_p7)  ;;  %v2696_v9 = vld [vmem:[#allocation3 + $0xe8] sm:$0xff] (!%p2848_p7) }
 0x24c   : > { %v2565_v5 = vadd.f32 %v4905_v40, %v2525_v12  ;;  %v2669_v40 = vld [vmem:[#allocation3 + $0x10] sm:$0xff] (!%p2848_p7)  ;;  %v2700_v58 = vadd.f32 (!%p2848_p7), %v2668_v54, %v2636_v39  ;;  %v2712_v12 = vadd.f32 (!%p2848_p7), %v2680_v38, %v2648_v37  ;;  %v2652_v39 = vmax.f32 (!%p2848_p7), %v2620_v11, 0.0  ;;  %v2621_v54 = vld [vmem:[%s3176_s28 + $0x90] sm:$0xff] (!%p2848_p7)  ;;  %2743 = vst [vmem:[%s3181_s6 + $0x60] sm:$0xff] (!%p2848_p7), %v2711_v25  ;;  %v2634_v31 = vld [vmem:[%s3176_s28 + $0xf8] sm:$0xff] (!%p2848_p7) }
 0x24d   : > { %2598 = vst [vmem:[#allocation3 + $0xf8] sm:$0xff] %v2566_v4  ;;  %v2701_v16 = vadd.f32 (!%p2848_p7), %v2669_v40, %v2637_v51  ;;  %v2650_v4 = vmax.f32 (!%p2848_p7), %v2618_v24, 0.0  ;;  %v2622_v40 = vld [vmem:[%s3176_s28 + $0x98] sm:$0xff] (!%p2848_p7)  ;;  %v2653_v18 = vmax.f32 (!%p2848_p7), %v2621_v54, 0.0  ;;  %v2725_v37 = vadd.f32 (!%p2848_p7), %v2693_v47, %v2661_v21 }
 0x24e   : > { %2597 = vst [vmem:[#allocation3 + $0xf0] sm:$0xff] %v2565_v5  ;;  %2732 = vst [vmem:[%s3181_s6 + $0x8] sm:$0xff] (!%p2848_p7), %v2700_v58  ;;  %v2651_v5 = vmax.f32 (!%p2848_p7), %v2619_v6, 0.0  ;;  %v2654_v15 = vmax.f32 (!%p2848_p7), %v2622_v40, 0.0  ;;  %v2623_v58 = vld [vmem:[%s3176_s28 + $0xa0] sm:$0xff] (!%p2848_p7)  ;;  %v2716_v57 = vadd.f32 (!%p2848_p7), %v2684_v13, %v2652_v39  ;;  %v2664_v38 = vmax.f32 (!%p2848_p7), %v2632_v43, 0.0 }
 0x24f   : > { %2733 = vst [vmem:[%s3181_s6 + $0x10] sm:$0xff] %v2701_v16  ;;  %v2682_v61 = vld [vmem:[#allocation3 + $0x78] sm:$0xff]  ;;  %2744 = vst [vmem:[%s3181_s6 + $0x68] sm:$0xff] %v2712_v12  ;;  %v2655_v1 = vmax.f32 %v2623_v58, 0.0  ;;  %v2625_v16 = vld [vmem:[%s3176_s28 + $0xb0] sm:$0xff]  ;;  %v2717_v30 = vadd.f32 %v2685_v49, %v2653_v18  ;;  %v2727_v24 = vadd.f32 %v2695_v34, %v2663_v3  ;;  %v2666_v6 = vmax.f32 %v2634_v31, 0.0 }
 0x250   : > { %v2681_v26 = vld [vmem:[#allocation3 + $0x70] sm:$0xff]  ;;  %v2714_v51 = vadd.f32 %v2682_v61, %v2650_v4  ;;  %v2715_v2 = vadd.f32 %v2683_v36, %v2651_v5  ;;  %v2718_v29 = vadd.f32 %v2686_v46, %v2654_v15  ;;  %v2657_v52 = vmax.f32 %v2625_v16, 0.0  ;;  %2748 = vst [vmem:[%s3181_s6 + $0x88] sm:$0xff] %v2716_v57  ;;  %2757 = vst [vmem:[%s3181_s6 + $0xd0] sm:$0xff] %v2725_v37 }
 0x251   : > { %v2713_v17 = vadd.f32 %v2681_v26, %v2649_v50  ;;  %v2719_v19 = vadd.f32 %v2687_v10, %v2655_v1  ;;  %2749 = vst [vmem:[%s3181_s6 + $0x90] sm:$0xff] %v2717_v30  ;;  %v2726_v50 = vadd.f32 %v2694_v28, %v2662_v32  ;;  %v2665_v61 = vmax.f32 %v2633_v27, 0.0  ;;  %2759 = vst [vmem:[%s3181_s6 + $0xe0] sm:$0xff] %v2727_v24 }
 0x252   : > { %2746 = vst [vmem:[%s3181_s6 + $0x78] sm:$0xff] %v2714_v51  ;;  %2747 = vst [vmem:[%s3181_s6 + $0x80] sm:$0xff] %v2715_v2  ;;  %v2721_v56 = vadd.f32 %v2689_v45, %v2657_v52  ;;  %v2728_v12 = vadd.f32 %v2696_v9, %v2664_v38 }
 0x253   : > { %2745 = vst [vmem:[%s3181_s6 + $0x70] sm:$0xff] %v2713_v17  ;;  %2750 = vst [vmem:[%s3181_s6 + $0x98] sm:$0xff] %v2718_v29 }
 0x254   : > { %2751 = vst [vmem:[%s3181_s6 + $0xa0] sm:$0xff] %v2719_v19  ;;  %2753 = vst [vmem:[%s3181_s6 + $0xb0] sm:$0xff] %v2721_v56  ;;  %v2698_v25 = vld [vmem:[#allocation3 + $0xf8] sm:$0xff] }
 0x255   : > { %v2697_v26 = vld [vmem:[#allocation3 + $0xf0] sm:$0xff]  ;;  %2758 = vst [vmem:[%s3181_s6 + $0xd8] sm:$0xff] %v2726_v50  ;;  %v2730_v5 = vadd.f32 %v2698_v25, %v2666_v6  ;;  %2760 = vst [vmem:[%s3181_s6 + $0xe8] sm:$0xff] %v2728_v12 }
 0x256   : > { %v2729_v4 = vadd.f32 %v2697_v26, %v2665_v61 }
 0x257   : > { %2762 = vst [vmem:[%s3181_s6 + $0xf8] sm:$0xff] %v2730_v5 }
 0x258   : > { %2761 = vst [vmem:[%s3181_s6 + $0xf0] sm:$0xff] %v2729_v4 }
 0x259 PF: > { %s15_s22 = sadd.s32 1, %s3108_s22   ;;  %s5102_s18 = smov %s3100_s20 }
 0x25a   : > { %p12_p8 = scmp.ge.s32.totalorder %s15_s22, 8   ;;  %s5103_s19 = smov %s3104_s21 }
 0x25b   : > { %s5104_s20 = smov %s5107_s23  ;;  %s5105_s21 = smov %s5111_s24 }
 0x25c   :  { %14 = sbr.rel (!%p12_p8) target bundleno = 3 (0x3), region = 84 }

</bundles_post_ra>
